<compile_context>
chip_gen: v6e
topology: v6e:2x2x1
jax: 0.10.0
libtpu: 0.0.40
codegen_flags: <defaults>
</compile_context>

<pallas_src>
import math
import numpy as np
import jax
import jax.numpy as jnp
from jax.experimental import pallas as pl
from jax.experimental.pallas import tpu as pltpu

# ------------------------- configuration (small shapes) -------------------------
B = 2
NUM_FRAMES = 4
NUM_HIST = 3
NUM_PRED = 1
IMG = 32
PS = 8                                   # patch size
HP = IMG // PS                           # patches per side (4)
NPATCH = HP * HP                         # 16
T_ROWS = NUM_FRAMES * NPATCH             # 64 patch-rows per batch element
SEQ = NUM_HIST * NPATCH                  # 48 predictor tokens
D_VIS = 112                              # encoder.emb_dim
PROPRIO_RAW = 5
ACTION_RAW = 6
PROPRIO_EMB = 4                          # proprio_encoder output dim
ACTION_EMB = 4                           # action_encoder output dim
NUM_PROPRIO_REPEAT = 2
NUM_ACTION_REPEAT = 2
CONCAT_DIM = 1
PROPRIO_DIM = PROPRIO_EMB * NUM_PROPRIO_REPEAT      # 8 (after repeat)
ACTION_DIM = ACTION_EMB * NUM_ACTION_REPEAT         # 8 (after repeat)
EMB_DIM = D_VIS + (PROPRIO_DIM + ACTION_DIM) * CONCAT_DIM   # 128 (one lane width)
D_FF = 256
PIX = 3 * PS * PS                        # 192 pixels per patch
DECODER_LATENT_LOSS_WEIGHT = 0.25


# ------------------------------ the fused kernel --------------------------------
def _fused_forward_kernel(
        patches_ref, prop_ref, act_ref, mask_ref,
        enc_wv_ref, enc_wp_ref, enc_wa_ref, enc_b_ref,
        wqkv_ref, wo_ref, g1_ref, be1_ref, w1_ref, b1_ref,
        w2_ref, b2_ref, g2_ref, be2_ref,
        dec_w_ref, dec_b_ref,
        zpred_ref, px_pred_ref, px_rec_ref, partials_ref):
    bf16 = jnp.bfloat16
    f32 = jnp.float32

    # ---- fused encoder: block-diagonal linear assembled via 3 dots ----
    # z = [visual(112) | proprio_emb x2 (8) | action_emb x2 (8)]  (concat_dim == 1)
    patches = patches_ref[0]                                   # (64, 192) f32
    z = (jnp.dot(patches.astype(bf16), enc_wv_ref[...],
                 preferred_element_type=f32)
         + jnp.dot(prop_ref[0].astype(bf16), enc_wp_ref[...],
                   preferred_element_type=f32)
         + jnp.dot(act_ref[0].astype(bf16), enc_wa_ref[...],
                   preferred_element_type=f32)
         + enc_b_ref[...])                                     # (64, 128) f32

    x = z[:SEQ]                                                # z_src  (frames 0..2)
    z_tgt = z[NPATCH:]                                         # z_tgt  (frames 1..3)

    # ---- predictor: one pre-LN masked transformer block (single head) ----
    # fused QKV; 1/sqrt(d) folded into Wq; additive 0/-1e9 frame mask;
    # bf16 matmul operands, f32 accumulation.
    mu = jnp.mean(x, axis=-1, keepdims=True)
    var = jnp.mean(jnp.square(x - mu), axis=-1, keepdims=True)
    xn = (x - mu) * jax.lax.rsqrt(var + 1e-5) * g1_ref[...] + be1_ref[...]
    qkv = jnp.dot(xn.astype(bf16), wqkv_ref[...],
                  preferred_element_type=f32)                  # (48, 384)
    q = qkv[:, :EMB_DIM]
    k = qkv[:, EMB_DIM:2 * EMB_DIM]
    v = qkv[:, 2 * EMB_DIM:]
    s = jax.lax.dot_general(q.astype(bf16), k.astype(bf16),
                            (((1,), (1,)), ((), ())),
                            preferred_element_type=f32)
    s = s + mask_ref[...]                                      # (48, 48)
    m = jnp.max(s, axis=-1, keepdims=True)
    p = jnp.exp(s - m)
    attn = p * pl.reciprocal(jnp.sum(p, axis=-1, keepdims=True), approx=True)
    a = jnp.dot(attn.astype(bf16), v.astype(bf16), preferred_element_type=f32)
    x = x + jnp.dot(a.astype(bf16), wo_ref[...], preferred_element_type=f32)

    mu2 = jnp.mean(x, axis=-1, keepdims=True)
    var2 = jnp.mean(jnp.square(x - mu2), axis=-1, keepdims=True)
    xn2 = (x - mu2) * jax.lax.rsqrt(var2 + 1e-5) * g2_ref[...] + be2_ref[...]
    h = jnp.dot(xn2.astype(bf16), w1_ref[...], preferred_element_type=f32) + b1_ref[...]
    # TODO(synk): PyTorch nn.GELU default is exact erf GELU; tanh approximation here.
    h = jax.nn.gelu(h, approximate=True)
    x = x + jnp.dot(h.astype(bf16), w2_ref[...], preferred_element_type=f32) + b2_ref[...]
    zpred_ref[0] = x                                           # (48, 128)

    # ---- decoder on z_pred (48 rows) and z (64 rows); full 128-wide inputs ----
    px_pred = (jnp.dot(x.astype(bf16), dec_w_ref[...], preferred_element_type=f32)
               + dec_b_ref[...])                               # (48, 192)
    px_rec = (jnp.dot(z.astype(bf16), dec_w_ref[...], preferred_element_type=f32)
              + dec_b_ref[...])                                # (64, 192)
    px_pred_ref[0] = px_pred
    px_rec_ref[0] = px_rec

    # ---- loss partial sums (per batch element), static sublane-aligned slices ----
    lane = jax.lax.broadcasted_iota(jnp.int32, (1, EMB_DIM), 1)

    # z losses: reduce over sublanes first, lane-mask the tiny (1,128) vector.
    dz = x - z_tgt
    col = jnp.sum(dz * dz, axis=0, keepdims=True)              # (1, 128)
    sse_z_vis = jnp.sum(jnp.where(lane < D_VIS, col, 0.0))
    sse_z_prop = jnp.sum(jnp.where(
        (lane >= D_VIS) & (lane < D_VIS + PROPRIO_DIM), col, 0.0))

    # decoder "VQ diff" (mean of squared decoded pixels) and recon SSEs.
    tgt_pred = patches[NPATCH:]                                # frames 1..3 targets
    dp = px_pred - tgt_pred
    dr = px_rec - patches
    sse_sq_pred = jnp.sum(px_pred * px_pred)
    sse_d_pred = jnp.sum(dp * dp)
    sse_sq_rec = jnp.sum(px_rec * px_rec)
    sse_d_rec = jnp.sum(dr * dr)

    vec = (jnp.where(lane == 0, sse_z_vis, 0.0)
           + jnp.where(lane == 1, sse_z_prop, 0.0)
           + jnp.where(lane == 2, sse_sq_pred, 0.0)
           + jnp.where(lane == 3, sse_d_pred, 0.0)
           + jnp.where(lane == 4, sse_sq_rec, 0.0)
           + jnp.where(lane == 5, sse_d_rec, 0.0))
    partials_ref[0] = vec                                      # (1, 128) lane-dense


def fused_forward_pallas(patches, prop_bcast, act_bcast, mask_bias, p):
    """One launch for encoder + predictor + decoder + all loss partial sums.

    patches:    (b, 64, 192) f32   prop_bcast: (b, 64, 5) f32
    act_bcast:  (b, 64, 6)  f32    mask_bias:  (48, 48)   f32
    Returns (z_pred (b,48,128), px_pred (b,48,192), px_rec (b,64,192),
             partials (b,1,128)).
    """
    b = patches.shape[0]

    def const2(shape):
        return pl.BlockSpec(shape, lambda i: (0, 0))

    def batched3(shape):
        return pl.BlockSpec(shape, lambda i: (i, 0, 0))

    flops_per_b = (2 * T_ROWS * (PIX + PROPRIO_RAW + ACTION_RAW) * EMB_DIM   # encoder
                   + 2 * SEQ * EMB_DIM * 3 * EMB_DIM                          # qkv
                   + 4 * SEQ * SEQ * EMB_DIM                                  # attn
                   + 2 * SEQ * EMB_DIM * EMB_DIM                              # out proj
                   + 4 * SEQ * EMB_DIM * D_FF                                 # mlp
                   + 2 * (SEQ + T_ROWS) * EMB_DIM * PIX)                      # decoder
    bytes_per_b = (T_ROWS * (PIX + PROPRIO_RAW + ACTION_RAW) * 4
                   + SEQ * EMB_DIM * 4 + (SEQ + T_ROWS) * PIX * 4 + EMB_DIM * 4)
    weight_bytes = 2 * (PIX * EMB_DIM + (PROPRIO_RAW + ACTION_RAW) * EMB_DIM
                        + EMB_DIM * 3 * EMB_DIM + EMB_DIM * EMB_DIM
                        + 2 * EMB_DIM * D_FF + EMB_DIM * PIX)

    return pl.pallas_call(
        _fused_forward_kernel,
        out_shape=(
            jax.ShapeDtypeStruct((b, SEQ, EMB_DIM), jnp.float32),   # z_pred
            jax.ShapeDtypeStruct((b, SEQ, PIX), jnp.float32),       # decoded pred
            jax.ShapeDtypeStruct((b, T_ROWS, PIX), jnp.float32),    # decoded recon
            jax.ShapeDtypeStruct((b, 1, EMB_DIM), jnp.float32),     # loss partials
        ),
        grid=(b,),
        in_specs=[
            batched3((1, T_ROWS, PIX)),
            batched3((1, T_ROWS, PROPRIO_RAW)),
            batched3((1, T_ROWS, ACTION_RAW)),
            const2((SEQ, SEQ)),
            const2((PIX, EMB_DIM)),
            const2((PROPRIO_RAW, EMB_DIM)),
            const2((ACTION_RAW, EMB_DIM)),
            const2((1, EMB_DIM)),
            const2((EMB_DIM, 3 * EMB_DIM)),
            const2((EMB_DIM, EMB_DIM)),
            const2((1, EMB_DIM)), const2((1, EMB_DIM)),
            const2((EMB_DIM, D_FF)), const2((1, D_FF)),
            const2((D_FF, EMB_DIM)), const2((1, EMB_DIM)),
            const2((1, EMB_DIM)), const2((1, EMB_DIM)),
            const2((EMB_DIM, PIX)), const2((1, PIX)),
        ],
        out_specs=(
            batched3((1, SEQ, EMB_DIM)),
            batched3((1, SEQ, PIX)),
            batched3((1, T_ROWS, PIX)),
            batched3((1, 1, EMB_DIM)),
        ),
        compiler_params=pltpu.CompilerParams(
            dimension_semantics=("parallel",)),
        cost_estimate=pl.CostEstimate(
            flops=b * flops_per_b,
            transcendentals=b * (SEQ * SEQ + SEQ * D_FF + 6 * SEQ),
            bytes_accessed=b * bytes_per_b + weight_bytes),
    )(patches, prop_bcast, act_bcast, mask_bias,
      p["enc_wv"], p["enc_wp"], p["enc_wa"], p["enc_b"],
      p["wqkv"], p["wo"], p["g1"], p["beta1"], p["w1"], p["b1"],
      p["w2"], p["b2"], p["g2"], p["beta2"],
      p["dec_w"], p["dec_b"])


# ---------------------------------- glue utils ----------------------------------
def patchify(x, ps):
    # x: (N, C, H, W) NCHW -> (N, num_patches, C*ps*ps)  (channel-major patches)
    N, C, H, W = x.shape
    x = x.reshape(N, C, H // ps, ps, W // ps, ps)
    x = x.transpose(0, 2, 4, 1, 3, 5)
    return x.reshape(N, (H // ps) * (W // ps), C * ps * ps)


def unpatchify(px, ps, hp, wp, C=3):
    # px: (N, num_patches, C*ps*ps) -> (N, C, H, W)
    N = px.shape[0]
    x = px.reshape(N, hp, wp, C, ps, ps)
    x = x.transpose(0, 3, 1, 4, 2, 5)
    return x.reshape(N, C, hp * ps, wp * ps)


def generate_mask_matrix(npatch, nwindow):
    # block lower-triangular frame mask, same semantics as the PyTorch helper
    frame = np.tril(np.ones((nwindow, nwindow), np.float32))
    return np.kron(frame, np.ones((npatch, npatch), np.float32))  # (S, S)


# ---------------------------------- the model -----------------------------------
class VWorldModelPallas:
    def __init__(self, key):
        self.num_hist = NUM_HIST
        self.num_pred = NUM_PRED
        self.num_proprio_repeat = NUM_PROPRIO_REPEAT
        self.num_action_repeat = NUM_ACTION_REPEAT
        self.proprio_dim = PROPRIO_DIM
        self.action_dim = ACTION_DIM
        self.concat_dim = CONCAT_DIM
        self.emb_dim = EMB_DIM
        self.decoder_latent_loss_weight = DECODER_LATENT_LOSS_WEIGHT
        # encoder.name does not contain 'dino' -> encoder_transform is identity
        # TODO(synk): torchvision Resize (encoder_transform for DINO encoders) has no
        # Pallas equivalent here; the identity-transform branch is used instead.

        def dense(k, fi, fo):
            return (0.02 * jax.random.normal(k, (fi, fo), jnp.float32),
                    jnp.zeros((fo,), jnp.float32))

        ks = jax.random.split(key, 10)
        enc_w, enc_b = dense(ks[0], PIX, D_VIS)
        prop_w, prop_b = dense(ks[1], PROPRIO_RAW, PROPRIO_EMB)
        act_w, act_b = dense(ks[2], ACTION_RAW, ACTION_EMB)
        wq, _ = dense(ks[3], EMB_DIM, EMB_DIM)
        wk, _ = dense(ks[4], EMB_DIM, EMB_DIM)
        wv, _ = dense(ks[5], EMB_DIM, EMB_DIM)
        wo, _ = dense(ks[6], EMB_DIM, EMB_DIM)
        w1, b1 = dense(ks[7], EMB_DIM, D_FF)
        w2, b2 = dense(ks[8], D_FF, EMB_DIM)
        dec_w, dec_b = dense(ks[9], D_VIS, PIX)

        p = {}

        # --- fused encoder weights (block diagonal, split per input ref) ---
        wv_full = jnp.zeros((PIX, EMB_DIM), jnp.float32).at[:, :D_VIS].set(enc_w)
        wp_full = jnp.zeros((PROPRIO_RAW, EMB_DIM), jnp.float32)
        wp_full = wp_full.at[:, D_VIS:D_VIS + PROPRIO_EMB].set(prop_w)
        wp_full = wp_full.at[:, D_VIS + PROPRIO_EMB:D_VIS + PROPRIO_DIM].set(prop_w)
        wa_full = jnp.zeros((ACTION_RAW, EMB_DIM), jnp.float32)
        wa_full = wa_full.at[:, D_VIS + PROPRIO_DIM:
                             D_VIS + PROPRIO_DIM + ACTION_EMB].set(act_w)
        wa_full = wa_full.at[:, D_VIS + PROPRIO_DIM + ACTION_EMB:].set(act_w)
        p["enc_wv"] = wv_full.astype(jnp.bfloat16)
        p["enc_wp"] = wp_full.astype(jnp.bfloat16)
        p["enc_wa"] = wa_full.astype(jnp.bfloat16)
        p["enc_b"] = jnp.concatenate(
            [enc_b, prop_b, prop_b, act_b, act_b]).reshape(1, EMB_DIM)

        # --- predictor: fused QKV, 1/sqrt(d) folded into Wq, bf16 weights ---
        wq_scaled = wq * (1.0 / math.sqrt(EMB_DIM))
        p["wqkv"] = jnp.concatenate([wq_scaled, wk, wv], axis=1).astype(jnp.bfloat16)
        p["wo"] = wo.astype(jnp.bfloat16)
        p["w1"] = w1.astype(jnp.bfloat16)
        p["b1"] = b1.reshape(1, D_FF)
        p["w2"] = w2.astype(jnp.bfloat16)
        p["b2"] = b2.reshape(1, EMB_DIM)
        p["g1"] = jnp.ones((1, EMB_DIM), jnp.float32)
        p["beta1"] = jnp.zeros((1, EMB_DIM), jnp.float32)
        p["g2"] = jnp.ones((1, EMB_DIM), jnp.float32)
        p["beta2"] = jnp.zeros((1, EMB_DIM), jnp.float32)

        # --- decoder: zero-padded from 112 to the full 128 input rows, 192 out lanes ---
        dw = jnp.zeros((EMB_DIM, PIX), jnp.float32).at[:D_VIS, :].set(dec_w)
        p["dec_w"] = dw.astype(jnp.bfloat16)
        p["dec_b"] = dec_b.reshape(1, PIX)

        self.params = p

        # additive attention mask bias (0 where visible, -1e9 where masked)
        mask = generate_mask_matrix(NPATCH, NUM_HIST)                   # (SEQ, SEQ)
        self.mask_bias = jnp.asarray(np.where(mask > 0.0, 0.0, -1e9), jnp.float32)

    # ----- forward -----
    def forward(self, obs, act):
        loss_components = {}
        visual = obs["visual"]                          # (b, t, 3, H, W) NCHW
        b, t = visual.shape[:2]

        # patchify once (shared by encoder and decoder recon targets)
        patches = patchify(visual.reshape(b * t, 3, IMG, IMG), PS)
        patches = patches.reshape(b, t * NPATCH, PIX)                  # (b, 64, 192)

        # tiny per-patch broadcasts of raw proprio / action (a few KB; the concat,
        # padding, bf16 casts and all embedding matmuls happen inside the kernel)
        prop_bcast = jnp.broadcast_to(
            obs["proprio"][:, :, None, :], (b, t, NPATCH, PROPRIO_RAW)
        ).reshape(b, t * NPATCH, PROPRIO_RAW)
        act_bcast = jnp.broadcast_to(
            act[:, :, None, :], (b, t, NPATCH, ACTION_RAW)
        ).reshape(b, t * NPATCH, ACTION_RAW)

        # drop_rate_ub is None -> no random patch dropping (training-only path)
        # TODO(synk): .detach() on z / z_pred is a no-op in this forward-only version.
        z_pred_flat, px_pred, px_rec, partials = fused_forward_pallas(
            patches, prop_bcast, act_bcast, self.mask_bias, self.params)

        z_pred = z_pred_flat.reshape(b, NUM_HIST, NPATCH, EMB_DIM)
        visual_pred = unpatchify(
            px_pred.reshape(b * NUM_HIST, NPATCH, PIX), PS, HP, HP
        ).reshape(b, NUM_HIST, 3, IMG, IMG)
        visual_reconstructed = unpatchify(
            px_rec.reshape(b * t, NPATCH, PIX), PS, HP, HP
        ).reshape(b, t, 3, IMG, IMG)

        # ---- assemble losses from the per-batch partial SSEs ----
        psum = jnp.sum(partials[:, 0, :], axis=0)       # (128,) summed over batch
        n_z = b * NUM_HIST * NPATCH                     # 96 z rows
        n_pred = b * NUM_HIST * NPATCH * PIX            # pred pixels
        n_rec = b * t * NPATCH * PIX                    # recon pixels

        z_visual_loss = psum[0] / (n_z * D_VIS)
        z_proprio_loss = psum[1] / (n_z * PROPRIO_DIM)
        z_loss = (psum[0] + psum[1]) / (n_z * (D_VIS + PROPRIO_DIM))

        # MSE over unpatchified images equals MSE over the patch representation.
        diff_pred = psum[2] / n_pred
        recon_loss_pred = psum[3] / n_pred
        diff_recon = psum[4] / n_rec
        recon_loss_reconstructed = psum[5] / n_rec

        decoder_loss_pred = recon_loss_pred + self.decoder_latent_loss_weight * diff_pred
        loss_components["decoder_recon_loss_pred"] = recon_loss_pred
        loss_components["decoder_vq_loss_pred"] = diff_pred
        loss_components["decoder_loss_pred"] = decoder_loss_pred

        loss = z_loss
        loss_components["z_loss"] = z_loss
        loss_components["z_visual_loss"] = z_visual_loss
        loss_components["z_proprio_loss"] = z_proprio_loss

        decoder_loss_reconstructed = (recon_loss_reconstructed
                                      + self.decoder_latent_loss_weight * diff_recon)
        loss_components["decoder_recon_loss_reconstructed"] = recon_loss_reconstructed
        loss_components["decoder_vq_loss_reconstructed"] = diff_recon
        loss_components["decoder_loss_reconstructed"] = decoder_loss_reconstructed
        loss = loss + decoder_loss_reconstructed
        loss_components["loss"] = loss
        return z_pred, visual_pred, visual_reconstructed, loss, loss_components


# ------------------------------------ main ---------------------------------------
if __name__ == "__main__":
    model = VWorldModelPallas(jax.random.PRNGKey(0))

    k1, k2, k3 = jax.random.split(jax.random.PRNGKey(0), 3)
    visual = jax.random.normal(k1, (B, NUM_FRAMES, 3, IMG, IMG), jnp.float32)
    proprio = jax.random.normal(k2, (B, NUM_FRAMES, PROPRIO_RAW), jnp.float32)
    act = jax.random.normal(k3, (B, NUM_FRAMES, ACTION_RAW), jnp.float32)
    obs = {"visual": visual, "proprio": proprio}

    fwd = jax.jit(model.forward)
    z_pred, visual_pred, visual_recon, loss, comps = fwd(obs, act)
    jax.block_until_ready((z_pred, visual_pred, visual_recon, loss))

    assert z_pred.shape == (B, NUM_HIST, NPATCH, EMB_DIM)
    assert visual_pred.shape == (B, NUM_HIST, 3, IMG, IMG)
    assert visual_recon.shape == (B, NUM_FRAMES, 3, IMG, IMG)
    assert loss.shape == ()
    assert comps["loss"].shape == ()
    assert bool(jnp.isfinite(loss))
    print("KERNEL_OK")
</pallas_src>

<mosaic_0001>
module attributes {stable_mosaic.version = 11 : i64} {
  func.func @_fused_forward_kernel(%arg0: i32, %arg1: memref<1x64x192xf32, #tpu.memory_space<vmem>>, %arg2: memref<1x64x5xf32, #tpu.memory_space<vmem>>, %arg3: memref<1x64x6xf32, #tpu.memory_space<vmem>>, %arg4: memref<48x48xf32, #tpu.memory_space<vmem>>, %arg5: memref<192x128xbf16, #tpu.memory_space<vmem>>, %arg6: memref<5x128xbf16, #tpu.memory_space<vmem>>, %arg7: memref<6x128xbf16, #tpu.memory_space<vmem>>, %arg8: memref<1x128xf32, #tpu.memory_space<vmem>>, %arg9: memref<128x384xbf16, #tpu.memory_space<vmem>>, %arg10: memref<128x128xbf16, #tpu.memory_space<vmem>>, %arg11: memref<1x128xf32, #tpu.memory_space<vmem>>, %arg12: memref<1x128xf32, #tpu.memory_space<vmem>>, %arg13: memref<128x256xbf16, #tpu.memory_space<vmem>>, %arg14: memref<1x256xf32, #tpu.memory_space<vmem>>, %arg15: memref<256x128xbf16, #tpu.memory_space<vmem>>, %arg16: memref<1x128xf32, #tpu.memory_space<vmem>>, %arg17: memref<1x128xf32, #tpu.memory_space<vmem>>, %arg18: memref<1x128xf32, #tpu.memory_space<vmem>>, %arg19: memref<128x192xbf16, #tpu.memory_space<vmem>>, %arg20: memref<1x192xf32, #tpu.memory_space<vmem>>, %arg21: memref<1x48x128xf32, #tpu.memory_space<vmem>>, %arg22: memref<1x48x192xf32, #tpu.memory_space<vmem>>, %arg23: memref<1x64x192xf32, #tpu.memory_space<vmem>>, %arg24: memref<1x1x128xf32, #tpu.memory_space<vmem>>) attributes {dimension_semantics = [#tpu.dimension_semantics<parallel>], iteration_bounds = array<i64: 2>, scalar_prefetch = 0 : i64, scratch_operands = 0 : i64, tpu.core_type = #tpu.core_type<tc>, window_params = [{transform_indices = @transform_0, window_bounds = array<i64: 1, 64, 192>}, {transform_indices = @transform_1, window_bounds = array<i64: 1, 64, 5>}, {transform_indices = @transform_2, window_bounds = array<i64: 1, 64, 6>}, {pipeline_mode = #tpu.pipeline_mode<synchronous>, transform_indices = @transform_3, window_bounds = array<i64: 48, 48>}, {pipeline_mode = #tpu.pipeline_mode<synchronous>, transform_indices = @transform_4, window_bounds = array<i64: 192, 128>}, {pipeline_mode = #tpu.pipeline_mode<synchronous>, transform_indices = @transform_5, window_bounds = array<i64: 5, 128>}, {pipeline_mode = #tpu.pipeline_mode<synchronous>, transform_indices = @transform_6, window_bounds = array<i64: 6, 128>}, {pipeline_mode = #tpu.pipeline_mode<synchronous>, transform_indices = @transform_7, window_bounds = array<i64: 1, 128>}, {pipeline_mode = #tpu.pipeline_mode<synchronous>, transform_indices = @transform_8, window_bounds = array<i64: 128, 384>}, {pipeline_mode = #tpu.pipeline_mode<synchronous>, transform_indices = @transform_9, window_bounds = array<i64: 128, 128>}, {pipeline_mode = #tpu.pipeline_mode<synchronous>, transform_indices = @transform_10, window_bounds = array<i64: 1, 128>}, {pipeline_mode = #tpu.pipeline_mode<synchronous>, transform_indices = @transform_11, window_bounds = array<i64: 1, 128>}, {pipeline_mode = #tpu.pipeline_mode<synchronous>, transform_indices = @transform_12, window_bounds = array<i64: 128, 256>}, {pipeline_mode = #tpu.pipeline_mode<synchronous>, transform_indices = @transform_13, window_bounds = array<i64: 1, 256>}, {pipeline_mode = #tpu.pipeline_mode<synchronous>, transform_indices = @transform_14, window_bounds = array<i64: 256, 128>}, {pipeline_mode = #tpu.pipeline_mode<synchronous>, transform_indices = @transform_15, window_bounds = array<i64: 1, 128>}, {pipeline_mode = #tpu.pipeline_mode<synchronous>, transform_indices = @transform_16, window_bounds = array<i64: 1, 128>}, {pipeline_mode = #tpu.pipeline_mode<synchronous>, transform_indices = @transform_17, window_bounds = array<i64: 1, 128>}, {pipeline_mode = #tpu.pipeline_mode<synchronous>, transform_indices = @transform_18, window_bounds = array<i64: 128, 192>}, {pipeline_mode = #tpu.pipeline_mode<synchronous>, transform_indices = @transform_19, window_bounds = array<i64: 1, 192>}, {transform_indices = @transform_20, window_bounds = array<i64: 1, 48, 128>}, {transform_indices = @transform_21, window_bounds = array<i64: 1, 48, 192>}, {transform_indices = @transform_22, window_bounds = array<i64: 1, 64, 192>}, {transform_indices = @transform_23, window_bounds = array<i64: 1, 1, 128>}]} {
    %c0 = arith.constant 0 : index
    %c0_0 = arith.constant 0 : index
    %c0_1 = arith.constant 0 : index
    %0 = vector.load %arg1[%c0, %c0_0, %c0_1] : memref<1x64x192xf32, #tpu.memory_space<vmem>>, vector<1x64x192xf32>
    %1 = vector.shape_cast %0 : vector<1x64x192xf32> to vector<64x192xf32>
    %2 = arith.truncf %1 : vector<64x192xf32> to vector<64x192xbf16>
    %c0_2 = arith.constant 0 : index
    %c0_3 = arith.constant 0 : index
    %3 = vector.load %arg5[%c0_2, %c0_3] : memref<192x128xbf16, #tpu.memory_space<vmem>>, vector<192x128xbf16>
    %cst = arith.constant dense<0.000000e+00> : vector<64x128xf32>
    %4 = tpu.matmul %2, %3, %cst {dimension_numbers = #tpu.dot_dimension_numbers<[1], [0], [0], [1], [0, 0, 1, 1], [], []>} : vector<64x192xbf16>, vector<192x128xbf16>, vector<64x128xf32> -> vector<64x128xf32>
    %c0_4 = arith.constant 0 : index
    %c0_5 = arith.constant 0 : index
    %c0_6 = arith.constant 0 : index
    %5 = vector.load %arg2[%c0_4, %c0_5, %c0_6] : memref<1x64x5xf32, #tpu.memory_space<vmem>>, vector<1x64x5xf32>
    %6 = vector.shape_cast %5 : vector<1x64x5xf32> to vector<64x5xf32>
    %7 = arith.truncf %6 : vector<64x5xf32> to vector<64x5xbf16>
    %c0_7 = arith.constant 0 : index
    %c0_8 = arith.constant 0 : index
    %8 = vector.load %arg6[%c0_7, %c0_8] : memref<5x128xbf16, #tpu.memory_space<vmem>>, vector<5x128xbf16>
    %cst_9 = arith.constant dense<0.000000e+00> : vector<64x128xf32>
    %9 = tpu.matmul %7, %8, %cst_9 {dimension_numbers = #tpu.dot_dimension_numbers<[1], [0], [0], [1], [0, 0, 1, 1], [], []>} : vector<64x5xbf16>, vector<5x128xbf16>, vector<64x128xf32> -> vector<64x128xf32>
    %10 = arith.addf %4, %9 : vector<64x128xf32>
    %c0_10 = arith.constant 0 : index
    %c0_11 = arith.constant 0 : index
    %c0_12 = arith.constant 0 : index
    %11 = vector.load %arg3[%c0_10, %c0_11, %c0_12] : memref<1x64x6xf32, #tpu.memory_space<vmem>>, vector<1x64x6xf32>
    %12 = vector.shape_cast %11 : vector<1x64x6xf32> to vector<64x6xf32>
    %13 = arith.truncf %12 : vector<64x6xf32> to vector<64x6xbf16>
    %c0_13 = arith.constant 0 : index
    %c0_14 = arith.constant 0 : index
    %14 = vector.load %arg7[%c0_13, %c0_14] : memref<6x128xbf16, #tpu.memory_space<vmem>>, vector<6x128xbf16>
    %cst_15 = arith.constant dense<0.000000e+00> : vector<64x128xf32>
    %15 = tpu.matmul %13, %14, %cst_15 {dimension_numbers = #tpu.dot_dimension_numbers<[1], [0], [0], [1], [0, 0, 1, 1], [], []>} : vector<64x6xbf16>, vector<6x128xbf16>, vector<64x128xf32> -> vector<64x128xf32>
    %16 = arith.addf %10, %15 : vector<64x128xf32>
    %c0_16 = arith.constant 0 : index
    %c0_17 = arith.constant 0 : index
    %17 = vector.load %arg8[%c0_16, %c0_17] : memref<1x128xf32, #tpu.memory_space<vmem>>, vector<1x128xf32>
    %18 = vector.broadcast %17 : vector<1x128xf32> to vector<64x128xf32>
    %19 = arith.addf %16, %18 : vector<64x128xf32>
    %20 = vector.extract_strided_slice %19 {offsets = [0, 0], sizes = [48, 128], strides = [1, 1]} : vector<64x128xf32> to vector<48x128xf32>
    %21 = vector.extract_strided_slice %19 {offsets = [16, 0], sizes = [48, 128], strides = [1, 1]} : vector<64x128xf32> to vector<48x128xf32>
    %cst_18 = arith.constant dense<0.000000e+00> : vector<48xf32>
    %22 = vector.multi_reduction <add>, %20, %cst_18 [1] : vector<48x128xf32> to vector<48xf32>
    %23 = vector.shape_cast %22 : vector<48xf32> to vector<48x1xf32>
    %cst_19 = arith.constant 1.280000e+02 : f32
    %24 = vector.broadcast %cst_19 : f32 to vector<48x1xf32>
    %25 = arith.divf %23, %24 : vector<48x1xf32>
    %26 = vector.broadcast %25 : vector<48x1xf32> to vector<48x128xf32>
    %27 = arith.subf %20, %26 : vector<48x128xf32>
    %28 = arith.mulf %27, %27 : vector<48x128xf32>
    %cst_20 = arith.constant dense<0.000000e+00> : vector<48xf32>
    %29 = vector.multi_reduction <add>, %28, %cst_20 [1] : vector<48x128xf32> to vector<48xf32>
    %30 = vector.shape_cast %29 : vector<48xf32> to vector<48x1xf32>
    %cst_21 = arith.constant 1.280000e+02 : f32
    %31 = vector.broadcast %cst_21 : f32 to vector<48x1xf32>
    %32 = arith.divf %30, %31 : vector<48x1xf32>
    %33 = vector.broadcast %25 : vector<48x1xf32> to vector<48x128xf32>
    %34 = arith.subf %20, %33 : vector<48x128xf32>
    %cst_22 = arith.constant 9.99999974E-6 : f32
    %35 = vector.broadcast %cst_22 : f32 to vector<48x1xf32>
    %36 = arith.addf %32, %35 : vector<48x1xf32>
    %37 = math.rsqrt %36 : vector<48x1xf32>
    %38 = vector.broadcast %37 : vector<48x1xf32> to vector<48x128xf32>
    %39 = arith.mulf %34, %38 : vector<48x128xf32>
    %c0_23 = arith.constant 0 : index
    %c0_24 = arith.constant 0 : index
    %40 = vector.load %arg11[%c0_23, %c0_24] : memref<1x128xf32, #tpu.memory_space<vmem>>, vector<1x128xf32>
    %41 = vector.broadcast %40 : vector<1x128xf32> to vector<48x128xf32>
    %42 = arith.mulf %39, %41 : vector<48x128xf32>
    %c0_25 = arith.constant 0 : index
    %c0_26 = arith.constant 0 : index
    %43 = vector.load %arg12[%c0_25, %c0_26] : memref<1x128xf32, #tpu.memory_space<vmem>>, vector<1x128xf32>
    %44 = vector.broadcast %43 : vector<1x128xf32> to vector<48x128xf32>
    %45 = arith.addf %42, %44 : vector<48x128xf32>
    %46 = arith.truncf %45 : vector<48x128xf32> to vector<48x128xbf16>
    %c0_27 = arith.constant 0 : index
    %c0_28 = arith.constant 0 : index
    %47 = vector.load %arg9[%c0_27, %c0_28] : memref<128x384xbf16, #tpu.memory_space<vmem>>, vector<128x384xbf16>
    %cst_29 = arith.constant dense<0.000000e+00> : vector<48x384xf32>
    %48 = tpu.matmul %46, %47, %cst_29 {dimension_numbers = #tpu.dot_dimension_numbers<[1], [0], [0], [1], [0, 0, 1, 1], [], []>} : vector<48x128xbf16>, vector<128x384xbf16>, vector<48x384xf32> -> vector<48x384xf32>
    %49 = vector.extract_strided_slice %48 {offsets = [0, 0], sizes = [48, 128], strides = [1, 1]} : vector<48x384xf32> to vector<48x128xf32>
    %50 = vector.extract_strided_slice %48 {offsets = [0, 128], sizes = [48, 128], strides = [1, 1]} : vector<48x384xf32> to vector<48x128xf32>
    %51 = vector.extract_strided_slice %48 {offsets = [0, 256], sizes = [48, 128], strides = [1, 1]} : vector<48x384xf32> to vector<48x128xf32>
    %52 = arith.truncf %49 : vector<48x128xf32> to vector<48x128xbf16>
    %53 = arith.truncf %50 : vector<48x128xf32> to vector<48x128xbf16>
    %cst_30 = arith.constant dense<0.000000e+00> : vector<48x48xf32>
    %54 = tpu.matmul %52, %53, %cst_30 {dimension_numbers = #tpu.dot_dimension_numbers<[1], [1], [0], [0], [0, 0, 1, 0], [], []>} : vector<48x128xbf16>, vector<48x128xbf16>, vector<48x48xf32> -> vector<48x48xf32>
    %c0_31 = arith.constant 0 : index
    %c0_32 = arith.constant 0 : index
    %55 = vector.load %arg4[%c0_31, %c0_32] : memref<48x48xf32, #tpu.memory_space<vmem>>, vector<48x48xf32>
    %56 = arith.addf %54, %55 : vector<48x48xf32>
    %cst_33 = arith.constant dense<0xFF800000> : vector<48xf32>
    %57 = vector.multi_reduction <maximumf>, %56, %cst_33 [1] : vector<48x48xf32> to vector<48xf32>
    %58 = vector.shape_cast %57 : vector<48xf32> to vector<48x1xf32>
    %59 = vector.broadcast %58 : vector<48x1xf32> to vector<48x48xf32>
    %60 = arith.subf %56, %59 : vector<48x48xf32>
    %61 = math.exp %60 : vector<48x48xf32>
    %cst_34 = arith.constant dense<0.000000e+00> : vector<48xf32>
    %62 = vector.multi_reduction <add>, %61, %cst_34 [1] : vector<48x48xf32> to vector<48xf32>
    %63 = vector.shape_cast %62 : vector<48xf32> to vector<48x1xf32>
    %64 = tpu.reciprocal %63 {approx = true} : vector<48x1xf32> -> vector<48x1xf32>
    %65 = vector.broadcast %64 : vector<48x1xf32> to vector<48x48xf32>
    %66 = arith.mulf %61, %65 : vector<48x48xf32>
    %67 = arith.truncf %66 : vector<48x48xf32> to vector<48x48xbf16>
    %68 = arith.truncf %51 : vector<48x128xf32> to vector<48x128xbf16>
    %cst_35 = arith.constant dense<0.000000e+00> : vector<48x128xf32>
    %69 = tpu.matmul %67, %68, %cst_35 {dimension_numbers = #tpu.dot_dimension_numbers<[1], [0], [0], [1], [0, 0, 1, 1], [], []>} : vector<48x48xbf16>, vector<48x128xbf16>, vector<48x128xf32> -> vector<48x128xf32>
    %70 = arith.truncf %69 : vector<48x128xf32> to vector<48x128xbf16>
    %c0_36 = arith.constant 0 : index
    %c0_37 = arith.constant 0 : index
    %71 = vector.load %arg10[%c0_36, %c0_37] : memref<128x128xbf16, #tpu.memory_space<vmem>>, vector<128x128xbf16>
    %cst_38 = arith.constant dense<0.000000e+00> : vector<48x128xf32>
    %72 = tpu.matmul %70, %71, %cst_38 {dimension_numbers = #tpu.dot_dimension_numbers<[1], [0], [0], [1], [0, 0, 1, 1], [], []>} : vector<48x128xbf16>, vector<128x128xbf16>, vector<48x128xf32> -> vector<48x128xf32>
    %73 = arith.addf %20, %72 : vector<48x128xf32>
    %cst_39 = arith.constant dense<0.000000e+00> : vector<48xf32>
    %74 = vector.multi_reduction <add>, %73, %cst_39 [1] : vector<48x128xf32> to vector<48xf32>
    %75 = vector.shape_cast %74 : vector<48xf32> to vector<48x1xf32>
    %cst_40 = arith.constant 1.280000e+02 : f32
    %76 = vector.broadcast %cst_40 : f32 to vector<48x1xf32>
    %77 = arith.divf %75, %76 : vector<48x1xf32>
    %78 = vector.broadcast %77 : vector<48x1xf32> to vector<48x128xf32>
    %79 = arith.subf %73, %78 : vector<48x128xf32>
    %80 = arith.mulf %79, %79 : vector<48x128xf32>
    %cst_41 = arith.constant dense<0.000000e+00> : vector<48xf32>
    %81 = vector.multi_reduction <add>, %80, %cst_41 [1] : vector<48x128xf32> to vector<48xf32>
    %82 = vector.shape_cast %81 : vector<48xf32> to vector<48x1xf32>
    %cst_42 = arith.constant 1.280000e+02 : f32
    %83 = vector.broadcast %cst_42 : f32 to vector<48x1xf32>
    %84 = arith.divf %82, %83 : vector<48x1xf32>
    %85 = vector.broadcast %77 : vector<48x1xf32> to vector<48x128xf32>
    %86 = arith.subf %73, %85 : vector<48x128xf32>
    %cst_43 = arith.constant 9.99999974E-6 : f32
    %87 = vector.broadcast %cst_43 : f32 to vector<48x1xf32>
    %88 = arith.addf %84, %87 : vector<48x1xf32>
    %89 = math.rsqrt %88 : vector<48x1xf32>
    %90 = vector.broadcast %89 : vector<48x1xf32> to vector<48x128xf32>
    %91 = arith.mulf %86, %90 : vector<48x128xf32>
    %c0_44 = arith.constant 0 : index
    %c0_45 = arith.constant 0 : index
    %92 = vector.load %arg17[%c0_44, %c0_45] : memref<1x128xf32, #tpu.memory_space<vmem>>, vector<1x128xf32>
    %93 = vector.broadcast %92 : vector<1x128xf32> to vector<48x128xf32>
    %94 = arith.mulf %91, %93 : vector<48x128xf32>
    %c0_46 = arith.constant 0 : index
    %c0_47 = arith.constant 0 : index
    %95 = vector.load %arg18[%c0_46, %c0_47] : memref<1x128xf32, #tpu.memory_space<vmem>>, vector<1x128xf32>
    %96 = vector.broadcast %95 : vector<1x128xf32> to vector<48x128xf32>
    %97 = arith.addf %94, %96 : vector<48x128xf32>
    %98 = arith.truncf %97 : vector<48x128xf32> to vector<48x128xbf16>
    %c0_48 = arith.constant 0 : index
    %c0_49 = arith.constant 0 : index
    %99 = vector.load %arg13[%c0_48, %c0_49] : memref<128x256xbf16, #tpu.memory_space<vmem>>, vector<128x256xbf16>
    %cst_50 = arith.constant dense<0.000000e+00> : vector<48x256xf32>
    %100 = tpu.matmul %98, %99, %cst_50 {dimension_numbers = #tpu.dot_dimension_numbers<[1], [0], [0], [1], [0, 0, 1, 1], [], []>} : vector<48x128xbf16>, vector<128x256xbf16>, vector<48x256xf32> -> vector<48x256xf32>
    %c0_51 = arith.constant 0 : index
    %c0_52 = arith.constant 0 : index
    %101 = vector.load %arg14[%c0_51, %c0_52] : memref<1x256xf32, #tpu.memory_space<vmem>>, vector<1x256xf32>
    %102 = vector.broadcast %101 : vector<1x256xf32> to vector<48x256xf32>
    %103 = arith.addf %100, %102 : vector<48x256xf32>
    %104 = arith.mulf %103, %103 : vector<48x256xf32>
    %105 = arith.mulf %103, %104 : vector<48x256xf32>
    %cst_53 = arith.constant 4.471500e-02 : f32
    %106 = vector.broadcast %cst_53 : f32 to vector<48x256xf32>
    %107 = arith.mulf %106, %105 : vector<48x256xf32>
    %108 = arith.addf %103, %107 : vector<48x256xf32>
    %cst_54 = arith.constant 0.797884583 : f32
    %109 = vector.broadcast %cst_54 : f32 to vector<48x256xf32>
    %110 = arith.mulf %109, %108 : vector<48x256xf32>
    %111 = math.tanh %110 : vector<48x256xf32>
    %cst_55 = arith.constant 1.000000e+00 : f32
    %112 = vector.broadcast %cst_55 : f32 to vector<48x256xf32>
    %113 = arith.addf %112, %111 : vector<48x256xf32>
    %cst_56 = arith.constant 5.000000e-01 : f32
    %114 = vector.broadcast %cst_56 : f32 to vector<48x256xf32>
    %115 = arith.mulf %114, %113 : vector<48x256xf32>
    %116 = arith.mulf %103, %115 : vector<48x256xf32>
    %117 = arith.truncf %116 : vector<48x256xf32> to vector<48x256xbf16>
    %c0_57 = arith.constant 0 : index
    %c0_58 = arith.constant 0 : index
    %118 = vector.load %arg15[%c0_57, %c0_58] : memref<256x128xbf16, #tpu.memory_space<vmem>>, vector<256x128xbf16>
    %cst_59 = arith.constant dense<0.000000e+00> : vector<48x128xf32>
    %119 = tpu.matmul %117, %118, %cst_59 {dimension_numbers = #tpu.dot_dimension_numbers<[1], [0], [0], [1], [0, 0, 1, 1], [], []>} : vector<48x256xbf16>, vector<256x128xbf16>, vector<48x128xf32> -> vector<48x128xf32>
    %120 = arith.addf %73, %119 : vector<48x128xf32>
    %c0_60 = arith.constant 0 : index
    %c0_61 = arith.constant 0 : index
    %121 = vector.load %arg16[%c0_60, %c0_61] : memref<1x128xf32, #tpu.memory_space<vmem>>, vector<1x128xf32>
    %122 = vector.broadcast %121 : vector<1x128xf32> to vector<48x128xf32>
    %123 = arith.addf %120, %122 : vector<48x128xf32>
    %c0_62 = arith.constant 0 : index
    %c0_63 = arith.constant 0 : index
    %c0_64 = arith.constant 0 : index
    %124 = vector.load %arg21[%c0_62, %c0_63, %c0_64] : memref<1x48x128xf32, #tpu.memory_space<vmem>>, vector<1x48x128xf32>
    %125 = vector.shape_cast %124 : vector<1x48x128xf32> to vector<48x128xf32>
    %126 = vector.shape_cast %123 : vector<48x128xf32> to vector<1x48x128xf32>
    tpu.vector_store %arg21[%c0_62, %c0_63, %c0_64], %126 {strides = array<i32>} : memref<1x48x128xf32, #tpu.memory_space<vmem>>, vector<1x48x128xf32>,
    %127 = arith.truncf %123 : vector<48x128xf32> to vector<48x128xbf16>
    %c0_65 = arith.constant 0 : index
    %c0_66 = arith.constant 0 : index
    %128 = vector.load %arg19[%c0_65, %c0_66] : memref<128x192xbf16, #tpu.memory_space<vmem>>, vector<128x192xbf16>
    %cst_67 = arith.constant dense<0.000000e+00> : vector<48x192xf32>
    %129 = tpu.matmul %127, %128, %cst_67 {dimension_numbers = #tpu.dot_dimension_numbers<[1], [0], [0], [1], [0, 0, 1, 1], [], []>} : vector<48x128xbf16>, vector<128x192xbf16>, vector<48x192xf32> -> vector<48x192xf32>
    %c0_68 = arith.constant 0 : index
    %c0_69 = arith.constant 0 : index
    %130 = vector.load %arg20[%c0_68, %c0_69] : memref<1x192xf32, #tpu.memory_space<vmem>>, vector<1x192xf32>
    %131 = vector.broadcast %130 : vector<1x192xf32> to vector<48x192xf32>
    %132 = arith.addf %129, %131 : vector<48x192xf32>
    %133 = arith.truncf %19 : vector<64x128xf32> to vector<64x128xbf16>
    %c0_70 = arith.constant 0 : index
    %c0_71 = arith.constant 0 : index
    %134 = vector.load %arg19[%c0_70, %c0_71] : memref<128x192xbf16, #tpu.memory_space<vmem>>, vector<128x192xbf16>
    %cst_72 = arith.constant dense<0.000000e+00> : vector<64x192xf32>
    %135 = tpu.matmul %133, %134, %cst_72 {dimension_numbers = #tpu.dot_dimension_numbers<[1], [0], [0], [1], [0, 0, 1, 1], [], []>} : vector<64x128xbf16>, vector<128x192xbf16>, vector<64x192xf32> -> vector<64x192xf32>
    %c0_73 = arith.constant 0 : index
    %c0_74 = arith.constant 0 : index
    %136 = vector.load %arg20[%c0_73, %c0_74] : memref<1x192xf32, #tpu.memory_space<vmem>>, vector<1x192xf32>
    %137 = vector.broadcast %136 : vector<1x192xf32> to vector<64x192xf32>
    %138 = arith.addf %135, %137 : vector<64x192xf32>
    %c0_75 = arith.constant 0 : index
    %c0_76 = arith.constant 0 : index
    %c0_77 = arith.constant 0 : index
    %139 = vector.load %arg22[%c0_75, %c0_76, %c0_77] : memref<1x48x192xf32, #tpu.memory_space<vmem>>, vector<1x48x192xf32>
    %140 = vector.shape_cast %139 : vector<1x48x192xf32> to vector<48x192xf32>
    %141 = vector.shape_cast %132 : vector<48x192xf32> to vector<1x48x192xf32>
    tpu.vector_store %arg22[%c0_75, %c0_76, %c0_77], %141 {strides = array<i32>} : memref<1x48x192xf32, #tpu.memory_space<vmem>>, vector<1x48x192xf32>,
    %c0_78 = arith.constant 0 : index
    %c0_79 = arith.constant 0 : index
    %c0_80 = arith.constant 0 : index
    %142 = vector.load %arg23[%c0_78, %c0_79, %c0_80] : memref<1x64x192xf32, #tpu.memory_space<vmem>>, vector<1x64x192xf32>
    %143 = vector.shape_cast %142 : vector<1x64x192xf32> to vector<64x192xf32>
    %144 = vector.shape_cast %138 : vector<64x192xf32> to vector<1x64x192xf32>
    tpu.vector_store %arg23[%c0_78, %c0_79, %c0_80], %144 {strides = array<i32>} : memref<1x64x192xf32, #tpu.memory_space<vmem>>, vector<1x64x192xf32>,
    %145 = tpu.iota {dimensions = array<i32: 1>} : vector<1x128xi32>
    %146 = arith.subf %123, %21 : vector<48x128xf32>
    %147 = arith.mulf %146, %146 : vector<48x128xf32>
    %cst_81 = arith.constant dense<0.000000e+00> : vector<128xf32>
    %148 = vector.multi_reduction <add>, %147, %cst_81 [0] : vector<48x128xf32> to vector<128xf32>
    %149 = vector.shape_cast %148 : vector<128xf32> to vector<1x128xf32>
    %c112_i32 = arith.constant 112 : i32
    %150 = vector.broadcast %c112_i32 : i32 to vector<1x128xi32>
    %151 = arith.cmpi slt, %145, %150 : vector<1x128xi32>
    %cst_82 = arith.constant 0.000000e+00 : f32
    %152 = vector.broadcast %cst_82 : f32 to vector<1x128xf32>
    %153 = arith.select %151, %149, %152 : vector<1x128xi1>, vector<1x128xf32>
    %154 = vector.shape_cast %153 : vector<1x128xf32> to vector<1x1x128xf32>
    %cst_83 = arith.constant dense<0.000000e+00> : vector<1xf32>
    %155 = vector.multi_reduction <add>, %154, %cst_83 [1, 2] : vector<1x1x128xf32> to vector<1xf32>
    %156 = vector.shape_cast %155 : vector<1xf32> to vector<1x1x1xf32>
    %157 = vector.extract %156[0, 0, 0] : f32 from vector<1x1x1xf32>
    %c112_i32_84 = arith.constant 112 : i32
    %158 = vector.broadcast %c112_i32_84 : i32 to vector<1x128xi32>
    %159 = arith.cmpi sge, %145, %158 : vector<1x128xi32>
    %c120_i32 = arith.constant 120 : i32
    %160 = vector.broadcast %c120_i32 : i32 to vector<1x128xi32>
    %161 = arith.cmpi slt, %145, %160 : vector<1x128xi32>
    %162 = arith.andi %159, %161 : vector<1x128xi1>
    %cst_85 = arith.constant 0.000000e+00 : f32
    %163 = vector.broadcast %cst_85 : f32 to vector<1x128xf32>
    %164 = arith.select %162, %149, %163 : vector<1x128xi1>, vector<1x128xf32>
    %165 = vector.shape_cast %164 : vector<1x128xf32> to vector<1x1x128xf32>
    %cst_86 = arith.constant dense<0.000000e+00> : vector<1xf32>
    %166 = vector.multi_reduction <add>, %165, %cst_86 [1, 2] : vector<1x1x128xf32> to vector<1xf32>
    %167 = vector.shape_cast %166 : vector<1xf32> to vector<1x1x1xf32>
    %168 = vector.extract %167[0, 0, 0] : f32 from vector<1x1x1xf32>
    %169 = vector.extract_strided_slice %1 {offsets = [16, 0], sizes = [48, 192], strides = [1, 1]} : vector<64x192xf32> to vector<48x192xf32>
    %170 = arith.subf %132, %169 : vector<48x192xf32>
    %171 = arith.subf %138, %1 : vector<64x192xf32>
    %172 = arith.mulf %132, %132 : vector<48x192xf32>
    %173 = vector.shape_cast %172 : vector<48x192xf32> to vector<1x48x192xf32>
    %cst_87 = arith.constant dense<0.000000e+00> : vector<1xf32>
    %174 = vector.multi_reduction <add>, %173, %cst_87 [1, 2] : vector<1x48x192xf32> to vector<1xf32>
    %175 = vector.shape_cast %174 : vector<1xf32> to vector<1x1x1xf32>
    %176 = vector.extract %175[0, 0, 0] : f32 from vector<1x1x1xf32>
    %177 = arith.mulf %170, %170 : vector<48x192xf32>
    %178 = vector.shape_cast %177 : vector<48x192xf32> to vector<1x48x192xf32>
    %cst_88 = arith.constant dense<0.000000e+00> : vector<1xf32>
    %179 = vector.multi_reduction <add>, %178, %cst_88 [1, 2] : vector<1x48x192xf32> to vector<1xf32>
    %180 = vector.shape_cast %179 : vector<1xf32> to vector<1x1x1xf32>
    %181 = vector.extract %180[0, 0, 0] : f32 from vector<1x1x1xf32>
    %182 = arith.mulf %138, %138 : vector<64x192xf32>
    %183 = vector.shape_cast %182 : vector<64x192xf32> to vector<1x64x192xf32>
    %cst_89 = arith.constant dense<0.000000e+00> : vector<1xf32>
    %184 = vector.multi_reduction <add>, %183, %cst_89 [1, 2] : vector<1x64x192xf32> to vector<1xf32>
    %185 = vector.shape_cast %184 : vector<1xf32> to vector<1x1x1xf32>
    %186 = vector.extract %185[0, 0, 0] : f32 from vector<1x1x1xf32>
    %187 = arith.mulf %171, %171 : vector<64x192xf32>
    %188 = vector.shape_cast %187 : vector<64x192xf32> to vector<1x64x192xf32>
    %cst_90 = arith.constant dense<0.000000e+00> : vector<1xf32>
    %189 = vector.multi_reduction <add>, %188, %cst_90 [1, 2] : vector<1x64x192xf32> to vector<1xf32>
    %190 = vector.shape_cast %189 : vector<1xf32> to vector<1x1x1xf32>
    %191 = vector.extract %190[0, 0, 0] : f32 from vector<1x1x1xf32>
    %c0_i32 = arith.constant 0 : i32
    %192 = vector.broadcast %c0_i32 : i32 to vector<1x128xi32>
    %193 = arith.cmpi eq, %145, %192 : vector<1x128xi32>
    %cst_91 = arith.constant 0.000000e+00 : f32
    %194 = vector.broadcast %157 : f32 to vector<1x128xf32>
    %195 = vector.broadcast %cst_91 : f32 to vector<1x128xf32>
    %196 = arith.select %193, %194, %195 : vector<1x128xi1>, vector<1x128xf32>
    %c1_i32 = arith.constant 1 : i32
    %197 = vector.broadcast %c1_i32 : i32 to vector<1x128xi32>
    %198 = arith.cmpi eq, %145, %197 : vector<1x128xi32>
    %cst_92 = arith.constant 0.000000e+00 : f32
    %199 = vector.broadcast %168 : f32 to vector<1x128xf32>
    %200 = vector.broadcast %cst_92 : f32 to vector<1x128xf32>
    %201 = arith.select %198, %199, %200 : vector<1x128xi1>, vector<1x128xf32>
    %202 = arith.addf %196, %201 : vector<1x128xf32>
    %c2_i32 = arith.constant 2 : i32
    %203 = vector.broadcast %c2_i32 : i32 to vector<1x128xi32>
    %204 = arith.cmpi eq, %145, %203 : vector<1x128xi32>
    %cst_93 = arith.constant 0.000000e+00 : f32
    %205 = vector.broadcast %176 : f32 to vector<1x128xf32>
    %206 = vector.broadcast %cst_93 : f32 to vector<1x128xf32>
    %207 = arith.select %204, %205, %206 : vector<1x128xi1>, vector<1x128xf32>
    %208 = arith.addf %202, %207 : vector<1x128xf32>
    %c3_i32 = arith.constant 3 : i32
    %209 = vector.broadcast %c3_i32 : i32 to vector<1x128xi32>
    %210 = arith.cmpi eq, %145, %209 : vector<1x128xi32>
    %cst_94 = arith.constant 0.000000e+00 : f32
    %211 = vector.broadcast %181 : f32 to vector<1x128xf32>
    %212 = vector.broadcast %cst_94 : f32 to vector<1x128xf32>
    %213 = arith.select %210, %211, %212 : vector<1x128xi1>, vector<1x128xf32>
    %214 = arith.addf %208, %213 : vector<1x128xf32>
    %c4_i32 = arith.constant 4 : i32
    %215 = vector.broadcast %c4_i32 : i32 to vector<1x128xi32>
    %216 = arith.cmpi eq, %145, %215 : vector<1x128xi32>
    %cst_95 = arith.constant 0.000000e+00 : f32
    %217 = vector.broadcast %186 : f32 to vector<1x128xf32>
    %218 = vector.broadcast %cst_95 : f32 to vector<1x128xf32>
    %219 = arith.select %216, %217, %218 : vector<1x128xi1>, vector<1x128xf32>
    %220 = arith.addf %214, %219 : vector<1x128xf32>
    %c5_i32 = arith.constant 5 : i32
    %221 = vector.broadcast %c5_i32 : i32 to vector<1x128xi32>
    %222 = arith.cmpi eq, %145, %221 : vector<1x128xi32>
    %cst_96 = arith.constant 0.000000e+00 : f32
    %223 = vector.broadcast %191 : f32 to vector<1x128xf32>
    %224 = vector.broadcast %cst_96 : f32 to vector<1x128xf32>
    %225 = arith.select %222, %223, %224 : vector<1x128xi1>, vector<1x128xf32>
    %226 = arith.addf %220, %225 : vector<1x128xf32>
    %c0_97 = arith.constant 0 : index
    %c0_98 = arith.constant 0 : index
    %c0_99 = arith.constant 0 : index
    %227 = vector.load %arg24[%c0_97, %c0_98, %c0_99] : memref<1x1x128xf32, #tpu.memory_space<vmem>>, vector<1x1x128xf32>
    %228 = vector.shape_cast %227 : vector<1x1x128xf32> to vector<1x128xf32>
    %229 = vector.shape_cast %226 : vector<1x128xf32> to vector<1x1x128xf32>
    tpu.vector_store %arg24[%c0_97, %c0_98, %c0_99], %229 {strides = array<i32>} : memref<1x1x128xf32, #tpu.memory_space<vmem>>, vector<1x1x128xf32>,
    return
  }
  func.func @transform_0(%arg0: i32) -> (i32, i32, i32) {
    %c0_i32 = arith.constant 0 : i32
    %c0_i32_0 = arith.constant 0 : i32
    %c0_i32_1 = arith.constant 0 : i32
    return %arg0, %c0_i32, %c0_i32_0 : i32, i32, i32
  }
  func.func @transform_1(%arg0: i32) -> (i32, i32, i32) {
    %c0_i32 = arith.constant 0 : i32
    %c0_i32_0 = arith.constant 0 : i32
    %c0_i32_1 = arith.constant 0 : i32
    return %arg0, %c0_i32, %c0_i32_0 : i32, i32, i32
  }
  func.func @transform_2(%arg0: i32) -> (i32, i32, i32) {
    %c0_i32 = arith.constant 0 : i32
    %c0_i32_0 = arith.constant 0 : i32
    %c0_i32_1 = arith.constant 0 : i32
    return %arg0, %c0_i32, %c0_i32_0 : i32, i32, i32
  }
  func.func @transform_3(%arg0: i32) -> (i32, i32) {
    %c0_i32 = arith.constant 0 : i32
    %c0_i32_0 = arith.constant 0 : i32
    %c0_i32_1 = arith.constant 0 : i32
    return %c0_i32, %c0_i32_0 : i32, i32
  }
  func.func @transform_4(%arg0: i32) -> (i32, i32) {
    %c0_i32 = arith.constant 0 : i32
    %c0_i32_0 = arith.constant 0 : i32
    %c0_i32_1 = arith.constant 0 : i32
    return %c0_i32, %c0_i32_0 : i32, i32
  }
  func.func @transform_5(%arg0: i32) -> (i32, i32) {
    %c0_i32 = arith.constant 0 : i32
    %c0_i32_0 = arith.constant 0 : i32
    %c0_i32_1 = arith.constant 0 : i32
    return %c0_i32, %c0_i32_0 : i32, i32
  }
  func.func @transform_6(%arg0: i32) -> (i32, i32) {
    %c0_i32 = arith.constant 0 : i32
    %c0_i32_0 = arith.constant 0 : i32
    %c0_i32_1 = arith.constant 0 : i32
    return %c0_i32, %c0_i32_0 : i32, i32
  }
  func.func @transform_7(%arg0: i32) -> (i32, i32) {
    %c0_i32 = arith.constant 0 : i32
    %c0_i32_0 = arith.constant 0 : i32
    %c0_i32_1 = arith.constant 0 : i32
    return %c0_i32, %c0_i32_0 : i32, i32
  }
  func.func @transform_8(%arg0: i32) -> (i32, i32) {
    %c0_i32 = arith.constant 0 : i32
    %c0_i32_0 = arith.constant 0 : i32
    %c0_i32_1 = arith.constant 0 : i32
    return %c0_i32, %c0_i32_0 : i32, i32
  }
  func.func @transform_9(%arg0: i32) -> (i32, i32) {
    %c0_i32 = arith.constant 0 : i32
    %c0_i32_0 = arith.constant 0 : i32
    %c0_i32_1 = arith.constant 0 : i32
    return %c0_i32, %c0_i32_0 : i32, i32
  }
  func.func @transform_10(%arg0: i32) -> (i32, i32) {
    %c0_i32 = arith.constant 0 : i32
    %c0_i32_0 = arith.constant 0 : i32
    %c0_i32_1 = arith.constant 0 : i32
    return %c0_i32, %c0_i32_0 : i32, i32
  }
  func.func @transform_11(%arg0: i32) -> (i32, i32) {
    %c0_i32 = arith.constant 0 : i32
    %c0_i32_0 = arith.constant 0 : i32
    %c0_i32_1 = arith.constant 0 : i32
    return %c0_i32, %c0_i32_0 : i32, i32
  }
  func.func @transform_12(%arg0: i32) -> (i32, i32) {
    %c0_i32 = arith.constant 0 : i32
    %c0_i32_0 = arith.constant 0 : i32
    %c0_i32_1 = arith.constant 0 : i32
    return %c0_i32, %c0_i32_0 : i32, i32
  }
  func.func @transform_13(%arg0: i32) -> (i32, i32) {
    %c0_i32 = arith.constant 0 : i32
    %c0_i32_0 = arith.constant 0 : i32
    %c0_i32_1 = arith.constant 0 : i32
    return %c0_i32, %c0_i32_0 : i32, i32
  }
  func.func @transform_14(%arg0: i32) -> (i32, i32) {
    %c0_i32 = arith.constant 0 : i32
    %c0_i32_0 = arith.constant 0 : i32
    %c0_i32_1 = arith.constant 0 : i32
    return %c0_i32, %c0_i32_0 : i32, i32
  }
  func.func @transform_15(%arg0: i32) -> (i32, i32) {
    %c0_i32 = arith.constant 0 : i32
    %c0_i32_0 = arith.constant 0 : i32
    %c0_i32_1 = arith.constant 0 : i32
    return %c0_i32, %c0_i32_0 : i32, i32
  }
  func.func @transform_16(%arg0: i32) -> (i32, i32) {
    %c0_i32 = arith.constant 0 : i32
    %c0_i32_0 = arith.constant 0 : i32
    %c0_i32_1 = arith.constant 0 : i32
    return %c0_i32, %c0_i32_0 : i32, i32
  }
  func.func @transform_17(%arg0: i32) -> (i32, i32) {
    %c0_i32 = arith.constant 0 : i32
    %c0_i32_0 = arith.constant 0 : i32
    %c0_i32_1 = arith.constant 0 : i32
    return %c0_i32, %c0_i32_0 : i32, i32
  }
  func.func @transform_18(%arg0: i32) -> (i32, i32) {
    %c0_i32 = arith.constant 0 : i32
    %c0_i32_0 = arith.constant 0 : i32
    %c0_i32_1 = arith.constant 0 : i32
    return %c0_i32, %c0_i32_0 : i32, i32
  }
  func.func @transform_19(%arg0: i32) -> (i32, i32) {
    %c0_i32 = arith.constant 0 : i32
    %c0_i32_0 = arith.constant 0 : i32
    %c0_i32_1 = arith.constant 0 : i32
    return %c0_i32, %c0_i32_0 : i32, i32
  }
  func.func @transform_20(%arg0: i32) -> (i32, i32, i32) {
    %c0_i32 = arith.constant 0 : i32
    %c0_i32_0 = arith.constant 0 : i32
    %c0_i32_1 = arith.constant 0 : i32
    return %arg0, %c0_i32, %c0_i32_0 : i32, i32, i32
  }
  func.func @transform_21(%arg0: i32) -> (i32, i32, i32) {
    %c0_i32 = arith.constant 0 : i32
    %c0_i32_0 = arith.constant 0 : i32
    %c0_i32_1 = arith.constant 0 : i32
    return %arg0, %c0_i32, %c0_i32_0 : i32, i32, i32
  }
  func.func @transform_22(%arg0: i32) -> (i32, i32, i32) {
    %c0_i32 = arith.constant 0 : i32
    %c0_i32_0 = arith.constant 0 : i32
    %c0_i32_1 = arith.constant 0 : i32
    return %arg0, %c0_i32, %c0_i32_0 : i32, i32, i32
  }
  func.func @transform_23(%arg0: i32) -> (i32, i32, i32) {
    %c0_i32 = arith.constant 0 : i32
    %c0_i32_0 = arith.constant 0 : i32
    %c0_i32_1 = arith.constant 0 : i32
    return %arg0, %c0_i32, %c0_i32_0 : i32, i32, i32
  }
}

</mosaic_0001>

<bundles_post_ra>
// kernel: forward.1
= control target key start
LH: loop header
LB: loop body
LE: loop exit
PB: predicated region body
PF: predicated region fallthrough
CT: control target
= control target key end

     0   :  { %s5129_s0 = inlined_call_operand.vmem [shape: f32[2,64,192], index: 0, kind: input, shape index: {}]   ;;  %s5130_s1 = inlined_call_operand.vmem [shape: f32[2,64,5], index: 1, kind: input, shape index: {}]   ;;  %s5131_s2 = inlined_call_operand.vmem [shape: f32[2,64,6], index: 2, kind: input, shape index: {}]   ;;  %s5132_s3 = inlined_call_operand.vmem [shape: f32[48,48], index: 3, kind: input, shape index: {}]   ;;  %s5133_s4 = inlined_call_operand.vmem [shape: bf16[192,128], index: 4, kind: input, shape index: {}]   ;;  %s5134_s5 = inlined_call_operand.vmem [shape: bf16[5,128], index: 5, kind: input, shape index: {}]   ;;  %s5135_s6 = inlined_call_operand.vmem [shape: bf16[6,128], index: 6, kind: input, shape index: {}]   ;;  %s5136_s7 = inlined_call_operand.vmem [shape: f32[1,128], index: 7, kind: input, shape index: {}, may-alias: {7,11,15,17}]   ;;  %s5137_s8 = inlined_call_operand.vmem [shape: bf16[128,384], index: 8, kind: input, shape index: {}]   ;;  %s5138_s9 = inlined_call_operand.vmem [shape: bf16[128,128], index: 9, kind: input, shape index: {}]   ;;  %s5139_s10 = inlined_call_operand.vmem [shape: f32[1,128], index: 10, kind: input, shape index: {}, may-alias: {10,16}]   ;;  %s5140_s11 = inlined_call_operand.vmem [shape: f32[1,128], index: 11, kind: input, shape index: {}, may-alias: {7,11,15,17}]   ;;  %s5141_s12 = inlined_call_operand.vmem [shape: bf16[128,256], index: 12, kind: input, shape index: {}]   ;;  %s5142_s13 = inlined_call_operand.vmem [shape: f32[1,256], index: 13, kind: input, shape index: {}]   ;;  %s5143_s14 = inlined_call_operand.vmem [shape: bf16[256,128], index: 14, kind: input, shape index: {}]   ;;  %s5144_s15 = inlined_call_operand.vmem [shape: f32[1,128], index: 15, kind: input, shape index: {}, may-alias: {7,11,15,17}]   ;;  %s5145_s16 = inlined_call_operand.vmem [shape: f32[1,128], index: 16, kind: input, shape index: {}, may-alias: {10,16}]   ;;  %s5146_s17 = inlined_call_operand.vmem [shape: f32[1,128], index: 17, kind: input, shape index: {}, may-alias: {7,11,15,17}]   ;;  %s5147_s18 = inlined_call_operand.vmem [shape: bf16[128,192], index: 18, kind: input, shape index: {}]   ;;  %s5148_s19 = inlined_call_operand.vmem [shape: f32[1,192], index: 19, kind: input, shape index: {}]   ;;  %s5149_s20 = inlined_call_operand.hbm [shape: f32[2,48,128], index: 20, kind: output, shape index: {0}]   ;;  %s5150_s21 = inlined_call_operand.vmem [shape: f32[2,48,192], index: 21, kind: output, shape index: {1}]   ;;  %s5151_s22 = inlined_call_operand.vmem [shape: f32[2,64,192], index: 22, kind: output, shape index: {2}]   ;;  %s5152_s23 = inlined_call_operand.vmem [shape: f32[2,1,128], index: 23, kind: output, shape index: {3}]  }
   0x1   :  { %5168 = sst [smem:[#allocation12_spill]] %s5129_s0 }
   0x2   :  { %5169 = sst [smem:[#allocation13_spill]] %s5130_s1 }
   0x3   :  { %5170 = sst [smem:[#allocation14_spill]] %s5131_s2 }
   0x4   :  { %5171 = sst [smem:[#allocation15_spill]] %s5132_s3 }
   0x5   :  { %5172 = sst [smem:[#allocation16_spill]] %s5133_s4 }
   0x6   :  { %5173 = sst [smem:[#allocation17_spill]] %s5134_s5 }
   0x7   :  { %5174 = sst [smem:[#allocation18_spill]] %s5135_s6 }
   0x8   :  { %5175 = sst [smem:[#allocation19_spill]] %s5136_s7 }
   0x9   :  { %5176 = sst [smem:[#allocation20_spill]] %s5149_s20 }
   0xa   :  { %5177 = sst [smem:[#allocation21_spill]] %s5152_s23 }
   0xb   :  { %29 = vsyncpa [#allocation3], 0 }
   0xc   :  { %31 = vsyncpa [#allocation3 + $0x1], 0  ;;  %s4023_s4 = smov 0   ;;  %s4025_s30 = smov 0  }
   0xd   :  { %s4027_s24 = smov 0   ;;  %s4029_s25 = smov 0  }
   0xe LB: > { %5178 = sst [smem:[#allocation5_spill]] %s3882_s4  ;;  %s4044_s5 = sadd.s32 4294967295, %s3894_s25   ;;  %s3894_s25 = sphi %s4029_s25, %s5206_s25   ;;  %s3890_s24 = sphi %s4027_s24, %s5208_s24   ;;  %s3886_s30 = sphi %s4025_s30, %s5210_s30   ;;  %s3882_s4 = sphi %s4023_s4, %s5209_s4  }
   0xf   : > { %5179 = sst [smem:[#allocation6_spill]] %s3890_s24  ;;  %s3246_s1 = sadd.s32 4294967294, %s3894_s25  }
  0x10   : > { %5180 = sst [smem:[#allocation7_spill]] %s3894_s25  ;;  %s4048_s26 = sadd.s32 1, %s3894_s25  }
  0x11   : > { %5181 = sst [smem:[#allocation8_spill]] %s4048_s26  ;;  %s479_s2 = sadd.s32 1, %s3890_s24 }
  0x12   : > { %s476_s6 = ssub.s32 %s3894_s25, %s4048_s26  ;;  %p489_p0 = scmp.ne.s32.totalorder %s3890_s24, %s3886_s30 }
  0x13   : > { %p477_p1 = scmp.eq.s32.totalorder %s476_s6, 0  ;;  %p490_p2 = scmp.eq.s32.totalorder %s4044_s5, 1 }
  0x14   : > { %p495_p3 = scmp.ne.s32.totalorder %s3886_s30, %s3882_s4  ;;  %p496_p4 = scmp.eq.s32.totalorder %s3246_s1, 1 }
  0x15   : > { %s4059_s27 = scalar_select %p477_p1, %s3890_s24, %s479_s2  }
  0x16   : > { %p4061_p5 = por %p490_p2, %p489_p0  ;;  %p4065_p6 = por %p496_p4, %p495_p3 }
  0x17   : > { %5182 = sst [smem:[#allocation9_spill]] %s4059_s27  ;;  %p3249_p7 = scmp.ge.s32.totalorder %s3894_s25, 1 }
  0x18   : > { %s5183_s7 = scalar_select %p4061_p5, 1, 0 }
  0x19   : > { %s5185_s28 = scalar_select %p4065_p6, 1, 0 }
  0x1a   : > { %5184 = sst [smem:[#allocation10_spill]] %s5183_s7  ;;  %p667_p8 = scmp.lt.s32.totalorder %s3894_s25, 3 }
  0x1b   : > { %5186 = sst [smem:[#allocation11_spill]] %s5185_s28 }
  0x1c   : > { %p668_p9 = pnand %p3249_p7, %p667_p8 }
  0x1d   : > { %s5187_s0 = sld [smem:[#allocation16_spill]] (!%p668_p9)  ;;  %p754_p10 = scmp.lt.s32.totalorder (!%p668_p9), %s4044_s5, 1 }
  0x1e   : > { %671 = sbr.rel (%p668_p9) target bundleno = 2930 (0xb72), region = 100  ;;  %s5188_s24 = sld [smem:[#allocation17_spill]] (!%p668_p9) }
  0x1f   : > { %s5189_s28 = sld [smem:[#allocation18_spill]] (!%p668_p9)  ;;  %s3584_s3 = smul.u32 (!%p668_p9), 768, %s4044_s5 }
  0x20   : > { %s5190_s25 = sld [smem:[#allocation13_spill]] (!%p668_p9) }
  0x21   : > { %s5191_s4 = sld [smem:[#allocation12_spill]] (!%p668_p9) }
  0x22   : > { %s5192_s20 = sld [smem:[#allocation14_spill]] (!%p668_p9) }
  0x23   : > { %v3630_v0 = vld [vmem:[%s5187_s0 + $0x38] sm:$0xff]   ;;  %v3896_v1 = vmov 0   ;;  %vm857_vm0 = vcmask 1041408   ;;  %v3631_v2 = vld [vmem:[%s5187_s0 + $0x30] sm:$0xff]   ;;  %vm858_vm1 = vcmask 1042432   ;;  %v3897_v3 = vmov 65535  }
  0x24   : > { %1014 = vmatprep.subr.bf16.mxu1 %v3896_v1  ;;  %v859_v4 = vsel %vm857_vm0, 4294967295, %v3897_v3  ;;  %v3632_v6 = vld [vmem:[%s5187_s0 + $0x28] sm:$0xff]   ;;  %v843_v7 = vld [vmem:[%s5188_s24] sm:$0x7]  ;;  %s4089_s1 = scalar_select %p754_p10, %s4044_s5, 1  ;;  %vm844_vm2 = vcmask 39936  }
  0x25   : > { %1015 = vmatpush1.bf16.msra.mxu1 %v3630_v0  ;;  %v860_v5 = vsel %vm858_vm1, %v859_v4, 0  ;;  %v1091_v9 = vld [vmem:[%s5189_s28] sm:$0x7]  ;;  %v3634_v18 = vld [vmem:[%s5187_s0 + $0x18] sm:$0xff]   ;;  %vm1001_vm3 = vcmask 523264   ;;  %v3635_v26 = vld [vmem:[%s5187_s0 + $0x10] sm:$0xff]  }
  0x26   : > { %1016 = vmatprep.subr.bf16.mxu1 %v3896_v1  ;;  %v862_v8 = vand.u32 %v860_v5, %v843_v7  ;;  %v3633_v10 = vld [vmem:[%s5187_s0 + $0x20] sm:$0xff]   ;;  %s3376_s24 = sshll.u32 %s4089_s1, 6  ;;  %s3375_s27 = sshll.u32 %s4089_s1, 7  ;;  %v1106_v21 = vsel %vm858_vm1, %v1091_v9, 0  ;;  %v3636_v32 = vld [vmem:[%s5187_s0 + $0x8] sm:$0xff]   ;;  %vm1092_vm4 = vcmask 48128  }
  0x27   : > { %s763_s23 = scalar_lea.vmem %s5190_s25, %s3376_s24  ;;  %s4112_s25 = scalar_lea.vmem %s5191_s4, %s3375_s27  ;;  %v3637_v35 = vld [vmem:[%s5187_s0] sm:$0xff]   ;;  %v3638_v38 = vld [vmem:[%s5187_s0 + $0x58] sm:$0xff]   ;;  %v3639_v43 = vld [vmem:[%s5187_s0 + $0x50] sm:$0xff]   ;;  %vm3899_vm5 = vmmov 0   ;;  %vm1641_vm6 = vcmask 392192   ;;  %vm2806_vm9 = vcmask 1040384  }
  0x28   : > { %3457 = vmatprep.subr.bf16.mxu0 %v862_v8  ;;  %v831_v11 = vld [vmem:[%s763_s23] sm:$0xff]  ;;  %v832_v12 = vld [vmem:[%s763_s23 + $0x8] sm:$0xff]  ;;  %v833_v13 = vld [vmem:[%s763_s23 + $0x10] sm:$0xff]  ;;  %s4119_s7 = scalar_lea.vmem %s5192_s20, %s3376_s24  ;;  %s5193_s2 = sld [smem:[#allocation19_spill]] }
  0x29   : > { %1017 = vmatpush1.bf16.msra.mxu1 %v3631_v2  ;;  %3458 = vmatpush3.bf16.msra.mxu0 %v862_v8  ;;  %v839_v14 = vpack.c.bf16 %v832_v12, %v831_v11  ;;  %v834_v15 = vld [vmem:[%s763_s23 + $0x18] sm:$0xff]  ;;  %v835_v16 = vld [vmem:[%s763_s23 + $0x20] sm:$0xff]  ;;  %v836_v17 = vld [vmem:[%s763_s23 + $0x28] sm:$0xff]  ;;  %s732_s24 = sand.u32 1, %s3886_s30   ;;  %s3900_s5 = smov [#allocation2]  }
  0x2a   : > { %1018 = vmatprep.subr.bf16.mxu1 %v3896_v1  ;;  %3569 = vmatprep.subr.msk.bf16.mxu0 %vm858_vm1, %v1091_v9  ;;  %v840_v19 = vpack.c.bf16 %v834_v15, %v833_v13  ;;  %v841_v20 = vpack.c.bf16 %v836_v17, %v835_v16  ;;  %v837_v22 = vld [vmem:[%s763_s23 + $0x30] sm:$0xff]  ;;  %v838_v23 = vld [vmem:[%s763_s23 + $0x38] sm:$0xff]  ;;  %v784_v24 = vld [vmem:[%s4112_s25 + $0x8] sm:$0xff]  ;;  %s3570_s28 = smul.u32 48, %s732_s24  ;;  %s4872_s23 = scalar_lea.vmem %s5151_s22, %s3375_s27 }
  0x2b   : > { %3459 = vmatprep.mubr.msk.bf16.mxu0 %vm844_vm2, %v839_v14  ;;  %v786_v25 = vld [vmem:[%s4112_s25 + $0x18] sm:$0xff]  ;;  %v1079_v27 = vld [vmem:[%s4119_s7] sm:$0xff]  ;;  %v1080_v28 = vld [vmem:[%s4119_s7 + $0x8] sm:$0xff]  ;;  %v842_v30 = vpack.c.bf16 %v838_v23, %v837_v22  ;;  %s3571_s27 = smul.u32 96, %s4089_s1 }
  0x2c   : > { %3460 = vmatmul.mubr.msk.bf16.vlgmr.msra.gmra.mxu0 %vm844_vm2, %v840_v19  ;;  %v800_v29 = vpack.c.bf16 %v786_v25, %v784_v24  ;;  %v1087_v31 = vpack.c.bf16 %v1080_v28, %v1079_v27  ;;  %v1081_v33 = vld [vmem:[%s4119_s7 + $0x10] sm:$0xff]  ;;  %v1082_v34 = vld [vmem:[%s4119_s7 + $0x18] sm:$0xff]  ;;  %v1083_v36 = vld [vmem:[%s4119_s7 + $0x20] sm:$0xff]  ;;  %s4835_s29 = scalar_lea.vmem [#allocation2], %s3570_s28 }
  0x2d   : > { %1019 = vmatpush1.bf16.msra.mxu1 %v3632_v6  ;;  %3463 = vmatprep.mubr.msk.bf16.mxu0 %vm844_vm2, %v841_v20  ;;  %v1084_v37 = vld [vmem:[%s4119_s7 + $0x28] sm:$0xff]  ;;  %v1088_v39 = vpack.c.bf16 %v1082_v34, %v1081_v33  ;;  %v1085_v41 = vld [vmem:[%s4119_s7 + $0x30] sm:$0xff]  ;;  %v1086_v42 = vld [vmem:[%s4119_s7 + $0x38] sm:$0xff]  ;;  %s5010_s6 = scalar_lea.vmem %s5150_s21, %s3571_s27  ;;  %s3082_s26 = sshll.u32 %s4835_s29, 4  ;;  %s5070_s26 = int_to_ptr.vmem [resolvable:$true] %s3082_s26 }
  0x2e   : > { %1020 = vmatprep.subr.bf16.mxu1 %v3896_v1  ;;  %3468 = vmatpush3.bf16.msra.mxu0 %v1106_v21  ;;  %v1089_v40 = vpack.c.bf16 %v1084_v37, %v1083_v36  ;;  %v3640_v44 = vld [vmem:[%s5187_s0 + $0x48] sm:$0xff]   ;;  %v1090_v45 = vpack.c.bf16 %v1086_v42, %v1085_v41  ;;  %v3641_v46 = vld [vmem:[%s5187_s0 + $0x40] sm:$0xff]   ;;  %v785_v48 = vld [vmem:[%s4112_s25 + $0x10] sm:$0xff]  ;;  %s3834_s28 = scalar_lea.vmem %s5070_s26, 768 }
  0x2f   : > { %3275 = vmatprep.mubr.msk.bf16.mxu1 %vm1001_vm3, %v800_v29  ;;  %v783_v47 = vld [vmem:[%s4112_s25] sm:$0xff]  ;;  %v788_v49 = vld [vmem:[%s4112_s25 + $0x28] sm:$0xff]  ;;  %v790_v50 = vld [vmem:[%s4112_s25 + $0x38] sm:$0xff]  ;;  %p3835_p11 = scmp.ne.s32.totalorder %s5070_s26, %s3834_s28 }
  0x30   : > { %v799_v51 = vpack.c.bf16 %v785_v48, %v783_v47  ;;  %v802_v52 = vpack.c.bf16 %v790_v50, %v788_v49  ;;  %v787_v53 = vld [vmem:[%s4112_s25 + $0x20] sm:$0xff]  ;;  %v789_v54 = vld [vmem:[%s4112_s25 + $0x30] sm:$0xff]  ;;  %v792_v55 = vld [vmem:[%s4112_s25 + $0x48] sm:$0xff] }
  0x31   : > { %1021 = vmatpush1.bf16.msra.mxu1 %v3633_v10  ;;  %v794_v56 = vld [vmem:[%s4112_s25 + $0x58] sm:$0xff]  ;;  %v801_v57 = vpack.c.bf16 %v789_v54, %v787_v53  ;;  %v791_v59 = vld [vmem:[%s4112_s25 + $0x40] sm:$0xff]  ;;  %v793_v60 = vld [vmem:[%s4112_s25 + $0x50] sm:$0xff]  ;;  %p3836_p12 = pnand %p3835_p11, %p4061_p5 }
  0x32   : > { %1022 = vmatprep.subr.bf16.mxu1 %v3896_v1  ;;  %v804_v58 = vpack.c.bf16 %v794_v56, %v792_v55  ;;  %v796_v61 = vld [vmem:[%s4112_s25 + $0x68] sm:$0xff]  ;;  %v798_v62 = vld [vmem:[%s4112_s25 + $0x78] sm:$0xff]  ;;  %v803_v63 = vpack.c.bf16 %v793_v60, %v791_v59  ;;  %v795_v2 = vld [vmem:[%s4112_s25 + $0x60] sm:$0xff] }
  0x33   : > { %v806_v0 = vpack.c.bf16 %v798_v62, %v796_v61  ;;  %v797_v3 = vld [vmem:[%s4112_s25 + $0x70] sm:$0xff]  ;;  %p3837_p13 = pneg %p3836_p12 }
  0x34   : > { %3464 = vmatmul.mubr.msk.bf16.gmra.mxu0 %vm844_vm2, %v842_v30  ;;  %v805_v4 = vpack.c.bf16 %v797_v3, %v795_v2  ;;  %v3642_v62 = vld [vmem:[%s5137_s8 + $0xa8] ss:$12 sps:$4 sm:$0xff]   ;;  %v3645_v2 = vld [vmem:[%s5137_s8 + $0xb0] ss:$12 sps:$4 sm:$0xff]  }
  0x35   : > { %1023 = vmatpush1.bf16.msra.mxu1 %v3634_v18  ;;  %3469 = vmatprep.mubr.msk.bf16.mxu0 %vm1092_vm4, %v1087_v31  ;;  %v3283_v18 = vld [vmem:[%s5193_s2] ss:$0 sm:$0xff]  ;;  %s5194_s2 = sld [smem:[#allocation15_spill]] }
  0x36   : > { %1024 = vmatprep.subr.bf16.mxu1 %v3896_v1 }
  0x39   : > { %1025 = vmatpush1.bf16.msra.mxu1 %v3635_v26 }
  0x3a   : > { %1026 = vmatprep.subr.bf16.mxu1 %v3896_v1 }
  0x3c   : > { %3470 = vmatmul.mubr.msk.bf16.vlgmr.msra.gmra.mxu0 %vm1092_vm4, %v1088_v39 }
  0x3d   : > { %1027 = vmatpush1.bf16.msra.mxu1 %v3636_v32  ;;  %3473 = vmatprep.mubr.msk.bf16.mxu0 %vm1092_vm4, %v1089_v40 }
  0x3e   : > { %1028 = vmatprep.subr.bf16.mxu1 %v3896_v1 }
  0x41   : > { %1029 = vmatpush1.bf16.msra.mxu1 %v3637_v35 }
  0x42   : > { %1038 = vmatprep.subr.bf16.mxu1 %v3896_v1 }
  0x44   : > { %3474 = vmatmul.mubr.msk.bf16.gmra.mxu0 %vm1092_vm4, %v1090_v45 }
  0x45   : > { %1039 = vmatpush2.bf16.msra.mxu1 %v3638_v38  ;;  %1484 = vmatprep.mubr.bf16.mxu0 %v3896_v1 }
  0x46   : > { %1040 = vmatprep.subr.bf16.mxu1 %v3896_v1 }
  0x49   : > { %1041 = vmatpush2.bf16.msra.mxu1 %v3639_v43 }
  0x4a   : > { %1042 = vmatprep.subr.bf16.mxu1 %v3896_v1 }
  0x4d   : > { %1043 = vmatpush2.bf16.msra.mxu1 %v3640_v44 }
  0x4e   : > { %1044 = vmatprep.subr.bf16.mxu1 %v3896_v1 }
  0x51   : > { %1045 = vmatpush2.bf16.msra.mxu1 %v3641_v46 }
  0x54   : > { %1047 = vmatmul.mubr.bf16.vlgmr.msra.gmra.mxu1 %v799_v51 }
  0x55   : > { %3276 = vmatprep.mubr.msk.bf16.mxu1 %vm1001_vm3, %v802_v52 }
  0x5c   : > { %1055 = vmatmul.mubr.bf16.gmra.mxu1 %v801_v57 }
  0x5d   : > { %3277 = vmatprep.mubr.msk.bf16.mxu1 %vm1001_vm3, %v804_v58 }
  0x64   : > { %1063 = vmatmul.mubr.bf16.gmra.mxu1 %v803_v63  ;;  %v3644_v63 = vld [vmem:[%s5137_s8 + $0xac] ss:$12 sps:$4 sm:$0xff]  }
  0x65   : > { %3278 = vmatprep.mubr.msk.bf16.mxu1 %vm1001_vm3, %v806_v0  ;;  %v3898_v0 = vmov 0.0   ;;  %1452 = vmatprep.subr.bf16.mxu0 %v3644_v63 }
  0x66   : > { %3477 = vmatprep.subr.bf16.mxu1 %v3898_v0  ;;  %1453 = vmatpush1.bf16.msra.mxu0 %v3642_v62 }
  0x67   : > { %3478 = vmatpush3.bf16.msra.mxu1 %v3645_v2 }
  0x68   : > { %3479 = vmatprep.subr.bf16.mxu1 %v3898_v0 }
  0x6c   : > { %1071 = vmatmul.mubr.bf16.gmra.mxu1 %v805_v4 }
  0x6d   : > { %3493 = vmatprep.mubr.msk.bf16.mxu1 %vm3899_vm5, %v3898_v0 }
  0xec   : > { %v3461_v5 = vpop.f32.mrf.mxu0 }
  0xee   : > { %v898_v6 = vpop.f32.mrf.mxu0 }
  0xf0   : > { %v3462_v7 = vpop.f32.mrf.mxu0 }
  0xf2   : > { %v901_v8 = vpop.f32.mrf.mxu0 }
  0xf4   : > { %v3465_v9 = vpop.f32.mrf.mxu0 }
  0xf6   : > { %v914_v10 = vpop.f32.mrf.mxu0 }
  0xf8   : > { %v3466_v11 = vpop.f32.mrf.mxu0 }
  0xfa   : > { %v917_v12 = vpop.f32.mrf.mxu0 }
  0xfc   : > { %v3471_v13 = vpop.f32.mrf.mxu0 }
  0xfe   : > { %v1142_v14 = vpop.f32.mrf.mxu0 }
 0x100   : > { %v3472_v17 = vpop.f32.mrf.mxu0 }
 0x102   : > { %v1145_v24 = vpop.f32.mrf.mxu0 }
 0x104   : > { %v3475_v31 = vpop.f32.mrf.mxu0 }
 0x106   : > { %v1158_v36 = vpop.f32.mrf.mxu0 }
 0x108   : > { %v3476_v42 = vpop.f32.mrf.mxu0 }
 0x10a   : > { %v1161_v48 = vpop.f32.mrf.mxu0 }
 0x114   : > { %v1048_v15 = vpop.f32.mrf.mxu1 }
 0x115   : > { %v1049_v16 = vadd.f32 %v1048_v15, %v898_v6 }
 0x116   : > { %v1050_v19 = vpop.f32.mrf.mxu1 }
 0x117   : > { %v1173_v20 = vadd.f32 %v1142_v14, %v1049_v16 }
 0x118   : > { %v1051_v21 = vpop.f32.mrf.mxu1 }
 0x119   : > { %v4189_v22 = vadd.f32 %v3283_v18, %v1173_v20  ;;  %v1052_v23 = vadd.f32 %v1051_v21, %v901_v8  ;;  %v3648_v21 = vld [vmem:[%s5137_s8 + $0x94] ss:$12 sps:$4 sm:$0xff]  }
 0x11a   : > { %v1053_v25 = vpop.f32.mrf.mxu1  ;;  %1454 = vmatprep.subr.bf16.mxu0 %v3648_v21 }
 0x11b   : > { %v1174_v26 = vadd.f32 %v1145_v24, %v1052_v23  ;;  %1196 = vadd.xlane.f32.xlu0 %v4189_v22  ;;  %v3646_v23 = vld [vmem:[%s5137_s8 + $0x90] ss:$12 sps:$4 sm:$0xff]   ;;  %v3649_v24 = vld [vmem:[%s5137_s8 + $0x98] ss:$12 sps:$4 sm:$0xff]  }
 0x11c   : > { %v1056_v27 = vpop.f32.mrf.mxu1  ;;  %1455 = vmatpush1.bf16.msra.mxu0 %v3646_v23  ;;  %3480 = vmatpush3.bf16.msra.mxu1 %v3649_v24  ;;  %v3285_v23 = vld [vmem:[%s5140_s11] ss:$0 sm:$0xff] }
 0x11d   : > { %v4192_v28 = vadd.f32 %v3283_v18, %v1174_v26  ;;  %v1057_v29 = vadd.f32 %v3461_v5, %v1056_v27  ;;  %3481 = vmatprep.subr.bf16.mxu1 %v3898_v0 }
 0x11e   : > { %v1058_v30 = vpop.f32.mrf.mxu1 }
 0x11f   : > { %v1175_v32 = vadd.f32 %v3471_v13, %v1057_v29  ;;  %1198 = vadd.xlane.f32.xlu0 %v4192_v28  ;;  %v3652_v30 = vld [vmem:[%s5137_s8 + $0x7c] ss:$12 sps:$4 sm:$0xff]  }
 0x120   : > { %v1059_v33 = vpop.f32.mrf.mxu1  ;;  %1456 = vmatprep.subr.bf16.mxu0 %v3652_v30 }
 0x121   : > { %v4195_v34 = vadd.f32 %v3283_v18, %v1175_v32  ;;  %v1060_v35 = vadd.f32 %v3462_v7, %v1059_v33  ;;  %v3653_v32 = vld [vmem:[%s5137_s8 + $0x80] ss:$12 sps:$4 sm:$0xff]  }
 0x122   : > { %v1061_v37 = vpop.f32.mrf.mxu1  ;;  %3482 = vmatpush3.bf16.msra.mxu1 %v3653_v32 }
 0x123   : > { %v1176_v38 = vadd.f32 %v3472_v17, %v1060_v35  ;;  %1200 = vadd.xlane.f32.xlu1 %v4195_v34  ;;  %3483 = vmatprep.subr.bf16.mxu1 %v3898_v0  ;;  %v3654_v37 = vld [vmem:[%s5137_s8 + $0x60] ss:$12 sps:$4 sm:$0xff]  }
 0x124   : > { %v1064_v39 = vpop.f32.mrf.mxu1 }
 0x125   : > { %v4198_v40 = vadd.f32 %v3283_v18, %v1176_v38  ;;  %v1065_v41 = vadd.f32 %v1064_v39, %v914_v10  ;;  %v3657_v38 = vld [vmem:[%s5137_s8 + $0x68] ss:$12 sps:$4 sm:$0xff]   ;;  %v3660_v39 = vld [vmem:[%s5137_s8 + $0x4c] ss:$12 sps:$4 sm:$0xff]  }
 0x126   : > { %v1066_v43 = vpop.f32.mrf.mxu1  ;;  %3484 = vmatpush3.bf16.msra.mxu1 %v3657_v38 }
 0x127   : > { %v1177_v44 = vadd.f32 %v1158_v36, %v1065_v41  ;;  %1202 = vadd.xlane.f32.xlu1 %v4198_v40  ;;  %v3656_v36 = vld [vmem:[%s5137_s8 + $0x64] ss:$12 sps:$4 sm:$0xff]   ;;  %3485 = vmatprep.subr.bf16.mxu1 %v3898_v0  ;;  %v3658_v41 = vld [vmem:[%s5137_s8 + $0x48] ss:$12 sps:$4 sm:$0xff]  }
 0x128   : > { %v1067_v45 = vpop.f32.mrf.mxu1  ;;  %v3664_v43 = vld [vmem:[%s5137_s8 + $0x34] ss:$12 sps:$4 sm:$0xff]  }
 0x129   : > { %v4201_v46 = vadd.f32 %v3283_v18, %v1177_v44  ;;  %v1068_v47 = vadd.f32 %v1067_v45, %v917_v12  ;;  %v3662_v44 = vld [vmem:[%s5137_s8 + $0x30] ss:$12 sps:$4 sm:$0xff]   ;;  %v3665_v45 = vld [vmem:[%s5137_s8 + $0x38] ss:$12 sps:$4 sm:$0xff]  }
 0x12a   : > { %v1069_v49 = vpop.f32.mrf.mxu1 }
 0x12b   : > { %v1178_v50 = vadd.f32 %v1161_v48, %v1068_v47  ;;  %1204 = vadd.xlane.f32.xlu0 %v4201_v46  ;;  %v3668_v47 = vld [vmem:[%s5137_s8 + $0x1c] ss:$12 sps:$4 sm:$0xff]   ;;  %v3666_v48 = vld [vmem:[%s5137_s8 + $0x18] ss:$12 sps:$4 sm:$0xff]   ;;  %v3669_v49 = vld [vmem:[%s5137_s8 + $0x20] ss:$12 sps:$4 sm:$0xff]  }
 0x12c   : > { %v1072_v51 = vpop.f32.mrf.mxu1 }
 0x12d   : > { %v4204_v52 = vadd.f32 %v3283_v18, %v1178_v50  ;;  %v1073_v53 = vadd.f32 %v3465_v9, %v1072_v51  ;;  %v3670_v50 = vld [vmem:[%s5137_s8] ss:$12 sps:$4 sm:$0xff]   ;;  %v3672_v51 = vld [vmem:[%s5137_s8 + $0x4] ss:$12 sps:$4 sm:$0xff]  }
 0x12e   : > { %v1074_v54 = vpop.f32.mrf.mxu1 }
 0x12f   : > { %v1179_v55 = vadd.f32 %v3475_v31, %v1073_v53  ;;  %1206 = vadd.xlane.f32.xlu1 %v4204_v52  ;;  %v3650_v31 = vld [vmem:[%s5137_s8 + $0x78] ss:$12 sps:$4 sm:$0xff]   ;;  %v3673_v53 = vld [vmem:[%s5137_s8 + $0x8] ss:$12 sps:$4 sm:$0xff]  }
 0x130   : > { %v1075_v56 = vpop.f32.mrf.mxu1  ;;  %1457 = vmatpush1.bf16.msra.mxu0 %v3650_v31 }
 0x131   : > { %v4207_v57 = vadd.f32 %v3283_v18, %v1179_v55  ;;  %v1076_v58 = vadd.f32 %v3466_v11, %v1075_v56  ;;  %1458 = vmatprep.subr.bf16.mxu0 %v3656_v36 }
 0x132   : > { %v1077_v59 = vpop.f32.mrf.mxu1 }
 0x133   : > { %v1180_v60 = vadd.f32 %v3476_v42, %v1076_v58  ;;  %v3661_v42 = vld [vmem:[%s5137_s8 + $0x50] ss:$12 sps:$4 sm:$0xff]  }
 0x134   : > { %1459 = vmatpush1.bf16.msra.mxu0 %v3654_v37  ;;  %3486 = vmatpush3.bf16.msra.mxu1 %v3661_v42 }
 0x135   : > { %v4209_v61 = vadd.f32 %v3283_v18, %v1180_v60  ;;  %1460 = vmatprep.subr.bf16.mxu0 %v3660_v39  ;;  %3487 = vmatprep.subr.bf16.mxu1 %v3898_v0 }
 0x138   : > { %1461 = vmatpush1.bf16.msra.mxu0 %v3658_v41  ;;  %3488 = vmatpush3.bf16.msra.mxu1 %v3665_v45 }
 0x139   : > { %1462 = vmatprep.subr.bf16.mxu0 %v3664_v43  ;;  %3489 = vmatprep.subr.bf16.mxu1 %v3898_v0 }
 0x13c   : > { %1463 = vmatpush1.bf16.msra.mxu0 %v3662_v44  ;;  %3490 = vmatpush3.bf16.msra.mxu1 %v3669_v49 }
 0x13d   : > { %1464 = vmatprep.subr.bf16.mxu0 %v3668_v47  ;;  %3491 = vmatprep.subr.bf16.mxu1 %v3898_v0 }
 0x140   : > { %1465 = vmatpush1.bf16.msra.mxu0 %v3666_v48  ;;  %3492 = vmatpush3.bf16.msra.mxu1 %v3673_v53 }
 0x141   : > { %1466 = vmatprep.subr.bf16.mxu0 %v3672_v51  ;;  %3541 = vmatprep.subr.bf16.mxu1 %v3898_v0 }
 0x144   : > { %1467 = vmatpush1.bf16.msra.mxu0 %v3670_v50 }
 0x145   : > { %3505 = vmatprep.subr.bf16.mxu0 %v3898_v0 }
 0x1a4   : > { %v1197_v3 = vpop.xlane.xlu0 %1196 }
 0x1a5   : > { %v1209_v4 = vmul.f32 0.0078125, %v1197_v3 }
 0x1a7   : > { %v4223_v5 = vsub.f32 %v4189_v22, %v1209_v4 }
 0x1a8   : > { %v1199_v6 = vpop.xlane.xlu0 %1198 }
 0x1a9   : > { %v1210_v7 = vmul.f32 0.0078125, %v1199_v6  ;;  %v1221_v8 = vmul.f32 %v4223_v5, %v4223_v5 }
 0x1ab   : > { %v4228_v9 = vsub.f32 %v4192_v28, %v1210_v7  ;;  %1227 = vadd.xlane.f32.xlu0 %v1221_v8 }
 0x1ac   : > { %v1201_v10 = vpop.xlane.xlu1 %1200 }
 0x1ad   : > { %v1211_v11 = vmul.f32 0.0078125, %v1201_v10  ;;  %v1222_v12 = vmul.f32 %v4228_v9, %v4228_v9 }
 0x1af   : > { %v4233_v13 = vsub.f32 %v4195_v34, %v1211_v11  ;;  %1229 = vadd.xlane.f32.xlu1 %v1222_v12 }
 0x1b0   : > { %v1203_v14 = vpop.xlane.xlu1 %1202 }
 0x1b1   : > { %v1212_v15 = vmul.f32 0.0078125, %v1203_v14  ;;  %v1223_v16 = vmul.f32 %v4233_v13, %v4233_v13 }
 0x1b3   : > { %v4238_v17 = vsub.f32 %v4198_v40, %v1212_v15  ;;  %1231 = vadd.xlane.f32.xlu0 %v1223_v16  ;;  %v3284_v15 = vld [vmem:[%s5139_s10] ss:$0 sm:$0xff] }
 0x1b4   : > { %v1205_v18 = vpop.xlane.xlu0 %1204 }
 0x1b5   : > { %v1213_v19 = vmul.f32 0.0078125, %v1205_v18  ;;  %v1224_v20 = vmul.f32 %v4238_v17, %v4238_v17 }
 0x1b7   : > { %v4252_v25 = vsub.f32 %v4201_v46, %v1213_v19  ;;  %1233 = vadd.xlane.f32.xlu1 %v1224_v20 }
 0x1b8   : > { %v1207_v26 = vpop.xlane.xlu1 %1206 }
 0x1b9   : > { %v1214_v27 = vmul.f32 0.0078125, %v1207_v26  ;;  %v1225_v29 = vmul.f32 %v4252_v25, %v4252_v25 }
 0x1bb   : > { %v4267_v33 = vsub.f32 %v4204_v52, %v1214_v27  ;;  %1235 = vadd.xlane.f32.xlu0 %v1225_v29 }
 0x1bd   : > { %v1226_v35 = vmul.f32 %v4267_v33, %v4267_v33 }
 0x1bf   : > { %1237 = vadd.xlane.f32.xlu1 %v1226_v35 }
 0x234   : > { %v1228_v54 = vpop.xlane.xlu0 %1227 }
 0x235   : > { %v1239_v55 = vmul.f32 0.0078125, %v1228_v54 }
 0x237   : > { %v1245_v56 = vadd.f32 1e-05, %v1239_v55 }
 0x238   : > { %v1230_v58 = vpop.xlane.xlu1 %1229 }
 0x239   : > { %3746 = vrsqrt.f32 %v1245_v56  ;;  %v1240_v59 = vmul.f32 0.0078125, %v1230_v58 }
 0x23b   : > { %v1246_v60 = vadd.f32 1e-05, %v1240_v59 }
 0x23c   : > { %v1232_v62 = vpop.xlane.xlu0 %1231 }
 0x23d   : > { %3748 = vrsqrt.f32 %v1246_v60  ;;  %v1241_v63 = vmul.f32 0.0078125, %v1232_v62 }
 0x23f   : > { %v1247_v2 = vadd.f32 1e-05, %v1241_v63 }
 0x240   : > { %v1234_v3 = vpop.xlane.xlu1 %1233 }
 0x241   : > { %3750 = vrsqrt.f32 %v1247_v2  ;;  %v1242_v4 = vmul.f32 0.0078125, %v1234_v3 }
 0x243   : > { %v1248_v6 = vadd.f32 1e-05, %v1242_v4 }
 0x244   : > { %v1236_v7 = vpop.xlane.xlu0 %1235 }
 0x245   : > { %3752 = vrsqrt.f32 %v1248_v6  ;;  %v1243_v8 = vmul.f32 0.0078125, %v1236_v7 }
 0x246   : > { %v3747_v10 = vpop.eup %3746 }
 0x247   : > { %v1257_v11 = vmul.f32 %v3747_v10, %v4223_v5  ;;  %v1249_v12 = vadd.f32 1e-05, %v1243_v8 }
 0x248   : > { %v1238_v14 = vpop.xlane.xlu1 %1237 }
 0x249   : > { %3754 = vrsqrt.f32 %v1249_v12  ;;  %v1244_v16 = vmul.f32 0.0078125, %v1238_v14  ;;  %v1270_v21 = vmul.f32 %v3284_v15, %v1257_v11 }
 0x24a   : > { %v3749_v18 = vpop.eup %3748 }
 0x24b   : > { %v1258_v19 = vmul.f32 %v3749_v18, %v4228_v9  ;;  %v1250_v20 = vadd.f32 1e-05, %v1244_v16  ;;  %v1283_v26 = vadd.f32 %v3285_v23, %v1270_v21 }
 0x24d   : > { %3756 = vrsqrt.f32 %v1250_v20  ;;  %v1271_v24 = vmul.f32 %v3284_v15, %v1258_v19 }
 0x24e   : > { %v3751_v5 = vpop.eup %3750 }
 0x24f   : > { %v1284_v27 = vadd.f32 %v3285_v23, %v1271_v24  ;;  %v1259_v29 = vmul.f32 %v3751_v5, %v4233_v13  ;;  %v1578_v5 = vld [vmem:[%s5194_s2] sm:$0xff] }
 0x251   : > { %v1289_v30 = vpack.c.bf16 %v1284_v27, %v1283_v26  ;;  %v1272_v9 = vmul.f32 %v3284_v15, %v1259_v29 }
 0x252   : > { %v3753_v31 = vpop.eup %3752 }
 0x253   : > { %1485 = vmatmul.mubr.bf16.vlgmr.msra.gmra.mxu0 %v1289_v30  ;;  %3494 = vmatmul.mubr.bf16.vlgmr.msra.gmra.mxu1 %v1289_v30  ;;  %v1260_v32 = vmul.f32 %v3753_v31, %v4238_v17  ;;  %v1285_v37 = vadd.f32 %v3285_v23, %v1272_v9  ;;  %v1579_v30 = vld [vmem:[%s5194_s2 + $0x8] sm:$0xff] }
 0x254   : > { %1494 = vmatprep.mubr.bf16.mxu0 %v3896_v1  ;;  %3497 = vmatprep.mubr.msk.bf16.mxu1 %vm3899_vm5, %v3898_v0 }
 0x255   : > { %v1273_v35 = vmul.f32 %v3284_v15, %v1260_v32 }
 0x256   : > { %v3755_v36 = vpop.eup %3754 }
 0x257   : > { %v1286_v38 = vadd.f32 %v3285_v23, %v1273_v35  ;;  %v1261_v39 = vmul.f32 %v3755_v36, %v4252_v25  ;;  %v1580_v36 = vld [vmem:[%s5194_s2 + $0x10] sm:$0xff] }
 0x259   : > { %v1290_v41 = vpack.c.bf16 %v1286_v38, %v1285_v37  ;;  %v1274_v43 = vmul.f32 %v3284_v15, %v1261_v39 }
 0x25a   : > { %v3757_v13 = vpop.eup %3756 }
 0x25b   : > { %1495 = vmatmul.mubr.bf16.gmra.mxu0 %v1290_v41  ;;  %3498 = vmatmul.mubr.bf16.gmra.mxu1 %v1290_v41  ;;  %v1262_v42 = vmul.f32 %v3757_v13, %v4267_v33  ;;  %v1287_v44 = vadd.f32 %v3285_v23, %v1274_v43  ;;  %v1581_v13 = vld [vmem:[%s5194_s2 + $0x18] sm:$0xff] }
 0x25c   : > { %1504 = vmatprep.mubr.bf16.mxu0 %v3896_v1  ;;  %3501 = vmatprep.mubr.msk.bf16.mxu1 %vm3899_vm5, %v3898_v0 }
 0x25d   : > { %v1275_v17 = vmul.f32 %v3284_v15, %v1262_v42 }
 0x25f   : > { %v1288_v45 = vadd.f32 %v3285_v23, %v1275_v17 }
 0x261   : > { %v1291_v47 = vpack.c.bf16 %v1288_v45, %v1287_v44  ;;  %v1582_v45 = vld [vmem:[%s5194_s2 + $0x20] sm:$0xff] }
 0x263   : > { %1505 = vmatmul.mubr.bf16.gmra.mxu0 %v1291_v47  ;;  %3502 = vmatmul.mubr.bf16.gmra.mxu1 %v1291_v47 }
 0x264   : > { %3511 = vmatprep.mubr.msk.bf16.mxu0 %vm3899_vm5, %v3898_v0  ;;  %3557 = vmatprep.mubr.msk.bf16.mxu1 %vm3899_vm5, %v3898_v0 }
 0x313   : > { %v1486_v25 = vpop.f32.mrf.mxu0  ;;  %v1549_v33 = vpop.f32.mrf.mxu1 }
 0x315   : > { %v1488_v48 = vpop.f32.mrf.mxu0  ;;  %v3495_v49 = vpop.f32.mrf.mxu1 }
 0x316   : > { %v1583_v49 = vld [vmem:[%s5194_s2 + $0x28] sm:$0xff] }
 0x317   : > { %v1490_v50 = vpop.f32.mrf.mxu0  ;;  %v1552_v51 = vpop.f32.mrf.mxu1 }
 0x318   : > { %v1572_v18 = vpack.c.bf16 %v1490_v50, %v1486_v25  ;;  %v1711_v23 = vpack.c.bf16 %v1552_v51, %v1549_v33 }
 0x319   : > { %v1492_v53 = vpop.f32.mrf.mxu0  ;;  %v3496_v54 = vpop.f32.mrf.mxu1 }
 0x31a   : > { %v1575_v16 = vpack.c.bf16 %v1492_v53, %v1488_v48 }
 0x31b   : > { %v1496_v55 = vpop.f32.mrf.mxu0  ;;  %v1557_v56 = vpop.f32.mrf.mxu1 }
 0x31d   : > { %v1498_v58 = vpop.f32.mrf.mxu0  ;;  %v3499_v59 = vpop.f32.mrf.mxu1 }
 0x31f   : > { %v1500_v60 = vpop.f32.mrf.mxu0  ;;  %v1560_v62 = vpop.f32.mrf.mxu1 }
 0x320   : > { %v1712_v20 = vpack.c.bf16 %v1560_v62, %v1557_v56  ;;  %v1573_v21 = vpack.c.bf16 %v1500_v60, %v1496_v55 }
 0x321   : > { %v1502_v63 = vpop.f32.mrf.mxu0  ;;  %v3500_v2 = vpop.f32.mrf.mxu1 }
 0x322   : > { %v1576_v15 = vpack.c.bf16 %v1502_v63, %v1498_v58 }
 0x323   : > { %v1506_v3 = vpop.f32.mrf.mxu0  ;;  %v1565_v4 = vpop.f32.mrf.mxu1 }
 0x325   : > { %v1508_v6 = vpop.f32.mrf.mxu0  ;;  %v3503_v7 = vpop.f32.mrf.mxu1 }
 0x327   : > { %v1510_v8 = vpop.f32.mrf.mxu0  ;;  %v1568_v10 = vpop.f32.mrf.mxu1 }
 0x328   : > { %v1713_v19 = vpack.c.bf16 %v1568_v10, %v1565_v4  ;;  %v1574_v24 = vpack.c.bf16 %v1510_v8, %v1506_v3 }
 0x329   : > { %v1512_v11 = vpop.f32.mrf.mxu0  ;;  %v3504_v12 = vpop.f32.mrf.mxu1 }
 0x32a   : > { %v1577_v14 = vpack.c.bf16 %v1512_v11, %v1508_v6 }
 0x32c   : > { %3506 = vmatpush3.bf16.xpose.msra.mxu0 %v1577_v14 }
 0x32d   : > { %3507 = vmatprep.subr.bf16.mxu0 %v3898_v0 }
 0x334   : > { %3508 = vmatpush3.bf16.xpose.msra.mxu0 %v1576_v15 }
 0x335   : > { %3509 = vmatprep.subr.bf16.mxu0 %v3898_v0 }
 0x33c   : > { %3510 = vmatpush3.bf16.xpose.msra.mxu0 %v1575_v16 }
 0x33d   : > { %3523 = vmatprep.subr.bf16.mxu0 %v3898_v0 }
 0x343   : > { %3512 = vmatmul.mubr.bf16.vlgmr.msra.gmra.mxu0 %v1572_v18 }
 0x344   : > { %3524 = vmatpush3.bf16.msra.mxu0 %v1713_v19  ;;  %3515 = vmatprep.mubr.msk.bf16.mxu0 %vm3899_vm5, %v3898_v0 }
 0x345   : > { %3525 = vmatprep.subr.bf16.mxu0 %v3898_v0 }
 0x348   : > { %3526 = vmatpush3.bf16.msra.mxu0 %v1712_v20 }
 0x349   : > { %3527 = vmatprep.subr.bf16.mxu0 %v3898_v0 }
 0x34b   : > { %3516 = vmatmul.mubr.bf16.gmra.mxu0 %v1573_v21 }
 0x34c   : > { %3528 = vmatpush3.bf16.msra.mxu0 %v1711_v23  ;;  %3519 = vmatprep.mubr.msk.bf16.mxu0 %vm3899_vm5, %v3898_v0 }
 0x353   : > { %3520 = vmatmul.mubr.bf16.gmra.mxu0 %v1574_v24 }
 0x354   : > { %3529 = vmatprep.mubr.msk.bf16.mxu0 %vm3899_vm5, %v3898_v0 }
 0x403   : > { %v1618_v26 = vpop.f32.mrf.mxu0 }
 0x404   : > { %v1619_v27 = vadd.f32 %v1618_v26, %v1578_v5 }
 0x405   : > { %v3513_v29 = vpop.f32.mrf.mxu0 }
 0x406   : > { %v1642_v31 = vsel %vm1641_vm6, %v1619_v27, -inf }
 0x407   : > { %1643 = vmax.xlane.f32.xlu0 %v1642_v31  ;;  %v1621_v32 = vpop.f32.mrf.mxu0 }
 0x408   : > { %v1622_v9 = vadd.f32 %v1621_v32, %v1579_v30  ;;  %v3674_v32 = vld [vmem:[%s5138_s9 + $0x38] sm:$0xff]  }
 0x409   : > { %v3514_v35 = vpop.f32.mrf.mxu0  ;;  %3542 = vmatpush3.bf16.msra.mxu1 %v3674_v32 }
 0x40a   : > { %v1645_v37 = vsel %vm1641_vm6, %v1622_v9, -inf  ;;  %3543 = vmatprep.subr.bf16.mxu1 %v3898_v0  ;;  %v3676_v35 = vld [vmem:[%s5138_s9 + $0x28] sm:$0xff]  }
 0x40b   : > { %1646 = vmax.xlane.f32.xlu1 %v1645_v37  ;;  %v1626_v38 = vpop.f32.mrf.mxu0  ;;  %v3678_v37 = vld [vmem:[%s5138_s9 + $0x18] sm:$0xff]  }
 0x40c   : > { %v1627_v39 = vadd.f32 %v1626_v38, %v1580_v36  ;;  %v3677_v36 = vld [vmem:[%s5138_s9 + $0x20] sm:$0xff]   ;;  %v3679_v38 = vld [vmem:[%s5138_s9 + $0x10] sm:$0xff]  }
 0x40d   : > { %v3517_v41 = vpop.f32.mrf.mxu0 }
 0x40e   : > { %v1648_v42 = vsel %vm1641_vm6, %v1627_v39, -inf }
 0x40f   : > { %1649 = vmax.xlane.f32.xlu0 %v1648_v42  ;;  %v1629_v43 = vpop.f32.mrf.mxu0 }
 0x410   : > { %v1630_v17 = vadd.f32 %v1629_v43, %v1581_v13 }
 0x411   : > { %v3518_v44 = vpop.f32.mrf.mxu0 }
 0x412   : > { %v1651_v47 = vsel %vm1641_vm6, %v1630_v17, -inf }
 0x413   : > { %1652 = vmax.xlane.f32.xlu1 %v1651_v47  ;;  %v1634_v25 = vpop.f32.mrf.mxu0 }
 0x414   : > { %v1635_v33 = vadd.f32 %v1634_v25, %v1582_v45 }
 0x415   : > { %v3521_v48 = vpop.f32.mrf.mxu0 }
 0x416   : > { %v1654_v50 = vsel %vm1641_vm6, %v1635_v33, -inf }
 0x417   : > { %1655 = vmax.xlane.f32.xlu0 %v1654_v50  ;;  %v1637_v51 = vpop.f32.mrf.mxu0 }
 0x418   : > { %v1638_v53 = vadd.f32 %v1637_v51, %v1583_v49 }
 0x419   : > { %v3522_v54 = vpop.f32.mrf.mxu0 }
 0x41a   : > { %v1657_v55 = vsel %vm1641_vm6, %v1638_v53, -inf }
 0x41b   : > { %1658 = vmax.xlane.f32.xlu1 %v1657_v55 }
 0x490   : > { %v1644_v56 = vpop.xlane.xlu0 %1643 }
 0x491   : > { %v1660_v58 = vsub.f32 %v1619_v27, %v1644_v56 }
 0x493   : > { %v1666_v59 = vmul.f32 1.442695, %v1660_v58 }
 0x494   : > { %v1647_v60 = vpop.xlane.xlu1 %1646 }
 0x495   : > { %3758 = vpow2.f32 %v1666_v59  ;;  %v1661_v62 = vsub.f32 %v1622_v9, %v1647_v60  ;;  %v3675_v9 = vld [vmem:[%s5138_s9 + $0x30] sm:$0xff]   ;;  %v3680_v60 = vld [vmem:[%s5138_s9 + $0x8] sm:$0xff]  }
 0x496   : > { %3544 = vmatpush3.bf16.msra.mxu1 %v3675_v9 }
 0x497   : > { %v1668_v63 = vmul.f32 1.442695, %v1661_v62  ;;  %3545 = vmatprep.subr.bf16.mxu1 %v3898_v0  ;;  %v3681_v62 = vld [vmem:[%s5138_s9] sm:$0xff]  }
 0x498   : > { %v1650_v2 = vpop.xlane.xlu0 %1649 }
 0x499   : > { %3760 = vpow2.f32 %v1668_v63  ;;  %v1662_v3 = vsub.f32 %v1627_v39, %v1650_v2 }
 0x49a   : > { %3546 = vmatpush3.bf16.msra.mxu1 %v3676_v35 }
 0x49b   : > { %v1670_v4 = vmul.f32 1.442695, %v1662_v3  ;;  %3547 = vmatprep.subr.bf16.mxu1 %v3898_v0 }
 0x49c   : > { %v1653_v6 = vpop.xlane.xlu1 %1652 }
 0x49d   : > { %3762 = vpow2.f32 %v1670_v4  ;;  %v1663_v7 = vsub.f32 %v1630_v17, %v1653_v6 }
 0x49e   : > { %3548 = vmatpush3.bf16.msra.mxu1 %v3677_v36 }
 0x49f   : > { %v1672_v8 = vmul.f32 1.442695, %v1663_v7  ;;  %3549 = vmatprep.subr.bf16.mxu1 %v3898_v0 }
 0x4a0   : > { %v1656_v10 = vpop.xlane.xlu0 %1655 }
 0x4a1   : > { %3764 = vpow2.f32 %v1672_v8  ;;  %v1664_v11 = vsub.f32 %v1635_v33, %v1656_v10 }
 0x4a2   : > { %v3759_v12 = vpop.eup %3758  ;;  %3550 = vmatpush3.bf16.msra.mxu1 %v3678_v37 }
 0x4a3   : > { %v1674_v14 = vmul.f32 1.442695, %v1664_v11  ;;  %v1678_v15 = vsel %vm1641_vm6, %v3759_v12, 0.0  ;;  %3551 = vmatprep.subr.bf16.mxu1 %v3898_v0 }
 0x4a4   : > { %1679 = vadd.xlane.f32.xlu0 %v1678_v15  ;;  %v1659_v16 = vpop.xlane.xlu1 %1658 }
 0x4a5   : > { %3766 = vpow2.f32 %v1674_v14  ;;  %v1665_v18 = vsub.f32 %v1638_v53, %v1659_v16 }
 0x4a6   : > { %v3761_v19 = vpop.eup %3760  ;;  %3552 = vmatpush3.bf16.msra.mxu1 %v3679_v38 }
 0x4a7   : > { %v1676_v20 = vmul.f32 1.442695, %v1665_v18  ;;  %v1681_v21 = vsel %vm1641_vm6, %v3761_v19, 0.0  ;;  %3553 = vmatprep.subr.bf16.mxu1 %v3898_v0 }
 0x4a8   : > { %1682 = vadd.xlane.f32.xlu1 %v1681_v21 }
 0x4a9   : > { %3768 = vpow2.f32 %v1676_v20 }
 0x4aa   : > { %v3763_v23 = vpop.eup %3762  ;;  %3554 = vmatpush3.bf16.msra.mxu1 %v3680_v60  ;;  %v3687_v60 = vld [vmem:[%s5141_s12 + $0x64] ss:$8 sps:$4 sm:$0xff]  }
 0x4ab   : > { %v1684_v24 = vsel %vm1641_vm6, %v3763_v23, 0.0  ;;  %3555 = vmatprep.subr.bf16.mxu1 %v3898_v0 }
 0x4ac   : > { %1685 = vadd.xlane.f32.xlu0 %v1684_v24 }
 0x4ae   : > { %v3765_v5 = vpop.eup %3764  ;;  %3556 = vmatpush3.bf16.msra.mxu1 %v3681_v62  ;;  %v3685_v62 = vld [vmem:[%s5141_s12 + $0x60] ss:$8 sps:$4 sm:$0xff]  }
 0x4af   : > { %v1687_v26 = vsel %vm1641_vm6, %v3765_v5, 0.0 }
 0x4b0   : > { %1688 = vadd.xlane.f32.xlu1 %v1687_v26 }
 0x4b2   : > { %v3767_v27 = vpop.eup %3766 }
 0x4b3   : > { %v1690_v29 = vsel %vm1641_vm6, %v3767_v27, 0.0 }
 0x4b4   : > { %1691 = vadd.xlane.f32.xlu0 %v1690_v29 }
 0x4b6   : > { %v3769_v30 = vpop.eup %3768 }
 0x4b7   : > { %v1693_v31 = vsel %vm1641_vm6, %v3769_v30, 0.0 }
 0x4b8   : > { %1694 = vadd.xlane.f32.xlu1 %v1693_v31 }
 0x52d   : > { %v1680_v39 = vpop.xlane.xlu0 %1679 }
 0x52e   : > { %3770 = vrcp.f32 %v1680_v39 }
 0x531   : > { %v1683_v41 = vpop.xlane.xlu1 %1682 }
 0x532   : > { %3772 = vrcp.f32 %v1683_v41  ;;  %v3682_v41 = vld [vmem:[%s5141_s12 + $0x70] ss:$8 sps:$4 sm:$0xff]  }
 0x535   : > { %v1686_v13 = vpop.xlane.xlu0 %1685 }
 0x536   : > { %3774 = vrcp.f32 %v1686_v13  ;;  %v3684_v13 = vld [vmem:[%s5141_s12 + $0x74] ss:$8 sps:$4 sm:$0xff]  }
 0x537   : > { %2113 = vmatprep.subr.bf16.mxu0 %v3684_v13 }
 0x539   : > { %v1689_v42 = vpop.xlane.xlu1 %1688 }
 0x53a   : > { %3776 = vrcp.f32 %v1689_v42 }
 0x53b   : > { %v3771_v43 = vpop.eup %3770 }
 0x53c   : > { %v1702_v45 = vmul.f32 %v3771_v43, %v3759_v12 }
 0x53d   : > { %v1692_v17 = vpop.xlane.xlu0 %1691 }
 0x53e   : > { %3778 = vrcp.f32 %v1692_v17 }
 0x53f   : > { %v3773_v44 = vpop.eup %3772 }
 0x540   : > { %v1703_v47 = vmul.f32 %v3773_v44, %v3761_v19 }
 0x541   : > { %v1695_v25 = vpop.xlane.xlu1 %1694 }
 0x542   : > { %v1708_v33 = vpack.c.bf16 %v1703_v47, %v1702_v45  ;;  %3780 = vrcp.f32 %v1695_v25 }
 0x543   : > { %v3775_v48 = vpop.eup %3774 }
 0x544   : > { %3530 = vmatmul.mubr.msk.bf16.vlgmr.msra.gmra.mxu0 %vm1641_vm6, %v1708_v33  ;;  %v1704_v50 = vmul.f32 %v3775_v48, %v3763_v23 }
 0x545   : > { %3533 = vmatprep.mubr.msk.bf16.mxu0 %vm3899_vm5, %v3898_v0  ;;  %2114 = vmatpush1.bf16.msra.mxu0 %v3682_v41 }
 0x546   : > { %2115 = vmatprep.subr.bf16.mxu0 %v3687_v60 }
 0x547   : > { %v3777_v49 = vpop.eup %3776 }
 0x548   : > { %v1705_v51 = vmul.f32 %v3777_v49, %v3765_v5 }
 0x549   : > { %2116 = vmatpush1.bf16.msra.mxu0 %v3685_v62 }
 0x54a   : > { %v1709_v53 = vpack.c.bf16 %v1705_v51, %v1704_v50 }
 0x54b   : > { %v3779_v54 = vpop.eup %3778 }
 0x54c   : > { %3534 = vmatmul.mubr.msk.bf16.gmra.mxu0 %vm1641_vm6, %v1709_v53  ;;  %v1706_v56 = vmul.f32 %v3779_v54, %v3767_v27 }
 0x54d   : > { %3537 = vmatprep.mubr.msk.bf16.mxu0 %vm3899_vm5, %v3898_v0 }
 0x54f   : > { %v3781_v55 = vpop.eup %3780 }
 0x550   : > { %v1707_v58 = vmul.f32 %v3781_v55, %v3769_v30 }
 0x552   : > { %v1710_v59 = vpack.c.bf16 %v1707_v58, %v1706_v56 }
 0x554   : > { %3538 = vmatmul.mubr.msk.bf16.gmra.mxu0 %vm1641_vm6, %v1710_v59 }
 0x555   : > { %2145 = vmatprep.mubr.bf16.mxu0 %v3896_v1 }
 0x604   : > { %v1757_v63 = vpop.f32.mrf.mxu0 }
 0x606   : > { %v3531_v2 = vpop.f32.mrf.mxu0 }
 0x608   : > { %v1760_v3 = vpop.f32.mrf.mxu0 }
 0x609   : > { %v1780_v4 = vpack.c.bf16 %v1760_v3, %v1757_v63 }
 0x60a   : > { %v3532_v6 = vpop.f32.mrf.mxu0 }
 0x60b   : > { %3558 = vmatmul.mubr.bf16.vlgmr.msra.gmra.mxu1 %v1780_v4  ;;  %v3690_v6 = vld [vmem:[%s5141_s12 + $0x54] ss:$8 sps:$4 sm:$0xff]  }
 0x60c   : > { %v1765_v7 = vpop.f32.mrf.mxu0  ;;  %3561 = vmatprep.mubr.msk.bf16.mxu1 %vm3899_vm5, %v3898_v0  ;;  %2117 = vmatprep.subr.bf16.mxu0 %v3690_v6 }
 0x60e   : > { %v3535_v8 = vpop.f32.mrf.mxu0 }
 0x610   : > { %v1768_v10 = vpop.f32.mrf.mxu0 }
 0x611   : > { %v1781_v11 = vpack.c.bf16 %v1768_v10, %v1765_v7  ;;  %v3688_v7 = vld [vmem:[%s5141_s12 + $0x50] ss:$8 sps:$4 sm:$0xff]  }
 0x612   : > { %v3536_v12 = vpop.f32.mrf.mxu0  ;;  %2118 = vmatpush1.bf16.msra.mxu0 %v3688_v7 }
 0x613   : > { %3562 = vmatmul.mubr.bf16.gmra.mxu1 %v1781_v11  ;;  %v3693_v11 = vld [vmem:[%s5141_s12 + $0x44] ss:$8 sps:$4 sm:$0xff]   ;;  %v3691_v12 = vld [vmem:[%s5141_s12 + $0x40] ss:$8 sps:$4 sm:$0xff]  }
 0x614   : > { %v1773_v14 = vpop.f32.mrf.mxu0  ;;  %3565 = vmatprep.mubr.msk.bf16.mxu1 %vm3899_vm5, %v3898_v0  ;;  %2119 = vmatprep.subr.bf16.mxu0 %v3693_v11 }
 0x616   : > { %v3539_v15 = vpop.f32.mrf.mxu0  ;;  %2120 = vmatpush1.bf16.msra.mxu0 %v3691_v12 }
 0x617   : > { %v3694_v15 = vld [vmem:[%s5141_s12 + $0x30] ss:$8 sps:$4 sm:$0xff]  }
 0x618   : > { %v1776_v16 = vpop.f32.mrf.mxu0 }
 0x619   : > { %v1782_v18 = vpack.c.bf16 %v1776_v16, %v1773_v14  ;;  %v3696_v14 = vld [vmem:[%s5141_s12 + $0x34] ss:$8 sps:$4 sm:$0xff]   ;;  %v3699_v16 = vld [vmem:[%s5141_s12 + $0x24] ss:$8 sps:$4 sm:$0xff]  }
 0x61a   : > { %v3540_v19 = vpop.f32.mrf.mxu0  ;;  %2121 = vmatprep.subr.bf16.mxu0 %v3696_v14 }
 0x61b   : > { %3566 = vmatmul.mubr.bf16.gmra.mxu1 %v1782_v18  ;;  %2122 = vmatpush1.bf16.msra.mxu0 %v3694_v15  ;;  %v3697_v18 = vld [vmem:[%s5141_s12 + $0x20] ss:$8 sps:$4 sm:$0xff]   ;;  %v3702_v19 = vld [vmem:[%s5141_s12 + $0x14] ss:$8 sps:$4 sm:$0xff]  }
 0x61c   : > { %2123 = vmatprep.subr.bf16.mxu0 %v3699_v16 }
 0x61f   : > { %2124 = vmatpush1.bf16.msra.mxu0 %v3697_v18 }
 0x620   : > { %2125 = vmatprep.subr.bf16.mxu0 %v3702_v19 }
 0x6cb   : > { %v1881_v20 = vpop.f32.mrf.mxu1 }
 0x6cc   : > { %v4432_v21 = vadd.f32 %v1881_v20, %v4189_v22  ;;  %v3700_v20 = vld [vmem:[%s5141_s12 + $0x10] ss:$8 sps:$4 sm:$0xff]  }
 0x6cd   : > { %v3559_v23 = vpop.f32.mrf.mxu1  ;;  %2126 = vmatpush1.bf16.msra.mxu0 %v3700_v20 }
 0x6ce   : > { %1910 = vadd.xlane.f32.xlu0 %v4432_v21  ;;  %v3703_v23 = vld [vmem:[%s5141_s12] ss:$8 sps:$4 sm:$0xff]  }
 0x6cf   : > { %v1884_v24 = vpop.f32.mrf.mxu1 }
 0x6d0   : > { %v4436_v5 = vadd.f32 %v1884_v24, %v4192_v28  ;;  %v3705_v24 = vld [vmem:[%s5141_s12 + $0x4] ss:$8 sps:$4 sm:$0xff]  }
 0x6d1   : > { %v3560_v26 = vpop.f32.mrf.mxu1  ;;  %2127 = vmatprep.subr.bf16.mxu0 %v3705_v24 }
 0x6d2   : > { %1912 = vadd.xlane.f32.xlu1 %v4436_v5  ;;  %2128 = vmatpush1.bf16.msra.mxu0 %v3703_v23 }
 0x6d3   : > { %v1889_v0 = vpop.f32.mrf.mxu1 }
 0x6d4   : > { %v4440_v27 = vadd.f32 %v1889_v0, %v4195_v34 }
 0x6d5   : > { %v3563_v29 = vpop.f32.mrf.mxu1 }
 0x6d6   : > { %1914 = vadd.xlane.f32.xlu0 %v4440_v27 }
 0x6d7   : > { %v1892_v30 = vpop.f32.mrf.mxu1 }
 0x6d8   : > { %v4444_v31 = vadd.f32 %v1892_v30, %v4198_v40 }
 0x6d9   : > { %v3564_v32 = vpop.f32.mrf.mxu1 }
 0x6da   : > { %1916 = vadd.xlane.f32.xlu1 %v4444_v31 }
 0x6db   : > { %v1897_v9 = vpop.f32.mrf.mxu1 }
 0x6dc   : > { %v4448_v35 = vadd.f32 %v1897_v9, %v4201_v46 }
 0x6dd   : > { %v3567_v36 = vpop.f32.mrf.mxu1 }
 0x6de   : > { %1918 = vadd.xlane.f32.xlu0 %v4448_v35 }
 0x6df   : > { %v1900_v37 = vpop.f32.mrf.mxu1 }
 0x6e0   : > { %v4452_v38 = vadd.f32 %v1900_v37, %v4204_v52 }
 0x6e1   : > { %v3568_v39 = vpop.f32.mrf.mxu1 }
 0x6e2   : > { %1920 = vadd.xlane.f32.xlu1 %v4452_v38 }
 0x757   : > { %v1911_v42 = vpop.xlane.xlu0 %1910 }
 0x758   : > { %v1922_v43 = vmul.f32 0.0078125, %v1911_v42 }
 0x75a   : > { %v4462_v17 = vsub.f32 %v4432_v21, %v1922_v43 }
 0x75b   : > { %v1913_v44 = vpop.xlane.xlu1 %1912 }
 0x75c   : > { %v1923_v45 = vmul.f32 0.0078125, %v1913_v44  ;;  %v1934_v47 = vmul.f32 %v4462_v17, %v4462_v17 }
 0x75e   : > { %v4467_v25 = vsub.f32 %v4436_v5, %v1923_v45  ;;  %1940 = vadd.xlane.f32.xlu0 %v1934_v47 }
 0x75f   : > { %v1915_v33 = vpop.xlane.xlu0 %1914 }
 0x760   : > { %v1924_v48 = vmul.f32 0.0078125, %v1915_v33  ;;  %v1935_v49 = vmul.f32 %v4467_v25, %v4467_v25 }
 0x762   : > { %v4472_v50 = vsub.f32 %v4440_v27, %v1924_v48  ;;  %1942 = vadd.xlane.f32.xlu1 %v1935_v49  ;;  %v3321_v49 = vld [vmem:[%s5145_s16] ss:$0 sm:$0xff] }
 0x763   : > { %v1917_v51 = vpop.xlane.xlu1 %1916 }
 0x764   : > { %v1925_v53 = vmul.f32 0.0078125, %v1917_v51  ;;  %v1936_v54 = vmul.f32 %v4472_v50, %v4472_v50 }
 0x766   : > { %v4477_v55 = vsub.f32 %v4444_v31, %v1925_v53  ;;  %1944 = vadd.xlane.f32.xlu0 %v1936_v54 }
 0x767   : > { %v1919_v56 = vpop.xlane.xlu0 %1918 }
 0x768   : > { %v1926_v58 = vmul.f32 0.0078125, %v1919_v56  ;;  %v1937_v59 = vmul.f32 %v4477_v55, %v4477_v55 }
 0x76a   : > { %v4488_v63 = vsub.f32 %v4448_v35, %v1926_v58  ;;  %1946 = vadd.xlane.f32.xlu1 %v1937_v59  ;;  %v3322_v59 = vld [vmem:[%s5146_s17] ss:$0 sm:$0xff] }
 0x76b   : > { %v1921_v2 = vpop.xlane.xlu1 %1920 }
 0x76c   : > { %v1927_v3 = vmul.f32 0.0078125, %v1921_v2  ;;  %v1938_v4 = vmul.f32 %v4488_v63, %v4488_v63 }
 0x76e   : > { %v4499_v8 = vsub.f32 %v4452_v38, %v1927_v3  ;;  %1948 = vadd.xlane.f32.xlu0 %v1938_v4 }
 0x770   : > { %v1939_v10 = vmul.f32 %v4499_v8, %v4499_v8 }
 0x772   : > { %1950 = vadd.xlane.f32.xlu1 %v1939_v10 }
 0x7e7   : > { %v1941_v26 = vpop.xlane.xlu0 %1940 }
 0x7e8   : > { %v1952_v0 = vmul.f32 0.0078125, %v1941_v26  ;;  %v3706_v26 = vld [vmem:[%s5143_s14 + $0x78] sm:$0xff]  }
 0x7e9   : > { %3423 = vmatprep.subr.bf16.mxu1 %v3706_v26 }
 0x7ea   : > { %v1958_v29 = vadd.f32 1e-05, %v1952_v0  ;;  %v3709_v0 = vld [vmem:[%s5143_s14 + $0x30] sm:$0xff]  }
 0x7eb   : > { %v1943_v30 = vpop.xlane.xlu1 %1942 }
 0x7ec   : > { %3782 = vrsqrt.f32 %v1958_v29  ;;  %v1953_v32 = vmul.f32 0.0078125, %v1943_v30  ;;  %v3710_v29 = vld [vmem:[%s5143_s14 + $0x68] sm:$0xff]  }
 0x7ed   : > { %v3711_v30 = vld [vmem:[%s5143_s14 + $0x28] sm:$0xff]  }
 0x7ee   : > { %v1959_v9 = vadd.f32 1e-05, %v1953_v32  ;;  %v3712_v32 = vld [vmem:[%s5143_s14 + $0x60] sm:$0xff]  }
 0x7ef   : > { %v1945_v36 = vpop.xlane.xlu0 %1944 }
 0x7f0   : > { %3784 = vrsqrt.f32 %v1959_v9  ;;  %v1954_v37 = vmul.f32 0.0078125, %v1945_v36  ;;  %v3713_v9 = vld [vmem:[%s5143_s14 + $0x20] sm:$0xff]   ;;  %v3714_v36 = vld [vmem:[%s5143_s14 + $0x58] sm:$0xff]  }
 0x7f2   : > { %v1960_v39 = vadd.f32 1e-05, %v1954_v37  ;;  %v3715_v37 = vld [vmem:[%s5143_s14 + $0x18] sm:$0xff]  }
 0x7f3   : > { %v1947_v41 = vpop.xlane.xlu1 %1946 }
 0x7f4   : > { %3786 = vrsqrt.f32 %v1960_v39  ;;  %v1955_v13 = vmul.f32 0.0078125, %v1947_v41  ;;  %v3716_v39 = vld [vmem:[%s5143_s14 + $0x50] sm:$0xff]  }
 0x7f5   : > { %v3717_v41 = vld [vmem:[%s5143_s14 + $0x10] sm:$0xff]  }
 0x7f6   : > { %v1961_v42 = vadd.f32 1e-05, %v1955_v13  ;;  %v3718_v13 = vld [vmem:[%s5143_s14 + $0x48] sm:$0xff]  }
 0x7f7   : > { %v1949_v43 = vpop.xlane.xlu0 %1948 }
 0x7f8   : > { %3788 = vrsqrt.f32 %v1961_v42  ;;  %v1956_v44 = vmul.f32 0.0078125, %v1949_v43  ;;  %v3719_v42 = vld [vmem:[%s5143_s14 + $0x8] sm:$0xff]   ;;  %v3720_v43 = vld [vmem:[%s5143_s14 + $0x40] sm:$0xff]  }
 0x7f9   : > { %v3783_v45 = vpop.eup %3782 }
 0x7fa   : > { %v1970_v47 = vmul.f32 %v3783_v45, %v4462_v17  ;;  %v1962_v33 = vadd.f32 1e-05, %v1956_v44  ;;  %v3721_v44 = vld [vmem:[%s5143_s14] sm:$0xff]   ;;  %v3724_v45 = vld [vmem:[%s5147_s18 + $0x74] ss:$8 sps:$4 sm:$0xff]  }
 0x7fb   : > { %v1951_v48 = vpop.xlane.xlu1 %1950  ;;  %2611 = vmatprep.subr.bf16.mxu0 %v3724_v45 }
 0x7fc   : > { %3790 = vrsqrt.f32 %v1962_v33  ;;  %v1957_v51 = vmul.f32 0.0078125, %v1951_v48  ;;  %v1983_v58 = vmul.f32 %v3321_v49, %v1970_v47  ;;  %v4602_v47 = vld [vmem:[%s5147_s18 + $0x70] ss:$8 sps:$4 sm:$0xff]   ;;  %v4607_v33 = vld [vmem:[%s5147_s18 + $0x64] ss:$8 sps:$4 sm:$0xff]  }
 0x7fd   : > { %v3785_v53 = vpop.eup %3784  ;;  %v4613_v48 = vld [vmem:[%s5147_s18 + $0x60] ss:$8 sps:$4 sm:$0xff]  }
 0x7fe   : > { %v1971_v54 = vmul.f32 %v3785_v53, %v4467_v25  ;;  %v1963_v56 = vadd.f32 1e-05, %v1957_v51  ;;  %v1996_v62 = vadd.f32 %v3322_v59, %v1983_v58  ;;  %v4625_v51 = vld [vmem:[%s5147_s18 + $0x50] ss:$8 sps:$4 sm:$0xff]   ;;  %v4631_v53 = vld [vmem:[%s5147_s18 + $0x44] ss:$8 sps:$4 sm:$0xff]  }
 0x7ff   : > { %v4649_v58 = vld [vmem:[%s5147_s18 + $0x30] ss:$8 sps:$4 sm:$0xff]  }
 0x800   : > { %3792 = vrsqrt.f32 %v1963_v56  ;;  %v1984_v60 = vmul.f32 %v3321_v49, %v1971_v54  ;;  %v4637_v54 = vld [vmem:[%s5147_s18 + $0x40] ss:$8 sps:$4 sm:$0xff]   ;;  %v4644_v56 = vld [vmem:[%s5147_s18 + $0x34] ss:$8 sps:$4 sm:$0xff]  }
 0x801   : > { %v3787_v17 = vpop.eup %3786 }
 0x802   : > { %v1997_v2 = vadd.f32 %v3322_v59, %v1984_v60  ;;  %v1972_v3 = vmul.f32 %v3787_v17, %v4472_v50  ;;  %v4661_v60 = vld [vmem:[%s5147_s18 + $0x20] ss:$8 sps:$4 sm:$0xff]   ;;  %v4668_v17 = vld [vmem:[%s5147_s18 + $0x14] ss:$8 sps:$4 sm:$0xff]  }
 0x804   : > { %v2002_v4 = vpack.c.bf16 %v1997_v2, %v1996_v62  ;;  %v1985_v10 = vmul.f32 %v3321_v49, %v1972_v3  ;;  %v4673_v62 = vld [vmem:[%s5147_s18 + $0x10] ss:$8 sps:$4 sm:$0xff]   ;;  %v4680_v2 = vld [vmem:[%s5147_s18 + $0x4] ss:$8 sps:$4 sm:$0xff]   ;;  %v4685_v3 = vld [vmem:[%s5147_s18] ss:$8 sps:$4 sm:$0xff]  }
 0x805   : > { %v3789_v6 = vpop.eup %3788 }
 0x806   : > { %2146 = vmatmul.mubr.bf16.vlgmr.msra.gmra.mxu0 %v2002_v4  ;;  %v1973_v7 = vmul.f32 %v3789_v6, %v4477_v55  ;;  %v1998_v12 = vadd.f32 %v3322_v59, %v1985_v10  ;;  %v5164_v4 = vlaneseq  ;;  %v2021_v10 = vld [vmem:[%s5142_s13] sm:$0x3] }
 0x807   : > { %2155 = vmatprep.mubr.bf16.mxu0 %v3896_v1  ;;  %2612 = vmatpush1.bf16.msra.mxu0 %v4602_v47 }
 0x808   : > { %v1986_v25 = vmul.f32 %v3321_v49, %v1973_v7  ;;  %2613 = vmatprep.subr.bf16.mxu0 %v4607_v33  ;;  %v4690_v6 = vshrl.u32 %v5164_v4, 7 }
 0x809   : > { %v3791_v11 = vpop.eup %3790 }
 0x80a   : > { %v1999_v14 = vadd.f32 %v3322_v59, %v1986_v25  ;;  %v1974_v15 = vmul.f32 %v3791_v11, %v4488_v63  ;;  %v3707_v63 = vld [vmem:[%s5143_s14 + $0x38] sm:$0xff]   ;;  %v5166_v7 = vsub.s32 0, %v4690_v6  ;;  %v5165_v25 = vsub.s32 1, %v4690_v6 }
 0x80b   : > { %3424 = vmatpush3.bf16.msra.mxu1 %v3707_v63  ;;  %2614 = vmatpush1.bf16.msra.mxu0 %v4613_v48 }
 0x80c   : > { %v2003_v16 = vpack.c.bf16 %v1999_v14, %v1998_v12  ;;  %v1987_v50 = vmul.f32 %v3321_v49, %v1974_v15  ;;  %v4699_v11 = vrot.slane %v2021_v10, %v5166_v7  ;;  %v4703_v12 = vrot.slane %v2021_v10, %v5165_v25 }
 0x80d   : > { %v3793_v18 = vpop.eup %3792 }
 0x80e   : > { %2156 = vmatmul.mubr.bf16.gmra.mxu0 %v2003_v16  ;;  %v1975_v19 = vmul.f32 %v3793_v18, %v4499_v8  ;;  %v2000_v23 = vadd.f32 %v3322_v59, %v1987_v50  ;;  %v3708_v8 = vld [vmem:[%s5143_s14 + $0x70] sm:$0xff]  }
 0x80f   : > { %2165 = vmatprep.mubr.bf16.mxu0 %v3896_v1  ;;  %3425 = vmatprep.subr.bf16.mxu1 %v3708_v8 }
 0x810   : > { %v1988_v20 = vmul.f32 %v3321_v49, %v1975_v19  ;;  %3426 = vmatpush3.bf16.msra.mxu1 %v3709_v0  ;;  %v4620_v49 = vld [vmem:[%s5147_s18 + $0x54] ss:$8 sps:$4 sm:$0xff]  }
 0x811   : > { %3427 = vmatprep.subr.bf16.mxu1 %v3710_v29  ;;  %2615 = vmatprep.subr.bf16.mxu0 %v4620_v49 }
 0x812   : > { %v2001_v55 = vadd.f32 %v3322_v59, %v1988_v20  ;;  %2616 = vmatpush1.bf16.msra.mxu0 %v4625_v51  ;;  %v4656_v59 = vld [vmem:[%s5147_s18 + $0x24] ss:$8 sps:$4 sm:$0xff]  }
 0x813   : > { %2617 = vmatprep.subr.bf16.mxu0 %v4631_v53 }
 0x814   : > { %v2004_v24 = vpack.c.bf16 %v2001_v55, %v2000_v23  ;;  %3428 = vmatpush3.bf16.msra.mxu1 %v3711_v30 }
 0x815   : > { %3429 = vmatprep.subr.bf16.mxu1 %v3712_v32 }
 0x816   : > { %2166 = vmatmul.mubr.bf16.gmra.mxu0 %v2004_v24 }
 0x817   : > { %2643 = vmatprep.mubr.bf16.mxu0 %v3896_v1  ;;  %2618 = vmatpush1.bf16.msra.mxu0 %v4637_v54 }
 0x818   : > { %3430 = vmatpush3.bf16.msra.mxu1 %v3713_v9  ;;  %2619 = vmatprep.subr.bf16.mxu0 %v4644_v56 }
 0x819   : > { %3431 = vmatprep.subr.bf16.mxu1 %v3714_v36 }
 0x81b   : > { %2620 = vmatpush1.bf16.msra.mxu0 %v4649_v58 }
 0x81c   : > { %3432 = vmatpush3.bf16.msra.mxu1 %v3715_v37  ;;  %2621 = vmatprep.subr.bf16.mxu0 %v4656_v59 }
 0x81d   : > { %3433 = vmatprep.subr.bf16.mxu1 %v3716_v39 }
 0x81f   : > { %2622 = vmatpush1.bf16.msra.mxu0 %v4661_v60 }
 0x820   : > { %3434 = vmatpush3.bf16.msra.mxu1 %v3717_v41  ;;  %2623 = vmatprep.subr.bf16.mxu0 %v4668_v17 }
 0x821   : > { %3435 = vmatprep.subr.bf16.mxu1 %v3718_v13 }
 0x823   : > { %2624 = vmatpush1.bf16.msra.mxu0 %v4673_v62 }
 0x824   : > { %3436 = vmatpush3.bf16.msra.mxu1 %v3719_v42  ;;  %2625 = vmatprep.subr.bf16.mxu0 %v4680_v2 }
 0x825   : > { %3437 = vmatprep.subr.bf16.mxu1 %v3720_v43 }
 0x827   : > { %2626 = vmatpush1.bf16.msra.mxu0 %v4685_v3 }
 0x828   : > { %3438 = vmatpush3.bf16.msra.mxu1 %v3721_v44 }
 0x829   : > { %2678 = vmatprep.subr.bf16.mxu1 %v3724_v45 }
 0x8c6   : > { %v2147_v14 = vpop.f32.mrf.mxu0 }
 0x8c7   : > { %v4706_v15 = vadd.f32 %v2147_v14, %v4699_v11 }
 0x8c8   : > { %v2149_v16 = vpop.f32.mrf.mxu0 }
 0x8c9   : > { %v2176_v18 = vmul.f32 %v4706_v15, %v4706_v15  ;;  %v4711_v19 = vadd.f32 %v2149_v16, %v4703_v12 }
 0x8ca   : > { %v2151_v50 = vpop.f32.mrf.mxu0 }
 0x8cb   : > { %v2188_v20 = vmul.f32 %v2176_v18, %v4706_v15  ;;  %v2177_v23 = vmul.f32 %v4711_v19, %v4711_v19  ;;  %v4717_v55 = vadd.f32 %v2151_v50, %v4699_v11 }
 0x8cc   : > { %v2153_v24 = vpop.f32.mrf.mxu0 }
 0x8cd   : > { %v2200_v26 = vmul.f32 0.044715, %v2188_v20  ;;  %v2189_v63 = vmul.f32 %v2177_v23, %v4711_v19  ;;  %v2178_v8 = vmul.f32 %v4717_v55, %v4717_v55  ;;  %v4723_v0 = vadd.f32 %v2153_v24, %v4703_v12 }
 0x8ce   : > { %v2157_v29 = vpop.f32.mrf.mxu0 }
 0x8cf   : > { %v2212_v30 = vadd.f32 %v2200_v26, %v4706_v15  ;;  %v2201_v32 = vmul.f32 0.044715, %v2189_v63  ;;  %v2190_v9 = vmul.f32 %v2178_v8, %v4717_v55  ;;  %v2179_v36 = vmul.f32 %v4723_v0, %v4723_v0 }
 0x8d0   : > { %v4730_v37 = vadd.f32 %v2157_v29, %v4699_v11  ;;  %v2159_v39 = vpop.f32.mrf.mxu0 }
 0x8d1   : > { %v2224_v41 = vmul.f32 0.7978846, %v2212_v30  ;;  %v2213_v13 = vadd.f32 %v2201_v32, %v4711_v19  ;;  %v2202_v42 = vmul.f32 0.044715, %v2190_v9  ;;  %v2191_v43 = vmul.f32 %v2179_v36, %v4723_v0 }
 0x8d2   : > { %v2180_v44 = vmul.f32 %v4730_v37, %v4730_v37  ;;  %v4737_v45 = vadd.f32 %v2159_v39, %v4703_v12  ;;  %v2161_v10 = vpop.f32.mrf.mxu0 }
 0x8d3   : > { %v2225_v14 = vmul.f32 0.7978846, %v2213_v13  ;;  %v2214_v16 = vadd.f32 %v2202_v42, %v4717_v55  ;;  %v2203_v18 = vmul.f32 0.044715, %v2191_v43  ;;  %3794 = vtanh.f32 %v2224_v41 }
 0x8d4   : > { %v2192_v50 = vmul.f32 %v2180_v44, %v4730_v37  ;;  %v2181_v20 = vmul.f32 %v4737_v45, %v4737_v45  ;;  %v4744_v23 = vadd.f32 %v2161_v10, %v4699_v11  ;;  %v2163_v24 = vpop.f32.mrf.mxu0 }
 0x8d5   : > { %3796 = vtanh.f32 %v2225_v14  ;;  %v2226_v26 = vmul.f32 0.7978846, %v2214_v16  ;;  %v2215_v63 = vadd.f32 %v2203_v18, %v4723_v0  ;;  %v4748_v8 = vadd.f32 %v2163_v24, %v4703_v12 }
 0x8d6   : > { %v2204_v29 = vmul.f32 0.044715, %v2192_v50  ;;  %v2193_v30 = vmul.f32 %v2181_v20, %v4737_v45  ;;  %v2182_v32 = vmul.f32 %v4744_v23, %v4744_v23  ;;  %v2167_v9 = vpop.f32.mrf.mxu0 }
 0x8d7   : > { %3798 = vtanh.f32 %v2226_v26  ;;  %v2227_v36 = vmul.f32 0.7978846, %v2215_v63  ;;  %v2183_v39 = vmul.f32 %v4748_v8, %v4748_v8  ;;  %v4756_v41 = vadd.f32 %v2167_v9, %v4699_v11 }
 0x8d8   : > { %v2216_v13 = vadd.f32 %v2204_v29, %v4730_v37  ;;  %v2205_v42 = vmul.f32 0.044715, %v2193_v30  ;;  %v2194_v43 = vmul.f32 %v2182_v32, %v4744_v23  ;;  %v2169_v44 = vpop.f32.mrf.mxu0 }
 0x8d9   : > { %3800 = vtanh.f32 %v2227_v36  ;;  %v2195_v10 = vmul.f32 %v2183_v39, %v4748_v8  ;;  %v2184_v14 = vmul.f32 %v4756_v41, %v4756_v41  ;;  %v4764_v16 = vadd.f32 %v2169_v44, %v4703_v12 }
 0x8da   : > { %v2228_v18 = vmul.f32 0.7978846, %v2216_v13  ;;  %v2217_v50 = vadd.f32 %v2205_v42, %v4737_v45  ;;  %v2206_v20 = vmul.f32 0.044715, %v2194_v43  ;;  %v2171_v24 = vpop.f32.mrf.mxu0 }
 0x8db   : > { %v2207_v26 = vmul.f32 0.044715, %v2195_v10  ;;  %v2196_v63 = vmul.f32 %v2184_v14, %v4756_v41  ;;  %v2185_v29 = vmul.f32 %v4764_v16, %v4764_v16  ;;  %v4771_v30 = vadd.f32 %v2171_v24, %v4699_v11 }
 0x8dc   : > { %3802 = vtanh.f32 %v2228_v18  ;;  %v2229_v32 = vmul.f32 0.7978846, %v2217_v50  ;;  %v2218_v9 = vadd.f32 %v2206_v20, %v4744_v23  ;;  %v2173_v36 = vpop.f32.mrf.mxu0 }
 0x8dd   : > { %v2219_v39 = vadd.f32 %v2207_v26, %v4748_v8  ;;  %v2208_v13 = vmul.f32 0.044715, %v2196_v63  ;;  %v2197_v42 = vmul.f32 %v2185_v29, %v4764_v16  ;;  %v2186_v43 = vmul.f32 %v4771_v30, %v4771_v30 }
 0x8de   : > { %3804 = vtanh.f32 %v2229_v32  ;;  %v2230_v44 = vmul.f32 0.7978846, %v2218_v9  ;;  %v4779_v10 = vadd.f32 %v2173_v36, %v4703_v12 }
 0x8df   : > { %v2231_v11 = vmul.f32 0.7978846, %v2219_v39  ;;  %v2220_v14 = vadd.f32 %v2208_v13, %v4756_v41  ;;  %v2209_v18 = vmul.f32 0.044715, %v2197_v42  ;;  %v2198_v50 = vmul.f32 %v2186_v43, %v4771_v30 }
 0x8e0   : > { %3806 = vtanh.f32 %v2230_v44  ;;  %v2187_v20 = vmul.f32 %v4779_v10, %v4779_v10  ;;  %v3795_v24 = vpop.eup %3794 }
 0x8e1   : > { %3808 = vtanh.f32 %v2231_v11  ;;  %v2232_v26 = vmul.f32 0.7978846, %v2220_v14  ;;  %v2221_v63 = vadd.f32 %v2209_v18, %v4764_v16  ;;  %v2210_v32 = vmul.f32 0.044715, %v2198_v50 }
 0x8e2   : > { %v3797_v29 = vpop.eup %3796  ;;  %v2199_v12 = vmul.f32 %v2187_v20, %v4779_v10  ;;  %v2248_v13 = vadd.f32 1.0, %v3795_v24 }
 0x8e3   : > { %v2233_v9 = vmul.f32 0.7978846, %v2221_v63  ;;  %v2249_v36 = vadd.f32 1.0, %v3797_v29  ;;  %3810 = vtanh.f32 %v2232_v26  ;;  %v2222_v42 = vadd.f32 %v2210_v32, %v4771_v30 }
 0x8e4   : > { %v3799_v39 = vpop.eup %3798  ;;  %v2211_v43 = vmul.f32 0.044715, %v2199_v12  ;;  %v2260_v50 = vmul.f32 0.5, %v2248_v13 }
 0x8e5   : > { %v2250_v44 = vadd.f32 1.0, %v3799_v39  ;;  %3812 = vtanh.f32 %v2233_v9  ;;  %v2234_v25 = vmul.f32 0.7978846, %v2222_v42  ;;  %v2261_v7 = vmul.f32 0.5, %v2249_v36 }
 0x8e6   : > { %v3801_v4 = vpop.eup %3800  ;;  %v2223_v11 = vadd.f32 %v2211_v43, %v4779_v10  ;;  %v2272_v9 = vmul.f32 %v2260_v50, %v4706_v15 }
 0x8e7   : > { %v2262_v14 = vmul.f32 0.5, %v2250_v44  ;;  %v2251_v18 = vadd.f32 1.0, %v3801_v4  ;;  %3814 = vtanh.f32 %v2234_v25  ;;  %v2273_v32 = vmul.f32 %v2261_v7, %v4711_v19 }
 0x8e8   : > { %v2235_v20 = vmul.f32 0.7978846, %v2223_v11 }
 0x8e9   : > { %v3803_v63 = vpop.eup %3802  ;;  %v2263_v29 = vmul.f32 0.5, %v2251_v18  ;;  %v2274_v24 = vmul.f32 %v2262_v14, %v4717_v55 }
 0x8ea   : > { %3816 = vtanh.f32 %v2235_v20  ;;  %v2252_v42 = vadd.f32 1.0, %v3803_v63 }
 0x8eb   : > { %v3805_v26 = vpop.eup %3804  ;;  %v2275_v12 = vmul.f32 %v2263_v29, %v4723_v0  ;;  %v2284_v13 = vpack.c.bf16 %v2274_v24, %v2272_v9 }
 0x8ec   : > { %v2253_v39 = vadd.f32 1.0, %v3805_v26  ;;  %v2264_v55 = vmul.f32 0.5, %v2252_v42 }
 0x8ed   : > { %v3807_v43 = vpop.eup %3806  ;;  %v2285_v4 = vpack.c.bf16 %v2275_v12, %v2273_v32 }
 0x8ee   : > { %v3809_v36 = vpop.eup %3808  ;;  %v2254_v25 = vadd.f32 1.0, %v3807_v43  ;;  %v2265_v11 = vmul.f32 0.5, %v2253_v39  ;;  %v2276_v20 = vmul.f32 %v2264_v55, %v4730_v37 }
 0x8ef   : > { %2450 = vmatprep.mubr.bf16.mxu1 %v2285_v4  ;;  %v2255_v44 = vadd.f32 1.0, %v3809_v36 }
 0x8f0   : > { %2451 = vmatmul.mubr.bf16.vlgmr.msra.gmra.mxu1 %v2284_v13  ;;  %v2266_v14 = vmul.f32 0.5, %v2254_v25  ;;  %v3811_v18 = vpop.eup %3810  ;;  %v2277_v0 = vmul.f32 %v2265_v11, %v4737_v45 }
 0x8f1   : > { %2679 = vmatpush1.bf16.msra.mxu1 %v4602_v47  ;;  %v2267_v7 = vmul.f32 0.5, %v2255_v44  ;;  %v2256_v26 = vadd.f32 1.0, %v3811_v18 }
 0x8f2   : > { %v3813_v19 = vpop.eup %3812  ;;  %2680 = vmatprep.subr.bf16.mxu1 %v4607_v33  ;;  %v2278_v15 = vmul.f32 %v2266_v14, %v4744_v23 }
 0x8f3   : > { %v2279_v50 = vmul.f32 %v2267_v7, %v4748_v8  ;;  %v2257_v63 = vadd.f32 1.0, %v3813_v19  ;;  %v2268_v8 = vmul.f32 0.5, %v2256_v26 }
 0x8f4   : > { %v3815_v29 = vpop.eup %3814  ;;  %v2286_v47 = vpack.c.bf16 %v2278_v15, %v2276_v20 }
 0x8f5   : > { %2681 = vmatpush1.bf16.msra.mxu1 %v4613_v48  ;;  %v2287_v24 = vpack.c.bf16 %v2279_v50, %v2277_v0  ;;  %v2258_v32 = vadd.f32 1.0, %v3815_v29  ;;  %v2269_v23 = vmul.f32 0.5, %v2257_v63  ;;  %v2280_v39 = vmul.f32 %v2268_v8, %v4756_v41 }
 0x8f6   : > { %2682 = vmatprep.subr.bf16.mxu1 %v4620_v49 }
 0x8f7   : > { %v3817_v12 = vpop.eup %3816  ;;  %2458 = vmatprep.mubr.bf16.mxu1 %v2287_v24  ;;  %v2270_v45 = vmul.f32 0.5, %v2258_v32  ;;  %v2281_v9 = vmul.f32 %v2269_v23, %v4764_v16 }
 0x8f8   : > { %2459 = vmatmul.mubr.bf16.gmra.mxu1 %v2286_v47  ;;  %v2259_v33 = vadd.f32 1.0, %v3817_v12 }
 0x8f9   : > { %2683 = vmatpush1.bf16.msra.mxu1 %v4625_v51  ;;  %v2282_v48 = vmul.f32 %v2270_v45, %v4771_v30  ;;  %v2674_v51 = vpack.c.bf16 %v4192_v28, %v4189_v22  ;;  %v5195_v45 = vsub.s32 0, %v4690_v6 }
 0x8fa   : > { %2684 = vmatprep.subr.bf16.mxu1 %v4631_v53  ;;  %v2271_v37 = vmul.f32 0.5, %v2259_v33  ;;  %v2675_v53 = vpack.c.bf16 %v4198_v40, %v4195_v34 }
 0x8fb   : > { %v2288_v43 = vpack.c.bf16 %v2282_v48, %v2280_v39 }
 0x8fc   : > { %v2283_v49 = vmul.f32 %v2271_v37, %v4779_v10 }
 0x8fd   : > { %2685 = vmatpush1.bf16.msra.mxu1 %v4637_v54  ;;  %v2676_v54 = vpack.c.bf16 %v4204_v52, %v4201_v46 }
 0x8fe   : > { %v2289_v42 = vpack.c.bf16 %v2283_v49, %v2281_v9  ;;  %2686 = vmatprep.subr.bf16.mxu1 %v4644_v56  ;;  %v2677_v56 = vpack.c.bf16 %v4209_v61, %v4207_v57 }
 0x900   : > { %2466 = vmatprep.mubr.bf16.mxu1 %v2289_v42 }
 0x901   : > { %2467 = vmatmul.mubr.bf16.gmra.mxu1 %v2288_v43  ;;  %v5197_v43 = vlaneseq }
 0x902   : > { %2687 = vmatpush1.bf16.msra.mxu1 %v4649_v58  ;;  %2710 = vmatprep.mubr.bf16.mxu1 %v3896_v1 }
 0x903   : > { %2688 = vmatprep.subr.bf16.mxu1 %v4656_v59  ;;  %v3355_v59 = vld [vmem:[%s5144_s15] ss:$0 sm:$0xff] }
 0x906   : > { %2689 = vmatpush1.bf16.msra.mxu1 %v4661_v60 }
 0x907   : > { %2690 = vmatprep.subr.bf16.mxu1 %v4668_v17 }
 0x90a   : > { %2691 = vmatpush1.bf16.msra.mxu1 %v4673_v62 }
 0x90b   : > { %2692 = vmatprep.subr.bf16.mxu1 %v4680_v2 }
 0x90e   : > { %2693 = vmatpush1.bf16.msra.mxu1 %v4685_v3 }
 0x911   : > { %2711 = vmatmul.mubr.bf16.vlgmr.msra.gmra.mxu1 %v2674_v51 }
 0x912   : > { %2720 = vmatprep.mubr.bf16.mxu1 %v3896_v1 }
 0x919   : > { %2721 = vmatmul.mubr.bf16.gmra.mxu1 %v2675_v53 }
 0x91a   : > { %2730 = vmatprep.mubr.bf16.mxu1 %v3896_v1 }
 0x921   : > { %2731 = vmatmul.mubr.bf16.gmra.mxu1 %v2676_v54 }
 0x922   : > { %2740 = vmatprep.mubr.bf16.mxu1 %v3896_v1 }
 0x929   : > { %2741 = vmatmul.mubr.bf16.gmra.mxu1 %v2677_v56  ;;  %v3818_v56 = vld [vmem:[%s4112_s25] sm:$0xff] }
 0x9b0   : > { %v3439_v22 = vpop.f32.mrf.mxu1 }
 0x9b2   : > { %v3440_v28 = vpop.f32.mrf.mxu1 }
 0x9b3   : > { %v3441_v58 = vadd.f32 %v3440_v28, %v3439_v22 }
 0x9b4   : > { %v3442_v60 = vpop.f32.mrf.mxu1 }
 0x9b5   : > { %v2475_v17 = vadd.f32 %v3441_v58, %v4432_v21  ;;  %v3819_v58 = vld [vmem:[%s4112_s25 + $0x8] sm:$0xff] }
 0x9b6   : > { %v3443_v62 = vpop.f32.mrf.mxu1 }
 0x9b7   : > { %v2488_v2 = vadd.f32 %v3355_v59, %v2475_v17  ;;  %v3444_v3 = vadd.f32 %v3443_v62, %v3442_v60 }
 0x9b8   : > { %v3445_v41 = vpop.f32.mrf.mxu1 }
 0x9b9   : > { %2494 = vst [vmem:[%s4835_s29] sm:$0xff] %v2488_v2  ;;  %v2476_v16 = vadd.f32 %v3444_v3, %v4436_v5  ;;  %v2781_v19 = vsub.f32 %v2488_v2, %v4195_v34 }
 0x9ba   : > { %v3446_v30 = vpop.f32.mrf.mxu1 }
 0x9bb   : > { %v2489_v10 = vadd.f32 %v3355_v59, %v2476_v16  ;;  %v3447_v4 = vadd.f32 %v3446_v30, %v3445_v41  ;;  %v2787_v24 = vmul.f32 %v2781_v19, %v2781_v19  ;;  %v3820_v30 = vld [vmem:[%s4112_s25 + $0x10] sm:$0xff] }
 0x9bc   : > { %v3448_v36 = vpop.f32.mrf.mxu1 }
 0x9bd   : > { %2495 = vst [vmem:[%s4835_s29 + $0x8] sm:$0xff] %v2489_v10  ;;  %v2500_v13 = vpack.c.bf16 %v2489_v10, %v2488_v2  ;;  %v2477_v21 = vadd.f32 %v3447_v4, %v4440_v27  ;;  %v2782_v5 = vsub.f32 %v2489_v10, %v4198_v40 }
 0x9be   : > { %v3449_v25 = vpop.f32.mrf.mxu1 }
 0x9bf   : > { %v2490_v44 = vadd.f32 %v3355_v59, %v2477_v21  ;;  %v3450_v11 = vadd.f32 %v3449_v25, %v3448_v36  ;;  %2644 = vmatmul.mubr.bf16.vlgmr.msra.gmra.mxu0 %v2500_v13  ;;  %v2788_v20 = vmul.f32 %v2782_v5, %v2782_v5 }
 0x9c0   : > { %2653 = vmatprep.mubr.bf16.mxu0 %v3896_v1 }
 0x9c1   : > { %2496 = vst [vmem:[%s4835_s29 + $0x10] sm:$0xff] %v2490_v44  ;;  %v2478_v55 = vadd.f32 %v3450_v11, %v4444_v31  ;;  %v3451_v14 = vpop.f32.mrf.mxu1  ;;  %v2783_v15 = vsub.f32 %v2490_v44, %v4201_v46  ;;  %v2793_v34 = vadd.f32 %v2788_v20, %v2787_v24 }
 0x9c3   : > { %v2491_v18 = vadd.f32 %v3355_v59, %v2478_v55  ;;  %v3452_v7 = vpop.f32.mrf.mxu1  ;;  %v2789_v40 = vmul.f32 %v2783_v15, %v2783_v15 }
 0x9c4   : > { %v3453_v0 = vadd.f32 %v3452_v7, %v3451_v14  ;;  %v3821_v7 = vld [vmem:[%s4112_s25 + $0x18] sm:$0xff] }
 0x9c5   : > { %2497 = vst [vmem:[%s4835_s29 + $0x18] sm:$0xff] %v2491_v18  ;;  %v3454_v27 = vpop.f32.mrf.mxu1  ;;  %v2501_v50 = vpack.c.bf16 %v2491_v18, %v2490_v44  ;;  %v2784_v63 = vsub.f32 %v2491_v18, %v4204_v52  ;;  %v2519_v52 = vld [vmem:[%s5148_s19] sm:$0x3] }
 0x9c6   : > { %v2479_v29 = vadd.f32 %v3453_v0, %v4448_v35  ;;  %v2794_v35 = vadd.f32 %v2793_v34, %v2789_v40  ;;  %v4859_v8 = vrot.slane %v2519_v52, %v5195_v45 }
 0x9c7   : > { %v3455_v31 = vpop.f32.mrf.mxu1  ;;  %2654 = vmatmul.mubr.bf16.gmra.mxu0 %v2501_v50  ;;  %v2790_v46 = vmul.f32 %v2784_v63, %v2784_v63 }
 0x9c8   : > { %v2492_v26 = vadd.f32 %v3355_v59, %v2479_v29  ;;  %v3456_v47 = vadd.f32 %v3455_v31, %v3454_v27  ;;  %2663 = vmatprep.mubr.bf16.mxu0 %v3896_v1  ;;  %v4898_v27 = vld [vmem:[%s4112_s25 + $0x20] sm:$0xff] }
 0x9c9   : > { %v2795_v1 = vadd.f32 %v2794_v35, %v2790_v46  ;;  %v4906_v46 = vld [vmem:[%s4112_s25 + $0x28] sm:$0xff] }
 0x9ca   : > { %2498 = vst [vmem:[%s4835_s29 + $0x20] sm:$0xff] %v2492_v26  ;;  %v2785_v32 = vsub.f32 %v2492_v26, %v4207_v57  ;;  %v2480_v12 = vadd.f32 %v3456_v47, %v4452_v38  ;;  %v5196_v57 = vsub.s32 1, %v4690_v6  ;;  %v4876_v6 = vand.u32 127, %v5197_v43 }
 0x9cc   : > { %v2791_v33 = vmul.f32 %v2785_v32, %v2785_v32  ;;  %v2493_v23 = vadd.f32 %v3355_v59, %v2480_v12  ;;  %v4865_v38 = vrot.slane %v2519_v52, %v5196_v57  ;;  %vm2817_vm7 = vcmp.ge.s32.totalorder %v4876_v6, 112 }
 0x9cd   : > { %vm2818_vm8 = vcmp.lt.s32.totalorder %v4876_v6, 120  ;;  %vm2804_vm10 = vcmp.lt.s32.totalorder %v4876_v6, 112 }
 0x9ce   : > { %2499 = vst [vmem:[%s4835_s29 + $0x28] sm:$0xff] %v2493_v23  ;;  %v2786_v37 = vsub.f32 %v2493_v23, %v4209_v61  ;;  %v2502_v48 = vpack.c.bf16 %v2493_v23, %v2492_v26  ;;  %v2796_v49 = vadd.f32 %v2795_v1, %v2791_v33  ;;  %vm4917_vm11 = vmand %vm2817_vm7, %vm2818_vm8  ;;  %s3838_s29 = sshll.u32 %s3900_s5, 4  ;;  %s3839_s29 = int_to_ptr.vmem [resolvable:$false] %s3838_s29 }
 0x9cf   : > { %p3841_p0 = scmp.lt.s32.totalorder %s5070_s26, %s3839_s29 }
 0x9d0   : > { %v2792_v9 = vmul.f32 %v2786_v37, %v2786_v37  ;;  %2664 = vmatmul.mubr.bf16.gmra.mxu0 %v2502_v48 }
 0x9d1   : > { %v2712_v39 = vpop.f32.mrf.mxu1 }
 0x9d2   : > { %v2713_v61 = vadd.f32 %v2712_v39, %v4859_v8  ;;  %v2797_v42 = vadd.f32 %v2796_v49, %v2792_v9  ;;  %v4923_v9 = vld [vmem:[%s4112_s25 + $0x30] sm:$0xff] }
 0x9d3   : > { %v2714_v51 = vpop.f32.mrf.mxu1 }
 0x9d4   : > { %2763 = vst [vmem:[%s4872_s23] sm:$0xff] %v2713_v61  ;;  %v2715_v53 = vadd.f32 %v2714_v51, %v4865_v38  ;;  %v2798_v54 = vrot.slane %v2797_v42, 4  ;;  %v2843_v22 = vsub.f32 %v2713_v61, %v3818_v56  ;;  %v2935_v62 = vmul.f32 %v2713_v61, %v2713_v61 }
 0x9d5   : > { %v2716_v28 = vpop.f32.mrf.mxu1 }
 0x9d6   : > { %2764 = vst.msk [vmem:[%s4872_s23 + $0x8] sm:$0xff] %vm1001_vm3, %v2715_v53  ;;  %v2844_v59 = vsub.f32 %v2715_v53, %v3819_v58  ;;  %v2936_v60 = vmul.f32 %v2715_v53, %v2715_v53  ;;  %v2717_v17 = vadd.f32 %v2716_v28, %v4859_v8  ;;  %v2799_v3 = vadd.f32 %v2798_v54, %v2797_v42  ;;  %v4932_v28 = vld [vmem:[%s4112_s25 + $0x38] sm:$0xff] }
 0x9d7   : > { %v2718_v2 = vpop.f32.mrf.mxu1  ;;  %v2983_v36 = vmul.f32 %v2843_v22, %v2843_v22 }
 0x9d8   : > { %v2951_v41 = vsel %vm1001_vm3, %v2936_v60, 0.0  ;;  %v2984_v16 = vmul.f32 %v2844_v59, %v2844_v59  ;;  %2765 = vst [vmem:[%s4872_s23 + $0x10] sm:$0xff] %v2717_v17  ;;  %v2845_v10 = vsub.f32 %v2717_v17, %v3820_v30  ;;  %v2937_v4 = vmul.f32 %v2717_v17, %v2717_v17 }
 0x9d9   : > { %v2952_v13 = vadd.f32 %v2951_v41, %v2935_v62  ;;  %v2719_v21 = vadd.f32 %v2718_v2, %v4865_v38  ;;  %v2722_v25 = vpop.f32.mrf.mxu1  ;;  %v2800_v44 = vrot.slane %v2799_v3, 2 }
 0x9da   : > { %v2999_v11 = vsel %vm1001_vm3, %v2984_v16, 0.0  ;;  %v2985_v55 = vmul.f32 %v2845_v10, %v2845_v10  ;;  %v2723_v14 = vadd.f32 %v2722_v25, %v4859_v8 }
 0x9db   : > { %v3000_v5 = vadd.f32 %v2999_v11, %v2983_v36  ;;  %v2953_v18 = vadd.f32 %v2952_v13, %v2937_v4  ;;  %2766 = vst.msk [vmem:[%s4872_s23 + $0x18] sm:$0xff] %vm1001_vm3, %v2719_v21  ;;  %v2846_v19 = vsub.f32 %v2719_v21, %v3821_v7  ;;  %v2938_v15 = vmul.f32 %v2719_v21, %v2719_v21  ;;  %v2724_v0 = vpop.f32.mrf.mxu1 }
 0x9dc   : > { %2767 = vst [vmem:[%s4872_s23 + $0x20] sm:$0xff] %v2723_v14  ;;  %v2847_v50 = vsub.f32 %v2723_v14, %v4898_v27  ;;  %v2939_v20 = vmul.f32 %v2723_v14, %v2723_v14  ;;  %v2725_v63 = vadd.f32 %v2724_v0, %v4865_v38  ;;  %v2801_v29 = vadd.f32 %v2800_v44, %v2799_v3  ;;  %v4939_v3 = vld [vmem:[%s4112_s25 + $0x40] sm:$0xff]  ;;  %v4954_v0 = vld [vmem:[%s4112_s25 + $0x48] sm:$0xff] }
 0x9dd   : > { %v3001_v31 = vadd.f32 %v3000_v5, %v2985_v55  ;;  %v2954_v24 = vsel %vm1001_vm3, %v2938_v15, 0.0  ;;  %v2986_v40 = vmul.f32 %v2846_v19, %v2846_v19  ;;  %v2726_v26 = vpop.f32.mrf.mxu1 }
 0x9de   : > { %v2955_v47 = vadd.f32 %v2954_v24, %v2953_v18  ;;  %v2987_v34 = vmul.f32 %v2847_v50, %v2847_v50  ;;  %2768 = vst.msk [vmem:[%s4872_s23 + $0x28] sm:$0xff] %vm1001_vm3, %v2725_v63  ;;  %v2848_v32 = vsub.f32 %v2725_v63, %v4906_v46  ;;  %v2940_v12 = vmul.f32 %v2725_v63, %v2725_v63  ;;  %v4959_v63 = vld [vmem:[%s4112_s25 + $0x50] sm:$0xff] }
 0x9df   : > { %v3002_v52 = vsel %vm1001_vm3, %v2986_v40, 0.0  ;;  %v2727_v35 = vadd.f32 %v2726_v26, %v4859_v8  ;;  %v2728_v33 = vpop.f32.mrf.mxu1  ;;  %v2802_v23 = vrot.slane %v2801_v29, 1  ;;  %v4965_v26 = vld [vmem:[%s4112_s25 + $0x58] sm:$0xff] }
 0x9e0   : > { %v3003_v45 = vadd.f32 %v3002_v52, %v3001_v31  ;;  %v2956_v1 = vadd.f32 %v2955_v47, %v2939_v20  ;;  %v2957_v37 = vsel %vm1001_vm3, %v2940_v12, 0.0  ;;  %v2988_v48 = vmul.f32 %v2848_v32, %v2848_v32 }
 0x9e1   : > { %2769 = vst [vmem:[%s4872_s23 + $0x30] sm:$0xff] %v2727_v35  ;;  %v2849_v49 = vsub.f32 %v2727_v35, %v4923_v9  ;;  %v2941_v39 = vmul.f32 %v2727_v35, %v2727_v35  ;;  %v2729_v61 = vadd.f32 %v2728_v33, %v4865_v38  ;;  %v2732_v42 = vpop.f32.mrf.mxu1  ;;  %v2803_v43 = vadd.f32 %v2802_v23, %v2801_v29 }
 0x9e2   : > { %v3004_v51 = vadd.f32 %v3003_v45, %v2987_v34  ;;  %v2958_v53 = vadd.f32 %v2957_v37, %v2956_v1  ;;  %v3005_v54 = vsel %vm1001_vm3, %v2988_v48, 0.0  ;;  %v2733_v56 = vadd.f32 %v2732_v42, %v4859_v8  ;;  %v4972_v1 = vld [vmem:[%s4112_s25 + $0x60] sm:$0xff] }
 0x9e3   : > { %v2989_v22 = vmul.f32 %v2849_v49, %v2849_v49  ;;  %2770 = vst.msk [vmem:[%s4872_s23 + $0x38] sm:$0xff] %vm1001_vm3, %v2729_v61  ;;  %v2850_v58 = vsub.f32 %v2729_v61, %v4932_v28  ;;  %v2942_v59 = vmul.f32 %v2729_v61, %v2729_v61  ;;  %v2820_v60 = vsel %vm4917_vm11, %v2803_v43, 0.0  ;;  %v2734_v17 = vpop.f32.mrf.mxu1 }
 0x9e4   : > { %v3006_v62 = vadd.f32 %v3005_v54, %v3004_v51  ;;  %v2959_v2 = vadd.f32 %v2958_v53, %v2941_v39  ;;  %2771 = vst [vmem:[%s4872_s23 + $0x40] sm:$0xff] %v2733_v56  ;;  %v2851_v41 = vsub.f32 %v2733_v56, %v4939_v3  ;;  %v2943_v16 = vmul.f32 %v2733_v56, %v2733_v56  ;;  %v4982_v53 = vld [vmem:[%s4112_s25 + $0x68] sm:$0xff] }
 0x9e5   : > { %v2960_v30 = vsel %vm1001_vm3, %v2942_v59, 0.0  ;;  %v2990_v10 = vmul.f32 %v2850_v58, %v2850_v58  ;;  %v2821_v4 = vsel %vm2806_vm9, %v2820_v60, 0.0  ;;  %v2805_v36 = vsel %vm2804_vm10, %v2803_v43, 0.0  ;;  %v2736_v13 = vpop.f32.mrf.mxu1 }
 0x9e6   : > { %v3007_v21 = vadd.f32 %v3006_v62, %v2989_v22  ;;  %v2961_v25 = vadd.f32 %v2960_v30, %v2959_v2  ;;  %v2991_v44 = vmul.f32 %v2851_v41, %v2851_v41  ;;  %2822 = vadd.xlane.f32.xlu1 %v2821_v4  ;;  %v2807_v11 = vsel %vm2806_vm9, %v2805_v36, 0.0  ;;  %v4989_v41 = vld [vmem:[%s4112_s25 + $0x70] sm:$0xff] }
 0x9e7   : > { %v3008_v55 = vsel %vm1001_vm3, %v2990_v10, 0.0  ;;  %2808 = vadd.xlane.f32.xlu0 %v2807_v11  ;;  %v2735_v14 = vadd.f32 %v2734_v17, %v4865_v38  ;;  %v2737_v5 = vadd.f32 %v2736_v13, %v4859_v8  ;;  %v2738_v18 = vpop.f32.mrf.mxu1 }
 0x9e8   : > { %v3009_v7 = vadd.f32 %v3008_v55, %v3007_v21  ;;  %v2962_v19 = vadd.f32 %v2961_v25, %v2943_v16  ;;  %v2739_v15 = vadd.f32 %v2738_v18, %v4865_v38  ;;  %v4996_v21 = vld [vmem:[%s4112_s25 + $0x78] sm:$0xff]  ;;  %s5079_s25 = scalar_lea.sflag [#allocation3], %s732_s24 }
 0x9e9   : > { %2772 = vst.msk [vmem:[%s4872_s23 + $0x48] sm:$0xff] %vm1001_vm3, %v2735_v14  ;;  %v2852_v50 = vsub.f32 %v2735_v14, %v4954_v0  ;;  %v2944_v20 = vmul.f32 %v2735_v14, %v2735_v14  ;;  %2773 = vst [vmem:[%s4872_s23 + $0x50] sm:$0xff] %v2737_v5  ;;  %v2853_v29 = vsub.f32 %v2737_v5, %v4959_v63  ;;  %v2742_v24 = vpop.f32.mrf.mxu1 }
 0x9ea   : > { %v2945_v31 = vmul.f32 %v2737_v5, %v2737_v5  ;;  %v3010_v40 = vadd.f32 %v3009_v7, %v2991_v44  ;;  %2774 = vst.msk [vmem:[%s4872_s23 + $0x58] sm:$0xff] %vm1001_vm3, %v2739_v15  ;;  %v2854_v47 = vsub.f32 %v2739_v15, %v4965_v26  ;;  %v2946_v34 = vmul.f32 %v2739_v15, %v2739_v15 }
 0x9eb   : > { %v2743_v32 = vadd.f32 %v2742_v24, %v4859_v8  ;;  %v2963_v12 = vsel %vm1001_vm3, %v2944_v20, 0.0  ;;  %v2992_v52 = vmul.f32 %v2852_v50, %v2852_v50  ;;  %v2744_v35 = vpop.f32.mrf.mxu1  ;;  %v2993_v23 = vmul.f32 %v2853_v29, %v2853_v29 }
 0x9ec   : > { %v2964_v33 = vadd.f32 %v2963_v12, %v2962_v19  ;;  %v2994_v45 = vmul.f32 %v2854_v47, %v2854_v47  ;;  %v2966_v57 = vsel %vm1001_vm3, %v2946_v34, 0.0  ;;  %v2745_v49 = vadd.f32 %v2744_v35, %v4865_v38 }
 0x9ed   : > { %2775 = vst [vmem:[%s4872_s23 + $0x60] sm:$0xff] %v2743_v32  ;;  %v2855_v37 = vsub.f32 %v2743_v32, %v4972_v1  ;;  %v3011_v48 = vsel %vm1001_vm3, %v2992_v52, 0.0  ;;  %v2746_v39 = vpop.f32.mrf.mxu1  ;;  %v2947_v43 = vmul.f32 %v2743_v32, %v2743_v32 }
 0x9ee   : > { %v3012_v61 = vadd.f32 %v3011_v48, %v3010_v40  ;;  %v2965_v42 = vadd.f32 %v2964_v33, %v2945_v31  ;;  %v3014_v51 = vsel %vm1001_vm3, %v2994_v45, 0.0  ;;  %2776 = vst.msk [vmem:[%s4872_s23 + $0x68] sm:$0xff] %vm1001_vm3, %v2745_v49  ;;  %v2856_v54 = vsub.f32 %v2745_v49, %v4982_v53 }
 0x9ef   : > { %v2948_v56 = vmul.f32 %v2745_v49, %v2745_v49  ;;  %v2747_v22 = vadd.f32 %v2746_v39, %v4859_v8  ;;  %v2748_v58 = vpop.f32.mrf.mxu1  ;;  %v2995_v17 = vmul.f32 %v2855_v37, %v2855_v37 }
 0x9f0   : > { %v3013_v59 = vadd.f32 %v3012_v61, %v2993_v23  ;;  %v2967_v60 = vadd.f32 %v2966_v57, %v2965_v42  ;;  %v2749_v62 = vadd.f32 %v2748_v58, %v4865_v38  ;;  %v2996_v2 = vmul.f32 %v2856_v54, %v2856_v54 }
 0x9f1   : > { %2777 = vst [vmem:[%s4872_s23 + $0x70] sm:$0xff] %v2747_v22  ;;  %v2857_v16 = vsub.f32 %v2747_v22, %v4989_v41  ;;  %v2949_v30 = vmul.f32 %v2747_v22, %v2747_v22  ;;  %v2969_v10 = vsel %vm1001_vm3, %v2948_v56, 0.0 }
 0x9f2   : > { %v3015_v4 = vadd.f32 %v3014_v51, %v3013_v59  ;;  %v2968_v36 = vadd.f32 %v2967_v60, %v2947_v43  ;;  %2778 = vst.msk [vmem:[%s4872_s23 + $0x78] sm:$0xff] %vm1001_vm3, %v2749_v62  ;;  %v2950_v13 = vmul.f32 %v2749_v62, %v2749_v62  ;;  %v2858_v25 = vsub.f32 %v2749_v62, %v4996_v21  ;;  %s5201_s23 = sld [smem:[#allocation20_spill]] }
 0x9f3   : > { %v3017_v44 = vsel %vm1001_vm3, %v2996_v2, 0.0  ;;  %v2997_v55 = vmul.f32 %v2857_v16, %v2857_v16 }
 0x9f4   : > { %v2970_v11 = vadd.f32 %v2969_v10, %v2968_v36  ;;  %v2998_v14 = vmul.f32 %v2858_v25, %v2858_v25  ;;  %v3016_v5 = vadd.f32 %v3015_v4, %v2995_v17  ;;  %v2972_v18 = vsel %vm1001_vm3, %v2950_v13, 0.0 }
 0x9f6   : > { %v2971_v7 = vadd.f32 %v2970_v11, %v2949_v30  ;;  %v3018_v19 = vadd.f32 %v3017_v44, %v3016_v5  ;;  %v3020_v15 = vsel %vm1001_vm3, %v2998_v14, 0.0 }
 0x9f8   : > { %v5002_v50 = vadd.f32 %v2972_v18, %v2971_v7  ;;  %v3019_v20 = vadd.f32 %v3018_v19, %v2997_v55  ;;  %s5075_s27 = scalar_lea.hbm %s5201_s23, %s3584_s3 }
 0x9fa   : > { %v5004_v29 = vadd.f32 %v3020_v15, %v3019_v20 }
 0xa6f   : > { %v2823_v31 = vpop.xlane.xlu1 %2822 }
 0xa70   : > { %v2824_v24 = vrot.slane %v2823_v31, 4  ;;  %v2809_v40 = vpop.xlane.xlu0 %2808 }
 0xa71   : > { %v2810_v47 = vrot.slane %v2809_v40, 4 }
 0xa72   : > { %v2825_v34 = vadd.f32 %v2824_v24, %v2823_v31 }
 0xa73   : > { %v2811_v32 = vadd.f32 %v2810_v47, %v2809_v40 }
 0xa74   : > { %v2826_v12 = vrot.slane %v2825_v34, 2 }
 0xa75   : > { %v2812_v52 = vrot.slane %v2811_v32, 2 }
 0xa76   : > { %v2827_v35 = vadd.f32 %v2826_v12, %v2825_v34 }
 0xa77   : > { %v2813_v33 = vadd.f32 %v2812_v52, %v2811_v32 }
 0xa78   : > { %v2828_v23 = vrot.slane %v2827_v35, 1 }
 0xa79   : > { %v2814_v45 = vrot.slane %v2813_v33, 1 }
 0xa7a   : > { %v2829_v37 = vadd.f32 %v2828_v23, %v2827_v35 }
 0xa7b   : > { %v2815_v48 = vadd.f32 %v2814_v45, %v2813_v33 }
 0xa7d   : > { %3572 = vpush %v2815_v48 }
 0xa7e   : > { %3574 = vpush %v2829_v37 }
 0xa7f   : > { %v2645_v57 = vpop.f32.mrf.mxu0 }
 0xa80   : > { %v2646_v49 = vadd.f32 %v2645_v57, %v4859_v8 }
 0xa81   : > { %v2647_v39 = vpop.f32.mrf.mxu0 }
 0xa82   : > { %2751 = vst [vmem:[%s5010_s6] sm:$0xff] %v2646_v49  ;;  %v2648_v61 = vadd.f32 %v2647_v39, %v4865_v38  ;;  %v2831_v42 = vsub.f32 %v2646_v49, %v4898_v27  ;;  %v2859_v22 = vmul.f32 %v2646_v49, %v2646_v49 }
 0xa83   : > { %v2649_v43 = vpop.f32.mrf.mxu0 }
 0xa84   : > { %2752 = vst.msk [vmem:[%s5010_s6 + $0x8] sm:$0xff] %vm1001_vm3, %v2648_v61  ;;  %v2832_v51 = vsub.f32 %v2648_v61, %v4906_v46  ;;  %v2860_v54 = vmul.f32 %v2648_v61, %v2648_v61  ;;  %v2650_v56 = vadd.f32 %v2649_v43, %v4859_v8  ;;  %v2897_v27 = vmul.f32 %v2831_v42, %v2831_v42 }
 0xa85   : > { %v2651_v58 = vpop.f32.mrf.mxu0 }
 0xa86   : > { %v2871_v59 = vsel %vm1001_vm3, %v2860_v54, 0.0  ;;  %v2898_v60 = vmul.f32 %v2832_v51, %v2832_v51  ;;  %2753 = vst [vmem:[%s5010_s6 + $0x10] sm:$0xff] %v2650_v56  ;;  %v2833_v17 = vsub.f32 %v2650_v56, %v4923_v9  ;;  %v2861_v62 = vmul.f32 %v2650_v56, %v2650_v56 }
 0xa87   : > { %v2872_v2 = vadd.f32 %v2871_v59, %v2859_v22  ;;  %v2652_v16 = vadd.f32 %v2651_v58, %v4865_v38  ;;  %v2655_v30 = vpop.f32.mrf.mxu0 }
 0xa88   : > { %v2909_v46 = vsel %vm1001_vm3, %v2898_v60, 0.0  ;;  %v2899_v10 = vmul.f32 %v2833_v17, %v2833_v17  ;;  %v2656_v4 = vadd.f32 %v2655_v30, %v4859_v8 }
 0xa89   : > { %v2910_v36 = vadd.f32 %v2909_v46, %v2897_v27  ;;  %v2873_v13 = vadd.f32 %v2872_v2, %v2861_v62  ;;  %2754 = vst.msk [vmem:[%s5010_s6 + $0x18] sm:$0xff] %vm1001_vm3, %v2652_v16  ;;  %v2834_v25 = vsub.f32 %v2652_v16, %v4932_v28  ;;  %v2862_v44 = vmul.f32 %v2652_v16, %v2652_v16  ;;  %v2657_v9 = vpop.f32.mrf.mxu0 }
 0xa8a   : > { %2755 = vst [vmem:[%s5010_s6 + $0x20] sm:$0xff] %v2656_v4  ;;  %v2835_v11 = vsub.f32 %v2656_v4, %v4939_v3  ;;  %v2863_v55 = vmul.f32 %v2656_v4, %v2656_v4  ;;  %v2658_v14 = vadd.f32 %v2657_v9, %v4865_v38 }
 0xa8b   : > { %v2911_v5 = vadd.f32 %v2910_v36, %v2899_v10  ;;  %v2874_v18 = vsel %vm1001_vm3, %v2862_v44, 0.0  ;;  %v2900_v7 = vmul.f32 %v2834_v25, %v2834_v25  ;;  %v2659_v19 = vpop.f32.mrf.mxu0 }
 0xa8c   : > { %v2875_v15 = vadd.f32 %v2874_v18, %v2873_v13  ;;  %v2901_v20 = vmul.f32 %v2835_v11, %v2835_v11  ;;  %2756 = vst.msk [vmem:[%s5010_s6 + $0x28] sm:$0xff] %vm1001_vm3, %v2658_v14  ;;  %v2836_v28 = vsub.f32 %v2658_v14, %v4954_v0  ;;  %v2864_v31 = vmul.f32 %v2658_v14, %v2658_v14 }
 0xa8d   : > { %v2912_v24 = vsel %vm1001_vm3, %v2900_v7, 0.0  ;;  %v2660_v3 = vadd.f32 %v2659_v19, %v4859_v8  ;;  %v2661_v40 = vpop.f32.mrf.mxu0 }
 0xa8e   : > { %v2913_v47 = vadd.f32 %v2912_v24, %v2911_v5  ;;  %v2876_v34 = vadd.f32 %v2875_v15, %v2863_v55  ;;  %v2877_v32 = vsel %vm1001_vm3, %v2864_v31, 0.0  ;;  %v2902_v12 = vmul.f32 %v2836_v28, %v2836_v28 }
 0xa8f   : > { %2757 = vst [vmem:[%s5010_s6 + $0x30] sm:$0xff] %v2660_v3  ;;  %v2837_v52 = vsub.f32 %v2660_v3, %v4959_v63  ;;  %v2865_v35 = vmul.f32 %v2660_v3, %v2660_v3  ;;  %v2662_v33 = vadd.f32 %v2661_v40, %v4865_v38 }
 0xa90   : > { %v2914_v0 = vadd.f32 %v2913_v47, %v2901_v20  ;;  %v2878_v23 = vadd.f32 %v2877_v32, %v2876_v34  ;;  %v2915_v45 = vsel %vm1001_vm3, %v2902_v12, 0.0  ;;  %v2665_v37 = vpop.f32.mrf.mxu0 }
 0xa91   : > { %v2903_v48 = vmul.f32 %v2837_v52, %v2837_v52  ;;  %2758 = vst.msk [vmem:[%s5010_s6 + $0x38] sm:$0xff] %vm1001_vm3, %v2662_v33  ;;  %v2838_v57 = vsub.f32 %v2662_v33, %v4965_v26  ;;  %v2866_v49 = vmul.f32 %v2662_v33, %v2662_v33  ;;  %v2666_v39 = vadd.f32 %v2665_v37, %v4859_v8 }
 0xa92   : > { %v2916_v61 = vadd.f32 %v2915_v45, %v2914_v0  ;;  %v2879_v42 = vadd.f32 %v2878_v23, %v2865_v35  ;;  %v2667_v63 = vpop.f32.mrf.mxu0 }
 0xa93   : > { %v2880_v43 = vsel %vm1001_vm3, %v2866_v49, 0.0  ;;  %v2904_v51 = vmul.f32 %v2838_v57, %v2838_v57  ;;  %2759 = vst [vmem:[%s5010_s6 + $0x40] sm:$0xff] %v2666_v39  ;;  %v2839_v54 = vsub.f32 %v2666_v39, %v4972_v1  ;;  %v2867_v56 = vmul.f32 %v2666_v39, %v2666_v39 }
 0xa94   : > { %v2917_v22 = vadd.f32 %v2916_v61, %v2903_v48  ;;  %v2881_v58 = vadd.f32 %v2880_v43, %v2879_v42  ;;  %v2668_v59 = vadd.f32 %v2667_v63, %v4865_v38  ;;  %v2669_v26 = vpop.f32.mrf.mxu0 }
 0xa95   : > { %v2918_v60 = vsel %vm1001_vm3, %v2904_v51, 0.0  ;;  %v2905_v17 = vmul.f32 %v2839_v54, %v2839_v54  ;;  %v2670_v62 = vadd.f32 %v2669_v26, %v4859_v8 }
 0xa96   : > { %v2919_v27 = vadd.f32 %v2918_v60, %v2917_v22  ;;  %v2882_v2 = vadd.f32 %v2881_v58, %v2867_v56  ;;  %2760 = vst.msk [vmem:[%s5010_s6 + $0x48] sm:$0xff] %vm1001_vm3, %v2668_v59  ;;  %v2840_v16 = vsub.f32 %v2668_v59, %v4982_v53  ;;  %v2868_v30 = vmul.f32 %v2668_v59, %v2668_v59  ;;  %v2671_v1 = vpop.f32.mrf.mxu0 }
 0xa97   : > { %2761 = vst [vmem:[%s5010_s6 + $0x50] sm:$0xff] %v2670_v62  ;;  %v2841_v46 = vsub.f32 %v2670_v62, %v4989_v41  ;;  %v2869_v10 = vmul.f32 %v2670_v62, %v2670_v62  ;;  %v2672_v4 = vadd.f32 %v2671_v1, %v4865_v38 }
 0xa98   : > { %v2906_v36 = vmul.f32 %v2840_v16, %v2840_v16  ;;  %v2883_v13 = vsel %vm1001_vm3, %v2868_v30, 0.0  ;;  %v2920_v25 = vadd.f32 %v2919_v27, %v2905_v17 }
 0xa99   : > { %2762 = vst.msk [vmem:[%s5010_s6 + $0x58] sm:$0xff] %vm1001_vm3, %v2672_v4  ;;  %v2870_v8 = vmul.f32 %v2672_v4, %v2672_v4  ;;  %v2884_v44 = vadd.f32 %v2883_v13, %v2882_v2  ;;  %v2842_v9 = vsub.f32 %v2672_v4, %v4996_v21  ;;  %v2907_v53 = vmul.f32 %v2841_v46, %v2841_v46  ;;  %s3840_s6 = scalar_lea.vmem %s3839_s29, 1536 }
 0xa9a   : > { %v2921_v11 = vsel %vm1001_vm3, %v2906_v36, 0.0  ;;  %p3842_p1 = scmp.lt.s32.totalorder %s3840_s6, %s3834_s28 }
 0xa9b   : > { %v2885_v55 = vadd.f32 %v2884_v44, %v2869_v10  ;;  %v2886_v41 = vsel %vm1001_vm3, %v2870_v8, 0.0  ;;  %v2908_v38 = vmul.f32 %v2842_v9, %v2842_v9  ;;  %v2922_v14 = vadd.f32 %v2921_v11, %v2920_v25 }
 0xa9c   : > { %p3843_p2 = por %p3842_p1, %p3841_p0 }
 0xa9d   : > { %v2887_v5 = vadd.f32 %v2886_v41, %v2885_v55  ;;  %v2923_v18 = vadd.f32 %v2922_v14, %v2907_v53  ;;  %v2924_v7 = vsel %vm1001_vm3, %v2908_v38, 0.0 }
 0xa9e   : > { %p3844_p3 = pnand %p3843_p2, %p3837_p13 }
 0xa9f   : > { %2888 = vadd.xlane.f32.xlu0 %v2887_v5  ;;  %v2925_v19 = vadd.f32 %v2924_v7, %v2923_v18 }
 0xaa1   : > { %2926 = vadd.xlane.f32.xlu1 %v2925_v19 }
 0xaa3   : > { %2974 = vadd.xlane.f32.xlu0 %v5002_v50 }
 0xaa5   : > { %3022 = vadd.xlane.f32.xlu1 %v5004_v29 }
 0xaa6   : > { %3847 = shalt.err (!%p3844_p3)
}
 0xaa7   : > { %s3848_s24 = scalar_lea.hbm %s5075_s27, 768  ;;  %s3852_s7 = scalar_lea.hbm %s5201_s23, 1536 }
 0xaa8   : > { %p3849_p4 = scmp.ne.s32.totalorder %s5075_s27, %s3848_s24  ;;  %p3853_p9 = scmp.lt.s32.totalorder %s5075_s27, %s5201_s23 }
 0xaa9   : > { %p3854_p10 = scmp.lt.s32.totalorder %s3852_s7, %s3848_s24 }
 0xaaa   : > { %p3850_p7 = pnand %p3849_p4, %p4061_p5 }
 0xaab   : > { %p3855_p11 = por %p3854_p10, %p3853_p9 }
 0xaac   : > { %p3851_p8 = pneg %p3850_p7 }
 0xaae   : > { %p3856_p12 = pnand %p3855_p11, %p3851_p8 }
 0xab0   : > { %3859 = shalt.err (!%p3856_p12)
}
 0xab1   : > { %s3901_s28 = smov 128   ;;  %s3902_s29 = smov 8   ;;  %vm3031_vm12 = vcmp.eq.s32.totalorder %v4876_v6, 0  ;;  %vm3034_vm13 = vcmp.eq.s32.totalorder %v4876_v6, 1  ;;  %vm3038_vm14 = vcmp.eq.s32.totalorder %v4876_v6, 2  ;;  %vm3042_vm15 = vcmp.eq.s32.totalorder %v4876_v6, 3 }
 0xab2   : > { %3585 = dma.vmem_to_hbm [thread:$0]  (%p4061_p5), %s5070_s26, 768, %s5075_s27, %s5079_s25, %s3901_s28, %s3901_s28, %s3902_s29   ;;  %vm3046_vm0 = vcmp.eq.s32.totalorder %v4876_v6, 4  ;;  %vm3050_vm1 = vcmp.eq.s32.totalorder %v4876_v6, 5 }
 0xab3   : > { %s3573_s0 = spop %3572  ;;  %s5202_s20 = sld [smem:[#allocation21_spill]] }
 0xab4   : > { %s3575_s4 = spop %3574  ;;  %v3032_v43 = vstv %s3573_s0 }
 0xab5   : > { %v3035_v51 = vstv %s3575_s4  ;;  %v3033_v54 = vsel %vm3031_vm12, %v3032_v43, 0.0 }
 0xab6   : > { %v3036_v56 = vsel %vm3034_vm13, %v3035_v51, 0.0 }
 0xab7   : > { %v3037_v22 = vadd.f32 %v3036_v56, %v3033_v54 }
 0xab9   : > { %s781_s7 = scalar_lea.vmem %s5202_s20, %s4089_s1 }
 0xb28   : > { %v2889_v21 = vpop.xlane.xlu0 %2888 }
 0xb29   : > { %v2890_v50 = vrot.slane %v2889_v21, 4 }
 0xb2a   : > { %v2927_v29 = vpop.xlane.xlu1 %2926 }
 0xb2b   : > { %v2891_v15 = vadd.f32 %v2890_v50, %v2889_v21  ;;  %v2928_v20 = vrot.slane %v2927_v29, 4 }
 0xb2c   : > { %v2975_v28 = vpop.xlane.xlu0 %2974 }
 0xb2d   : > { %v2892_v31 = vrot.slane %v2891_v15, 2  ;;  %v2929_v24 = vadd.f32 %v2928_v20, %v2927_v29  ;;  %v2976_v3 = vrot.slane %v2975_v28, 4 }
 0xb2e   : > { %v3023_v40 = vpop.xlane.xlu1 %3022 }
 0xb2f   : > { %v2930_v47 = vrot.slane %v2929_v24, 2  ;;  %v2977_v34 = vadd.f32 %v2976_v3, %v2975_v28  ;;  %v3024_v32 = vrot.slane %v3023_v40, 4  ;;  %v2893_v12 = vadd.f32 %v2892_v31, %v2891_v15 }
 0xb31   : > { %v2978_v52 = vrot.slane %v2977_v34, 2  ;;  %v3025_v35 = vadd.f32 %v3024_v32, %v3023_v40  ;;  %v2894_v33 = vrot.slane %v2893_v12, 1  ;;  %v2931_v0 = vadd.f32 %v2930_v47, %v2929_v24 }
 0xb33   : > { %v2979_v23 = vadd.f32 %v2978_v52, %v2977_v34  ;;  %v3026_v45 = vrot.slane %v3025_v35, 2  ;;  %v2895_v37 = vadd.f32 %v2894_v33, %v2893_v12  ;;  %v2932_v48 = vrot.slane %v2931_v0, 1 }
 0xb35   : > { %v3027_v57 = vadd.f32 %v3026_v45, %v3025_v35  ;;  %3576 = vpush %v2895_v37  ;;  %v2933_v49 = vadd.f32 %v2932_v48, %v2931_v0  ;;  %v2980_v39 = vrot.slane %v2979_v23, 1 }
 0xb37   : > { %3578 = vpush %v2933_v49  ;;  %v2981_v61 = vadd.f32 %v2980_v39, %v2979_v23  ;;  %v3028_v42 = vrot.slane %v3027_v57, 1 }
 0xb39   : > { %3580 = vpush %v2981_v61  ;;  %v3029_v63 = vadd.f32 %v3028_v42, %v3027_v57 }
 0xb3b   : > { %3582 = vpush %v3029_v63 }
 0xb66   : > { %s3577_s26 = spop %3576 }
 0xb67   : > { %v3039_v58 = vstv %s3577_s26 }
 0xb68   : > { %v3040_v59 = vsel %vm3038_vm14, %v3039_v58, 0.0  ;;  %s3579_s27 = spop %3578 }
 0xb69   : > { %v3041_v26 = vadd.f32 %v3040_v59, %v3037_v22  ;;  %v3043_v60 = vstv %s3579_s27 }
 0xb6a   : > { %v3044_v17 = vsel %vm3042_vm15, %v3043_v60, 0.0  ;;  %s3581_s25 = spop %3580 }
 0xb6b   : > { %v3045_v62 = vadd.f32 %v3044_v17, %v3041_v26  ;;  %v3047_v27 = vstv %s3581_s25 }
 0xb6c   : > { %v3048_v2 = vsel %vm3046_vm0, %v3047_v27, 0.0  ;;  %s3583_s6 = spop %3582 }
 0xb6d   : > { %v3049_v16 = vadd.f32 %v3048_v2, %v3045_v62  ;;  %v3051_v30 = vstv %s3583_s6 }
 0xb6e   : > { %v3052_v1 = vsel %vm3050_vm1, %v3051_v30, 0.0 }
 0xb6f   : > { %v3053_v46 = vadd.f32 %v3052_v1, %v3049_v16 }
 0xb71   : > { %3054 = vst [vmem:[%s781_s7] sm:$0x1] %v3053_v46 }
 0xb72 PF: > { %s5203_s5 = sld [smem:[#allocation7_spill]] }
 0xb73   : > { %s5204_s28 = sld [smem:[#allocation5_spill]] }
 0xb78   : > { %p3591_p5 = scmp.ge.s32.totalorder %s5203_s5, 2 }
 0xb79   : > { %s3106_s0 = sand.u32 1, %s5204_s28  }
 0xb7a   : > { %p3588_p13 = pnand %p3591_p5, %p4065_p6  ;;  %s3107_s4 = scalar_lea.sflag [#allocation3], %s3106_s0 }
 0xb7c   : > { %p3589_p0 = pneg %p3588_p13 }
 0xb7e   : > { %3877 = dma.done.wait (%p3589_p0), %s3107_s4, 768  }
 0xb7f   : > { %3879 = vsyncadd (%p3589_p0), %s3107_s4, 4294966528  ;;  %s5206_s25 = sld [smem:[#allocation8_spill]]  ;;  %s5209_s4 = smov %s3886_s30 }
 0xb80   : > { %s5207_s26 = sld [smem:[#allocation6_spill]] }
 0xb81   : > { %s5208_s24 = sld [smem:[#allocation9_spill]] }
 0xb85   : > { %p34_p1 = scmp.ge.s32.totalorder %s5206_s25, 4  }
 0xb86   : > { %s5210_s30 = smov %s5207_s26 }
 0xb87   :  { %36 = sbr.rel (!%p34_p1) target bundleno = 14 (0xe), region = 177 }
 0xb8c   :  { %3134 = vsyncpa [#allocation3], 1 }
 0xb8d   :  { %3136 = vsyncpa [#allocation3 + $0x1], 1 }

</bundles_post_ra>
